<compile_context>
chip_gen: v7x
topology: tpu7x:2x2x1
jax: 0.10.0
libtpu: 0.0.40
codegen_flags: <defaults>
</compile_context>

<pallas_src>
import jax
import jax.numpy as jnp
from jax import lax
from jax.experimental import pallas as pl
from jax.experimental.pallas import tpu as pltpu


H = 16
W = 16
_EPS = 1e-5
_LANE = 128      # TPU lane width: batch lives in the lane dimension
_MAX_TB = 512    # cap per-step batch block (keeps >=2 grid steps for large N)


def _round_up(a, b):
    return ((a + b - 1) // b) * b


# ----------------------------------------------------------------------------
# Fused Bottleneck kernel, batch-in-lanes layout.
#   x_ref  : (H, W, TB)  VMEM   TB images, batch along the 128-lane axis
#   w_ref  : (27,)       SMEM   BN-scale-folded 3x3 weights, idx = stage*9+kh*3+kw
#   b_ref  : (3,)        SMEM   BN-folded bias per conv stage
#   out_ref: (H, W, TB)  VMEM
# The whole Bottleneck (3 convs + folded BN + residual + ReLUs) runs on
# register values; intermediates never touch VMEM or HBM.
# ----------------------------------------------------------------------------
def _fused_bottleneck_kernel(x_ref, w_ref, b_ref, out_ref):
    Hk, Wk, TBk = x_ref.shape
    x = x_ref[...]                                  # (H, W, TB) f32
    identity = x                                    # inplanes == planes == 1

    # Hoisted zero slabs shared by all stages / taps.
    zrow = jnp.zeros((1, Wk, TBk), jnp.float32)
    zcol = jnp.zeros((Hk, 1, TBk), jnp.float32)

    def shift_h(a, dh):                             # result[h] = a[h+dh], zero OOB
        if dh == 0:
            return a
        if dh > 0:
            return jnp.concatenate([a[1:], zrow], axis=0)
        return jnp.concatenate([zrow, a[:-1]], axis=0)

    def shift_w(a, dw):                             # result[:, w] = a[:, w+dw], zero OOB
        if dw == 0:
            return a
        if dw > 0:
            return jnp.concatenate([a[:, 1:], zcol], axis=1)
        return jnp.concatenate([zcol, a[:, :-1]], axis=1)

    def conv_stage(h, stage):
        # conv3x3 (pad=1, stride=1, Cin=Cout=1) as a 9-tap VPU stencil.
        # BN scale is already folded into the weights; only the bias remains.
        wgt = [w_ref[stage * 9 + i] for i in range(9)]   # SMEM scalars, hoisted
        cols = [shift_w(h, dw) for dw in (-1, 0, 1)]     # 2 W-shifts per stage
        acc = None
        for kh in range(3):
            for kw in range(3):
                tap = shift_h(cols[kw], kh - 1)          # leading-dim shift: cheap
                term = wgt[kh * 3 + kw] * tap
                acc = term if acc is None else acc + term
        return acc + b_ref[stage]

    h = jnp.maximum(conv_stage(x, 0), 0.0)               # conv1 + bn1 + relu
    h = jnp.maximum(conv_stage(h, 1), 0.0)               # conv2 + bn2 + relu
    out_ref[...] = jnp.maximum(conv_stage(h, 2) + identity, 0.0)  # conv3+bn3+res+relu


def bottleneck_fused(x_hwn, w_all, b_all, tb):
    """x_hwn: (H, W, Npad) f32, Npad % tb == 0, tb % 128 == 0."""
    Hi, Wi, Np = x_hwn.shape
    return pl.pallas_call(
        _fused_bottleneck_kernel,
        out_shape=jax.ShapeDtypeStruct((Hi, Wi, Np), jnp.float32),
        grid_spec=pltpu.PrefetchScalarGridSpec(
            num_scalar_prefetch=0,
            grid=(Np // tb,),
            in_specs=[
                pl.BlockSpec((Hi, Wi, tb), lambda n: (0, 0, n)),
                pl.BlockSpec(memory_space=pltpu.MemorySpace.SMEM),  # weights (27,)
                pl.BlockSpec(memory_space=pltpu.MemorySpace.SMEM),  # biases  (3,)
            ],
            out_specs=pl.BlockSpec((Hi, Wi, tb), lambda n: (0, 0, n)),
        ),
        compiler_params=pltpu.CompilerParams(
            dimension_semantics=("parallel",)),   # batch blocks shard over TCs (v7x)
    )(x_hwn, w_all, b_all)


# ----------------------------------------------------------------------------
# Parameters + BN folding (inference mode, running stats).
# ----------------------------------------------------------------------------
def init_bottleneck_params(key):
    ks = jax.random.split(key, 9)
    p = {}
    for i in range(3):
        p[f"w{i + 1}"] = 0.3 * jax.random.normal(ks[i], (3, 3), jnp.float32)
        p[f"gamma{i + 1}"] = 1.0 + 0.05 * jax.random.normal(ks[3 + i], (), jnp.float32)
        p[f"beta{i + 1}"] = 0.05 * jax.random.normal(ks[6 + i], (), jnp.float32)
        p[f"mean{i + 1}"] = jnp.zeros((), jnp.float32)
        p[f"var{i + 1}"] = jnp.ones((), jnp.float32)
    return p


def _fold_bottleneck(p, eps=_EPS):
    """Fold BN scale into the 3x3 weights; return (27,) weights and (3,) biases."""
    ws, bs = [], []
    for i in (1, 2, 3):
        scale = p[f"gamma{i}"] / jnp.sqrt(p[f"var{i}"] + eps)   # scalar (planes == 1)
        ws.append((p[f"w{i}"] * scale).reshape(9))
        bs.append((p[f"beta{i}"] - p[f"mean{i}"] * scale).reshape(1))
    return (jnp.concatenate(ws).astype(jnp.float32),
            jnp.concatenate(bs).astype(jnp.float32))


# ----------------------------------------------------------------------------
# TemResGen forward
# ----------------------------------------------------------------------------
@jax.jit
def tem_res_gen_forward(x_nchw, params):
    # Reference forward computes res1(input) then overwrites it with
    # res2(input); the result is exactly res2(input), so res1 is skipped.
    N, C, Hi, Wi = x_nchw.shape
    assert C == 1
    # Batch-in-lanes layout: (N, 1, H, W) -> (H, W, N), pad N to a lane-dense block.
    x = jnp.transpose(x_nchw[:, 0, :, :], (1, 2, 0)).astype(jnp.float32)
    tb = min(_MAX_TB, _round_up(N, _LANE))
    npad = _round_up(N, tb)
    x = jnp.pad(x, ((0, 0), (0, 0), (0, npad - N)))
    w_all, b_all = _fold_bottleneck(params["res2"])
    out = bottleneck_fused(x, w_all, b_all, tb)            # (H, W, Npad)
    out = jnp.transpose(out[:, :, :N], (2, 0, 1))          # (N, H, W)
    return out[:, None, :, :]                              # back to NCHW


# ----------------------------------------------------------------------------
# Pure-JAX reference (lax.conv), implementing the forward literally.
# ----------------------------------------------------------------------------
def _ref_forward(x_nchw, params, eps=_EPS):
    x = jnp.transpose(x_nchw, (0, 2, 3, 1)).astype(jnp.float32)   # NHWC

    def conv(h, w_hw):
        return lax.conv_general_dilated(
            h, w_hw.reshape(3, 3, 1, 1), window_strides=(1, 1), padding="SAME",
            dimension_numbers=("NHWC", "HWIO", "NHWC"))

    def bottleneck(h, p):
        ident = h
        for i in (1, 2, 3):
            scale = p[f"gamma{i}"] / jnp.sqrt(p[f"var{i}"] + eps)
            bias = p[f"beta{i}"] - p[f"mean{i}"] * scale
            h = conv(h, p[f"w{i}"]) * scale + bias
            if i < 3:
                h = jnp.maximum(h, 0.0)
        return jnp.maximum(h + ident, 0.0)

    y = bottleneck(x, params["res1"])      # overwritten, exactly as in the module
    y = bottleneck(x, params["res2"])
    return jnp.transpose(y, (0, 3, 1, 2))


if __name__ == "__main__":
    key = jax.random.PRNGKey(0)
    kx, k1, k2, kx2 = jax.random.split(key, 4)

    params = {"res1": init_bottleneck_params(k1),
              "res2": init_bottleneck_params(k2)}

    # Small test: batch 2 (padded to one 128-lane block, grid = 1).
    N = 2
    x = jax.random.normal(kx, (N, 1, H, W), jnp.float32)   # NCHW, as in PyTorch
    out = jax.block_until_ready(tem_res_gen_forward(x, params))
    ref = jax.block_until_ready(_ref_forward(x, params))
    assert out.shape == (N, 1, H, W)
    assert jnp.allclose(out, ref, rtol=1e-4, atol=1e-4)

    # Larger test: exercises multi-step grid (TB=512, grid=2) and batch padding.
    N2 = 600
    x2 = jax.random.normal(kx2, (N2, 1, H, W), jnp.float32)
    out2 = jax.block_until_ready(tem_res_gen_forward(x2, params))
    ref2 = jax.block_until_ready(_ref_forward(x2, params))
    assert out2.shape == (N2, 1, H, W)
    assert jnp.allclose(out2, ref2, rtol=1e-4, atol=1e-4)

    print("KERNEL_OK")
</pallas_src>

<mosaic_0001>
module attributes {stable_mosaic.version = 11 : i64} {
  func.func @_fused_bottleneck_kernel(%arg0: i32, %arg1: memref<16x16x128xf32, #tpu.memory_space<vmem>>, %arg2: memref<27xf32, #tpu.memory_space<smem>>, %arg3: memref<3xf32, #tpu.memory_space<smem>>, %arg4: memref<16x16x128xf32, #tpu.memory_space<vmem>>) attributes {dimension_semantics = [#tpu.dimension_semantics<parallel>], iteration_bounds = array<i64: 1>, scalar_prefetch = 0 : i64, scratch_operands = 0 : i64, tpu.core_type = #tpu.core_type<tc>, window_params = [{transform_indices = @transform_0, window_bounds = array<i64: 16, 16, 128>}, {transform_indices = @transform_1, window_bounds = array<i64: 27>}, {transform_indices = @transform_2, window_bounds = array<i64: 3>}, {transform_indices = @transform_3, window_bounds = array<i64: 16, 16, 128>}]} {
    %c0 = arith.constant 0 : index
    %c0_0 = arith.constant 0 : index
    %c0_1 = arith.constant 0 : index
    %0 = vector.load %arg1[%c0, %c0_0, %c0_1] : memref<16x16x128xf32, #tpu.memory_space<vmem>>, vector<16x16x128xf32>
    %cst = arith.constant 0.000000e+00 : f32
    %1 = vector.broadcast %cst : f32 to vector<1x16x128xf32>
    %cst_2 = arith.constant 0.000000e+00 : f32
    %2 = vector.broadcast %cst_2 : f32 to vector<16x1x128xf32>
    %c0_3 = arith.constant 0 : index
    %3 = memref.load %arg2[%c0_3] : memref<27xf32, #tpu.memory_space<smem>>
    %c1 = arith.constant 1 : index
    %4 = memref.load %arg2[%c1] : memref<27xf32, #tpu.memory_space<smem>>
    %c2 = arith.constant 2 : index
    %5 = memref.load %arg2[%c2] : memref<27xf32, #tpu.memory_space<smem>>
    %c3 = arith.constant 3 : index
    %6 = memref.load %arg2[%c3] : memref<27xf32, #tpu.memory_space<smem>>
    %c4 = arith.constant 4 : index
    %7 = memref.load %arg2[%c4] : memref<27xf32, #tpu.memory_space<smem>>
    %c5 = arith.constant 5 : index
    %8 = memref.load %arg2[%c5] : memref<27xf32, #tpu.memory_space<smem>>
    %c6 = arith.constant 6 : index
    %9 = memref.load %arg2[%c6] : memref<27xf32, #tpu.memory_space<smem>>
    %c7 = arith.constant 7 : index
    %10 = memref.load %arg2[%c7] : memref<27xf32, #tpu.memory_space<smem>>
    %c8 = arith.constant 8 : index
    %11 = memref.load %arg2[%c8] : memref<27xf32, #tpu.memory_space<smem>>
    %12 = vector.extract_strided_slice %0 {offsets = [0, 0, 0], sizes = [16, 15, 128], strides = [1, 1, 1]} : vector<16x16x128xf32> to vector<16x15x128xf32>
    %13 = tpu.concatenate %2, %12 in 1 : vector<16x1x128xf32>, vector<16x15x128xf32> -> vector<16x16x128xf32>
    %14 = vector.extract_strided_slice %0 {offsets = [0, 1, 0], sizes = [16, 15, 128], strides = [1, 1, 1]} : vector<16x16x128xf32> to vector<16x15x128xf32>
    %15 = tpu.concatenate %14, %2 in 1 : vector<16x15x128xf32>, vector<16x1x128xf32> -> vector<16x16x128xf32>
    %16 = vector.extract_strided_slice %13 {offsets = [0, 0, 0], sizes = [15, 16, 128], strides = [1, 1, 1]} : vector<16x16x128xf32> to vector<15x16x128xf32>
    %17 = tpu.concatenate %1, %16 in 0 : vector<1x16x128xf32>, vector<15x16x128xf32> -> vector<16x16x128xf32>
    %18 = vector.broadcast %3 : f32 to vector<16x16x128xf32>
    %19 = arith.mulf %18, %17 : vector<16x16x128xf32>
    %20 = vector.extract_strided_slice %0 {offsets = [0, 0, 0], sizes = [15, 16, 128], strides = [1, 1, 1]} : vector<16x16x128xf32> to vector<15x16x128xf32>
    %21 = tpu.concatenate %1, %20 in 0 : vector<1x16x128xf32>, vector<15x16x128xf32> -> vector<16x16x128xf32>
    %22 = vector.broadcast %4 : f32 to vector<16x16x128xf32>
    %23 = arith.mulf %22, %21 : vector<16x16x128xf32>
    %24 = arith.addf %19, %23 : vector<16x16x128xf32>
    %25 = vector.extract_strided_slice %15 {offsets = [0, 0, 0], sizes = [15, 16, 128], strides = [1, 1, 1]} : vector<16x16x128xf32> to vector<15x16x128xf32>
    %26 = tpu.concatenate %1, %25 in 0 : vector<1x16x128xf32>, vector<15x16x128xf32> -> vector<16x16x128xf32>
    %27 = vector.broadcast %5 : f32 to vector<16x16x128xf32>
    %28 = arith.mulf %27, %26 : vector<16x16x128xf32>
    %29 = arith.addf %24, %28 : vector<16x16x128xf32>
    %30 = vector.broadcast %6 : f32 to vector<16x16x128xf32>
    %31 = arith.mulf %30, %13 : vector<16x16x128xf32>
    %32 = arith.addf %29, %31 : vector<16x16x128xf32>
    %33 = vector.broadcast %7 : f32 to vector<16x16x128xf32>
    %34 = arith.mulf %33, %0 : vector<16x16x128xf32>
    %35 = arith.addf %32, %34 : vector<16x16x128xf32>
    %36 = vector.broadcast %8 : f32 to vector<16x16x128xf32>
    %37 = arith.mulf %36, %15 : vector<16x16x128xf32>
    %38 = arith.addf %35, %37 : vector<16x16x128xf32>
    %39 = vector.extract_strided_slice %13 {offsets = [1, 0, 0], sizes = [15, 16, 128], strides = [1, 1, 1]} : vector<16x16x128xf32> to vector<15x16x128xf32>
    %40 = tpu.concatenate %39, %1 in 0 : vector<15x16x128xf32>, vector<1x16x128xf32> -> vector<16x16x128xf32>
    %41 = vector.broadcast %9 : f32 to vector<16x16x128xf32>
    %42 = arith.mulf %41, %40 : vector<16x16x128xf32>
    %43 = arith.addf %38, %42 : vector<16x16x128xf32>
    %44 = vector.extract_strided_slice %0 {offsets = [1, 0, 0], sizes = [15, 16, 128], strides = [1, 1, 1]} : vector<16x16x128xf32> to vector<15x16x128xf32>
    %45 = tpu.concatenate %44, %1 in 0 : vector<15x16x128xf32>, vector<1x16x128xf32> -> vector<16x16x128xf32>
    %46 = vector.broadcast %10 : f32 to vector<16x16x128xf32>
    %47 = arith.mulf %46, %45 : vector<16x16x128xf32>
    %48 = arith.addf %43, %47 : vector<16x16x128xf32>
    %49 = vector.extract_strided_slice %15 {offsets = [1, 0, 0], sizes = [15, 16, 128], strides = [1, 1, 1]} : vector<16x16x128xf32> to vector<15x16x128xf32>
    %50 = tpu.concatenate %49, %1 in 0 : vector<15x16x128xf32>, vector<1x16x128xf32> -> vector<16x16x128xf32>
    %51 = vector.broadcast %11 : f32 to vector<16x16x128xf32>
    %52 = arith.mulf %51, %50 : vector<16x16x128xf32>
    %53 = arith.addf %48, %52 : vector<16x16x128xf32>
    %c0_4 = arith.constant 0 : index
    %54 = memref.load %arg3[%c0_4] : memref<3xf32, #tpu.memory_space<smem>>
    %55 = vector.broadcast %54 : f32 to vector<16x16x128xf32>
    %56 = arith.addf %53, %55 : vector<16x16x128xf32>
    %cst_5 = arith.constant 0.000000e+00 : f32
    %57 = vector.broadcast %cst_5 : f32 to vector<16x16x128xf32>
    %58 = arith.maximumf %56, %57 : vector<16x16x128xf32>
    %c9 = arith.constant 9 : index
    %59 = memref.load %arg2[%c9] : memref<27xf32, #tpu.memory_space<smem>>
    %c10 = arith.constant 10 : index
    %60 = memref.load %arg2[%c10] : memref<27xf32, #tpu.memory_space<smem>>
    %c11 = arith.constant 11 : index
    %61 = memref.load %arg2[%c11] : memref<27xf32, #tpu.memory_space<smem>>
    %c12 = arith.constant 12 : index
    %62 = memref.load %arg2[%c12] : memref<27xf32, #tpu.memory_space<smem>>
    %c13 = arith.constant 13 : index
    %63 = memref.load %arg2[%c13] : memref<27xf32, #tpu.memory_space<smem>>
    %c14 = arith.constant 14 : index
    %64 = memref.load %arg2[%c14] : memref<27xf32, #tpu.memory_space<smem>>
    %c15 = arith.constant 15 : index
    %65 = memref.load %arg2[%c15] : memref<27xf32, #tpu.memory_space<smem>>
    %c16 = arith.constant 16 : index
    %66 = memref.load %arg2[%c16] : memref<27xf32, #tpu.memory_space<smem>>
    %c17 = arith.constant 17 : index
    %67 = memref.load %arg2[%c17] : memref<27xf32, #tpu.memory_space<smem>>
    %68 = vector.extract_strided_slice %58 {offsets = [0, 0, 0], sizes = [16, 15, 128], strides = [1, 1, 1]} : vector<16x16x128xf32> to vector<16x15x128xf32>
    %69 = tpu.concatenate %2, %68 in 1 : vector<16x1x128xf32>, vector<16x15x128xf32> -> vector<16x16x128xf32>
    %70 = vector.extract_strided_slice %58 {offsets = [0, 1, 0], sizes = [16, 15, 128], strides = [1, 1, 1]} : vector<16x16x128xf32> to vector<16x15x128xf32>
    %71 = tpu.concatenate %70, %2 in 1 : vector<16x15x128xf32>, vector<16x1x128xf32> -> vector<16x16x128xf32>
    %72 = vector.extract_strided_slice %69 {offsets = [0, 0, 0], sizes = [15, 16, 128], strides = [1, 1, 1]} : vector<16x16x128xf32> to vector<15x16x128xf32>
    %73 = tpu.concatenate %1, %72 in 0 : vector<1x16x128xf32>, vector<15x16x128xf32> -> vector<16x16x128xf32>
    %74 = vector.broadcast %59 : f32 to vector<16x16x128xf32>
    %75 = arith.mulf %74, %73 : vector<16x16x128xf32>
    %76 = vector.extract_strided_slice %58 {offsets = [0, 0, 0], sizes = [15, 16, 128], strides = [1, 1, 1]} : vector<16x16x128xf32> to vector<15x16x128xf32>
    %77 = tpu.concatenate %1, %76 in 0 : vector<1x16x128xf32>, vector<15x16x128xf32> -> vector<16x16x128xf32>
    %78 = vector.broadcast %60 : f32 to vector<16x16x128xf32>
    %79 = arith.mulf %78, %77 : vector<16x16x128xf32>
    %80 = arith.addf %75, %79 : vector<16x16x128xf32>
    %81 = vector.extract_strided_slice %71 {offsets = [0, 0, 0], sizes = [15, 16, 128], strides = [1, 1, 1]} : vector<16x16x128xf32> to vector<15x16x128xf32>
    %82 = tpu.concatenate %1, %81 in 0 : vector<1x16x128xf32>, vector<15x16x128xf32> -> vector<16x16x128xf32>
    %83 = vector.broadcast %61 : f32 to vector<16x16x128xf32>
    %84 = arith.mulf %83, %82 : vector<16x16x128xf32>
    %85 = arith.addf %80, %84 : vector<16x16x128xf32>
    %86 = vector.broadcast %62 : f32 to vector<16x16x128xf32>
    %87 = arith.mulf %86, %69 : vector<16x16x128xf32>
    %88 = arith.addf %85, %87 : vector<16x16x128xf32>
    %89 = vector.broadcast %63 : f32 to vector<16x16x128xf32>
    %90 = arith.mulf %89, %58 : vector<16x16x128xf32>
    %91 = arith.addf %88, %90 : vector<16x16x128xf32>
    %92 = vector.broadcast %64 : f32 to vector<16x16x128xf32>
    %93 = arith.mulf %92, %71 : vector<16x16x128xf32>
    %94 = arith.addf %91, %93 : vector<16x16x128xf32>
    %95 = vector.extract_strided_slice %69 {offsets = [1, 0, 0], sizes = [15, 16, 128], strides = [1, 1, 1]} : vector<16x16x128xf32> to vector<15x16x128xf32>
    %96 = tpu.concatenate %95, %1 in 0 : vector<15x16x128xf32>, vector<1x16x128xf32> -> vector<16x16x128xf32>
    %97 = vector.broadcast %65 : f32 to vector<16x16x128xf32>
    %98 = arith.mulf %97, %96 : vector<16x16x128xf32>
    %99 = arith.addf %94, %98 : vector<16x16x128xf32>
    %100 = vector.extract_strided_slice %58 {offsets = [1, 0, 0], sizes = [15, 16, 128], strides = [1, 1, 1]} : vector<16x16x128xf32> to vector<15x16x128xf32>
    %101 = tpu.concatenate %100, %1 in 0 : vector<15x16x128xf32>, vector<1x16x128xf32> -> vector<16x16x128xf32>
    %102 = vector.broadcast %66 : f32 to vector<16x16x128xf32>
    %103 = arith.mulf %102, %101 : vector<16x16x128xf32>
    %104 = arith.addf %99, %103 : vector<16x16x128xf32>
    %105 = vector.extract_strided_slice %71 {offsets = [1, 0, 0], sizes = [15, 16, 128], strides = [1, 1, 1]} : vector<16x16x128xf32> to vector<15x16x128xf32>
    %106 = tpu.concatenate %105, %1 in 0 : vector<15x16x128xf32>, vector<1x16x128xf32> -> vector<16x16x128xf32>
    %107 = vector.broadcast %67 : f32 to vector<16x16x128xf32>
    %108 = arith.mulf %107, %106 : vector<16x16x128xf32>
    %109 = arith.addf %104, %108 : vector<16x16x128xf32>
    %c1_6 = arith.constant 1 : index
    %110 = memref.load %arg3[%c1_6] : memref<3xf32, #tpu.memory_space<smem>>
    %111 = vector.broadcast %110 : f32 to vector<16x16x128xf32>
    %112 = arith.addf %109, %111 : vector<16x16x128xf32>
    %cst_7 = arith.constant 0.000000e+00 : f32
    %113 = vector.broadcast %cst_7 : f32 to vector<16x16x128xf32>
    %114 = arith.maximumf %112, %113 : vector<16x16x128xf32>
    %c18 = arith.constant 18 : index
    %115 = memref.load %arg2[%c18] : memref<27xf32, #tpu.memory_space<smem>>
    %c19 = arith.constant 19 : index
    %116 = memref.load %arg2[%c19] : memref<27xf32, #tpu.memory_space<smem>>
    %c20 = arith.constant 20 : index
    %117 = memref.load %arg2[%c20] : memref<27xf32, #tpu.memory_space<smem>>
    %c21 = arith.constant 21 : index
    %118 = memref.load %arg2[%c21] : memref<27xf32, #tpu.memory_space<smem>>
    %c22 = arith.constant 22 : index
    %119 = memref.load %arg2[%c22] : memref<27xf32, #tpu.memory_space<smem>>
    %c23 = arith.constant 23 : index
    %120 = memref.load %arg2[%c23] : memref<27xf32, #tpu.memory_space<smem>>
    %c24 = arith.constant 24 : index
    %121 = memref.load %arg2[%c24] : memref<27xf32, #tpu.memory_space<smem>>
    %c25 = arith.constant 25 : index
    %122 = memref.load %arg2[%c25] : memref<27xf32, #tpu.memory_space<smem>>
    %c26 = arith.constant 26 : index
    %123 = memref.load %arg2[%c26] : memref<27xf32, #tpu.memory_space<smem>>
    %124 = vector.extract_strided_slice %114 {offsets = [0, 0, 0], sizes = [16, 15, 128], strides = [1, 1, 1]} : vector<16x16x128xf32> to vector<16x15x128xf32>
    %125 = tpu.concatenate %2, %124 in 1 : vector<16x1x128xf32>, vector<16x15x128xf32> -> vector<16x16x128xf32>
    %126 = vector.extract_strided_slice %114 {offsets = [0, 1, 0], sizes = [16, 15, 128], strides = [1, 1, 1]} : vector<16x16x128xf32> to vector<16x15x128xf32>
    %127 = tpu.concatenate %126, %2 in 1 : vector<16x15x128xf32>, vector<16x1x128xf32> -> vector<16x16x128xf32>
    %128 = vector.extract_strided_slice %125 {offsets = [0, 0, 0], sizes = [15, 16, 128], strides = [1, 1, 1]} : vector<16x16x128xf32> to vector<15x16x128xf32>
    %129 = tpu.concatenate %1, %128 in 0 : vector<1x16x128xf32>, vector<15x16x128xf32> -> vector<16x16x128xf32>
    %130 = vector.broadcast %115 : f32 to vector<16x16x128xf32>
    %131 = arith.mulf %130, %129 : vector<16x16x128xf32>
    %132 = vector.extract_strided_slice %114 {offsets = [0, 0, 0], sizes = [15, 16, 128], strides = [1, 1, 1]} : vector<16x16x128xf32> to vector<15x16x128xf32>
    %133 = tpu.concatenate %1, %132 in 0 : vector<1x16x128xf32>, vector<15x16x128xf32> -> vector<16x16x128xf32>
    %134 = vector.broadcast %116 : f32 to vector<16x16x128xf32>
    %135 = arith.mulf %134, %133 : vector<16x16x128xf32>
    %136 = arith.addf %131, %135 : vector<16x16x128xf32>
    %137 = vector.extract_strided_slice %127 {offsets = [0, 0, 0], sizes = [15, 16, 128], strides = [1, 1, 1]} : vector<16x16x128xf32> to vector<15x16x128xf32>
    %138 = tpu.concatenate %1, %137 in 0 : vector<1x16x128xf32>, vector<15x16x128xf32> -> vector<16x16x128xf32>
    %139 = vector.broadcast %117 : f32 to vector<16x16x128xf32>
    %140 = arith.mulf %139, %138 : vector<16x16x128xf32>
    %141 = arith.addf %136, %140 : vector<16x16x128xf32>
    %142 = vector.broadcast %118 : f32 to vector<16x16x128xf32>
    %143 = arith.mulf %142, %125 : vector<16x16x128xf32>
    %144 = arith.addf %141, %143 : vector<16x16x128xf32>
    %145 = vector.broadcast %119 : f32 to vector<16x16x128xf32>
    %146 = arith.mulf %145, %114 : vector<16x16x128xf32>
    %147 = arith.addf %144, %146 : vector<16x16x128xf32>
    %148 = vector.broadcast %120 : f32 to vector<16x16x128xf32>
    %149 = arith.mulf %148, %127 : vector<16x16x128xf32>
    %150 = arith.addf %147, %149 : vector<16x16x128xf32>
    %151 = vector.extract_strided_slice %125 {offsets = [1, 0, 0], sizes = [15, 16, 128], strides = [1, 1, 1]} : vector<16x16x128xf32> to vector<15x16x128xf32>
    %152 = tpu.concatenate %151, %1 in 0 : vector<15x16x128xf32>, vector<1x16x128xf32> -> vector<16x16x128xf32>
    %153 = vector.broadcast %121 : f32 to vector<16x16x128xf32>
    %154 = arith.mulf %153, %152 : vector<16x16x128xf32>
    %155 = arith.addf %150, %154 : vector<16x16x128xf32>
    %156 = vector.extract_strided_slice %114 {offsets = [1, 0, 0], sizes = [15, 16, 128], strides = [1, 1, 1]} : vector<16x16x128xf32> to vector<15x16x128xf32>
    %157 = tpu.concatenate %156, %1 in 0 : vector<15x16x128xf32>, vector<1x16x128xf32> -> vector<16x16x128xf32>
    %158 = vector.broadcast %122 : f32 to vector<16x16x128xf32>
    %159 = arith.mulf %158, %157 : vector<16x16x128xf32>
    %160 = arith.addf %155, %159 : vector<16x16x128xf32>
    %161 = vector.extract_strided_slice %127 {offsets = [1, 0, 0], sizes = [15, 16, 128], strides = [1, 1, 1]} : vector<16x16x128xf32> to vector<15x16x128xf32>
    %162 = tpu.concatenate %161, %1 in 0 : vector<15x16x128xf32>, vector<1x16x128xf32> -> vector<16x16x128xf32>
    %163 = vector.broadcast %123 : f32 to vector<16x16x128xf32>
    %164 = arith.mulf %163, %162 : vector<16x16x128xf32>
    %165 = arith.addf %160, %164 : vector<16x16x128xf32>
    %c2_8 = arith.constant 2 : index
    %166 = memref.load %arg3[%c2_8] : memref<3xf32, #tpu.memory_space<smem>>
    %167 = vector.broadcast %166 : f32 to vector<16x16x128xf32>
    %168 = arith.addf %165, %167 : vector<16x16x128xf32>
    %169 = arith.addf %168, %0 : vector<16x16x128xf32>
    %cst_9 = arith.constant 0.000000e+00 : f32
    %170 = vector.broadcast %cst_9 : f32 to vector<16x16x128xf32>
    %171 = arith.maximumf %169, %170 : vector<16x16x128xf32>
    %c0_10 = arith.constant 0 : index
    %c0_11 = arith.constant 0 : index
    %c0_12 = arith.constant 0 : index
    %172 = vector.load %arg4[%c0_10, %c0_11, %c0_12] : memref<16x16x128xf32, #tpu.memory_space<vmem>>, vector<16x16x128xf32>
    tpu.vector_store %arg4[%c0_10, %c0_11, %c0_12], %171 {strides = array<i32>} : memref<16x16x128xf32, #tpu.memory_space<vmem>>, vector<16x16x128xf32>,
    return
  }
  func.func @transform_0(%arg0: i32) -> (i32, i32, i32) {
    %c0_i32 = arith.constant 0 : i32
    %c0_i32_0 = arith.constant 0 : i32
    %c0_i32_1 = arith.constant 0 : i32
    return %c0_i32, %c0_i32_0, %arg0 : i32, i32, i32
  }
  func.func @transform_1(%arg0: i32) -> i32 {
    %c0_i32 = arith.constant 0 : i32
    %c0_i32_0 = arith.constant 0 : i32
    return %c0_i32 : i32
  }
  func.func @transform_2(%arg0: i32) -> i32 {
    %c0_i32 = arith.constant 0 : i32
    %c0_i32_0 = arith.constant 0 : i32
    return %c0_i32 : i32
  }
  func.func @transform_3(%arg0: i32) -> (i32, i32, i32) {
    %c0_i32 = arith.constant 0 : i32
    %c0_i32_0 = arith.constant 0 : i32
    %c0_i32_1 = arith.constant 0 : i32
    return %c0_i32, %c0_i32_0, %arg0 : i32, i32, i32
  }
}

</mosaic_0001>

<bundles_post_ra>
// kernel: tem_res_gen_forward.1
= control target key start
LH: loop header
LB: loop body
LE: loop exit
PB: predicated region body
PF: predicated region fallthrough
CT: control target
= control target key end

     0   :  { %8 = vsyncpa [#allocation3], 0  ;;  %s7748_s0 = inlined_call_operand.vmem [shape: f32[16,16,128], index: 0, kind: input, shape index: {}]   ;;  %s7749_s1 = inlined_call_operand.vmem [shape: f32[27], index: 1, kind: input, shape index: {}]   ;;  %s7750_s2 = inlined_call_operand.vmem [shape: f32[3], index: 2, kind: input, shape index: {}]   ;;  %s7751_s3 = inlined_call_operand.vmem [shape: f32[16,16,128], index: 3, kind: output, shape index: {}]  }
   0x1   :  { %s18_s14 = sshll.u32 %s7749_s1, 4  ;;  %s19_s14 = int_to_ptr.vmem [resolvable:$true] %s18_s14 }
   0x2   :  { %9 = vsyncpa [#allocation5], 0  ;;  %s28_s17 = sshll.u32 %s7750_s2, 4  ;;  %s2767_s18 = scalar_lea.vmem %s19_s14, 16  ;;  %s29_s17 = int_to_ptr.vmem [resolvable:$true] %s28_s17 }
   0x3   :  { %p2768_p0 = scmp.ne.s32.totalorder %s19_s14, %s2767_s18  ;;  %p2772_p1 = scmp.lt.s32.totalorder %s19_s14, %s19_s14 }
   0x4   :  { %p2773_p2 = scmp.lt.s32.totalorder %s2767_s18, %s2767_s18 }
   0x6   :  { %p2774_p3 = por %p2773_p2, %p2772_p1 }
   0x8   :  { %p2775_p4 = pnand %p2774_p3, %p2768_p0 }
   0xa   :  { %2778 = shalt.err (!%p2775_p4)
}
   0xb   :  { %s2795_s19 = smov [#allocation2]   ;;  %s2779_s20 = scalar_lea.vmem %s29_s17, 16 }
   0xc   :  { %21 = dma.vmem_to_smem %s19_s14, 16, %s2795_s19, [#allocation3]  }
   0xd   :  { %p2780_p5 = scmp.ne.s32.totalorder %s29_s17, %s2779_s20  ;;  %p2784_p6 = scmp.lt.s32.totalorder %s29_s17, %s29_s17 }
   0xe   :  { %p2785_p7 = scmp.lt.s32.totalorder %s2779_s20, %s2779_s20 }
  0x10   :  { %p2786_p8 = por %p2785_p7, %p2784_p6 }
  0x12   :  { %p2787_p9 = pnand %p2786_p8, %p2780_p5 }
  0x14   :  { %2790 = shalt.err (!%p2787_p9)
}
  0x15   :  { %s2796_s1 = smov [#allocation4]  }
  0x16   :  { %31 = dma.vmem_to_smem %s29_s17, 16, %s2796_s1, [#allocation5]  }
  0x17   :  { %2791 = dma.done.wait [#allocation3], 16  }
  0x18   :  { %2792 = vsyncadd [#allocation3], 4294967280 }
  0x19   :  { %2793 = dma.done.wait [#allocation5], 16  }
  0x1a   :  { %2794 = vsyncadd [#allocation5], 4294967280 }
  0x1b   :  { %38 = sfence }
  0x1c   :  { %v2826_v0 = vld [vmem:[%s7748_s0] sm:$0xff]  ;;  %v2831_v1 = vld [vmem:[%s7748_s0 + $0x8] sm:$0xff]  ;;  %v2836_v2 = vld [vmem:[%s7748_s0 + $0x10] sm:$0xff]  ;;  %s71_s26 = sld [smem:[#allocation2]]  ;;  %s2675_s29 = sld [smem:[#allocation2 + $0x1]]  ;;  %vm112_vm0 = vcmask 1040384  }
  0x1d   :  { %8195 = vst [vmem:[#allocation8_spill] sm:$0xff] %v2826_v0  ;;  %8196 = vst [vmem:[#allocation9_spill] sm:$0xff] %v2831_v1  ;;  %v2841_v3 = vld [vmem:[%s7748_s0 + $0x18] sm:$0xff]  ;;  %v7755_v4 = vrot.slane %v2826_v0, 7  ;;  %v2847_v5 = vld [vmem:[%s7748_s0 + $0x20] sm:$0xff]  ;;  %v114_v6 = vrot.slane %v2831_v1, 7 }
  0x1e   :  { %8197 = vst [vmem:[#allocation10_spill] sm:$0xff] %v2836_v2  ;;  %8198 = vst [vmem:[#allocation11_spill] sm:$0xff] %v2841_v3  ;;  %v2853_v7 = vld [vmem:[%s7748_s0 + $0x28] sm:$0xff]  ;;  %v7754_v8 = vrot.slane %v2836_v2, 7  ;;  %v2859_v9 = vld [vmem:[%s7748_s0 + $0x30] sm:$0xff]  ;;  %v117_v10 = vrot.slane %v2841_v3, 7 }
  0x1f   :  { %8199 = vst [vmem:[#allocation12_spill] sm:$0xff] %v2847_v5  ;;  %8200 = vst [vmem:[#allocation13_spill] sm:$0xff] %v2853_v7  ;;  %v2865_v11 = vld [vmem:[%s7748_s0 + $0x38] sm:$0xff]  ;;  %v2870_v12 = vsel %vm112_vm0, %v7755_v4, %v114_v6  ;;  %v7753_v13 = vrot.slane %v2847_v5, 7  ;;  %v2876_v14 = vld [vmem:[%s7748_s0 + $0x40] sm:$0xff]  ;;  %v120_v18 = vrot.slane %v2853_v7, 7 }
  0x20   :  { %8201 = vst [vmem:[#allocation14_spill] sm:$0xff] %v2859_v9  ;;  %8202 = vst [vmem:[#allocation15_spill] sm:$0xff] %v2865_v11  ;;  %v2881_v15 = vld [vmem:[%s7748_s0 + $0x48] sm:$0xff]  ;;  %v2886_v16 = vld [vmem:[%s7748_s0 + $0x50] sm:$0xff]  ;;  %v2891_v17 = vsel %vm112_vm0, %v7754_v8, %v117_v10  ;;  %v7752_v23 = vrot.slane %v2859_v9, 7  ;;  %v123_v29 = vrot.slane %v2865_v11, 7 }
  0x21   :  { %8203 = vst [vmem:[#allocation16_spill] sm:$0xff] %v2870_v12  ;;  %8204 = vst [vmem:[#allocation17_spill] sm:$0xff] %v2876_v14  ;;  %v2899_v20 = vld [vmem:[%s7748_s0 + $0x58] sm:$0xff]  ;;  %v2904_v21 = vld [vmem:[%s7748_s0 + $0x60] sm:$0xff]  ;;  %v2932_v28 = vsel %vm112_vm0, %v7753_v13, %v120_v18  ;;  %v125_v34 = vrot.slane %v2876_v14, 7  ;;  %v126_v35 = vrot.slane %v2881_v15, 7 }
  0x22   :  { %8205 = vst [vmem:[#allocation18_spill] sm:$0xff] %v2881_v15  ;;  %8206 = vst [vmem:[#allocation19_spill] sm:$0xff] %v2886_v16  ;;  %v2894_v19 = vstv %s71_s26  ;;  %v2909_v22 = vld [vmem:[%s7748_s0 + $0x68] sm:$0xff]  ;;  %v2912_v24 = vstv %s2675_s29  ;;  %v2917_v25 = vld [vmem:[%s7748_s0 + $0x70] sm:$0xff]  ;;  %v128_v36 = vrot.slane %v2886_v16, 7  ;;  %v129_v41 = vrot.slane %v2899_v20, 7 }
  0x23   :  { %8207 = vst [vmem:[#allocation20_spill] sm:$0xff] %v2891_v17  ;;  %8208 = vst [vmem:[#allocation21_spill] sm:$0xff] %v2899_v20  ;;  %v2922_v26 = vld [vmem:[%s7748_s0 + $0x78] sm:$0xff]  ;;  %v2927_v27 = vld [vmem:[%s7748_s0 + $0x80] sm:$0xff]  ;;  %v2937_v30 = vmul.f32 %v2894_v19, %v2870_v12  ;;  %v2941_v31 = vmul.f32 %v2894_v19, %v2891_v17  ;;  %v2958_v37 = vmul.f32 %v2912_v24, %v2826_v0  ;;  %v131_v42 = vrot.slane %v2904_v21, 7  ;;  %s3379_s28 = sld [smem:[#allocation2 + $0x2]] }
  0x24   :  { %8209 = vst [vmem:[#allocation22_spill] sm:$0xff] %v2904_v21  ;;  %8210 = vst [vmem:[#allocation23_spill] sm:$0xff] %v2909_v22  ;;  %v2946_v32 = vld [vmem:[%s7748_s0 + $0x88] sm:$0xff]  ;;  %v2951_v33 = vld [vmem:[%s7748_s0 + $0x90] sm:$0xff]  ;;  %v132_v43 = vrot.slane %v2909_v22, 7  ;;  %v2980_v44 = vmul.f32 %v2912_v24, %v2831_v1  ;;  %v134_v48 = vrot.slane %v2917_v25, 7  ;;  %v3002_v51 = vmul.f32 %v2894_v19, %v2932_v28 }
  0x25   :  { %8211 = vst [vmem:[#allocation24_spill] sm:$0xff] %v2912_v24  ;;  %8212 = vst [vmem:[#allocation25_spill] sm:$0xff] %v2917_v25  ;;  %v2963_v38 = vld [vmem:[%s7748_s0 + $0x98] sm:$0xff]  ;;  %v2968_v39 = vld [vmem:[%s7748_s0 + $0xa0] sm:$0xff]  ;;  %v135_v49 = vrot.slane %v2922_v26, 7  ;;  %v137_v50 = vrot.slane %v2927_v27, 7  ;;  %v3017_v54 = vsel %vm112_vm0, %v7752_v23, %v123_v29  ;;  %v3020_v55 = vsel %vm112_vm0, %v125_v34, %v126_v35 }
  0x26   :  { %8213 = vst [vmem:[#allocation26_spill] sm:$0xff] %v2922_v26  ;;  %8214 = vst [vmem:[#allocation27_spill] sm:$0xff] %v2927_v27  ;;  %v2973_v40 = vld [vmem:[%s7748_s0 + $0xa8] sm:$0xff]  ;;  %v2985_v45 = vld [vmem:[%s7748_s0 + $0xb0] sm:$0xff]  ;;  %v138_v56 = vrot.slane %v2946_v32, 7  ;;  %v140_v57 = vrot.slane %v2951_v33, 7  ;;  %v3040_v61 = vsel %vm112_vm0, %v128_v36, %v129_v41  ;;  %v3056_v29 = vsel %vm112_vm0, %v131_v42, %v132_v43 }
  0x27   :  { %8215 = vst [vmem:[#allocation28_spill] sm:$0xff] %v2932_v28  ;;  %8216 = vst [vmem:[#allocation29_spill] sm:$0xff] %v2937_v30  ;;  %v2990_v46 = vld [vmem:[%s7748_s0 + $0xb8] sm:$0xff]  ;;  %v2995_v47 = vld [vmem:[%s7748_s0 + $0xc0] sm:$0xff]  ;;  %v141_v62 = vrot.slane %v2963_v38, 7  ;;  %v143_v63 = vrot.slane %v2968_v39, 7  ;;  %v3062_v13 = vsel %vm112_vm0, %v134_v48, %v135_v49 }
  0x28   :  { %8217 = vst [vmem:[#allocation30_spill] sm:$0xff] %v2941_v31  ;;  %8218 = vst [vmem:[#allocation31_spill] sm:$0xff] %v2946_v32  ;;  %v3007_v52 = vld [vmem:[%s7748_s0 + $0xc8] sm:$0xff]  ;;  %v3012_v53 = vld [vmem:[%s7748_s0 + $0xd0] sm:$0xff]  ;;  %v144_v6 = vrot.slane %v2973_v40, 7  ;;  %v146_v35 = vrot.slane %v2985_v45, 7  ;;  %v3065_v8 = vsel %vm112_vm0, %v137_v50, %v138_v56 }
  0x29   :  { %8219 = vst [vmem:[#allocation32_spill] sm:$0xff] %v2951_v33  ;;  %8220 = vst [vmem:[#allocation33_spill] sm:$0xff] %v2958_v37  ;;  %v3027_v58 = vld [vmem:[%s7748_s0 + $0xd8] sm:$0xff]  ;;  %v3032_v59 = vld [vmem:[%s7748_s0 + $0xe0] sm:$0xff]  ;;  %v147_v41 = vrot.slane %v2990_v46, 7  ;;  %v149_v23 = vrot.slane %v2995_v47, 7  ;;  %v3070_v17 = vsel %vm112_vm0, %v140_v57, %v141_v62 }
  0x2a   :  { %8221 = vst [vmem:[#allocation34_spill] sm:$0xff] %v2963_v38  ;;  %8222 = vst [vmem:[#allocation35_spill] sm:$0xff] %v2968_v39  ;;  %v3037_v60 = vld [vmem:[%s7748_s0 + $0xe8] sm:$0xff]  ;;  %v3048_v10 = vld [vmem:[%s7748_s0 + $0xf0] sm:$0xff]  ;;  %v150_v4 = vrot.slane %v3007_v52, 7  ;;  %v152_v28 = vrot.slane %v3012_v53, 7  ;;  %v3076_v31 = vsel %vm112_vm0, %v143_v63, %v144_v6 }
  0x2b   :  { %8223 = vst [vmem:[#allocation36_spill] sm:$0xff] %v2973_v40  ;;  %8224 = vst [vmem:[#allocation37_spill] sm:$0xff] %v2980_v44  ;;  %v3053_v18 = vld [vmem:[%s7748_s0 + $0xf8] sm:$0xff]  ;;  %v153_v43 = vrot.slane %v3027_v58, 7  ;;  %v155_v12 = vrot.slane %v3032_v59, 7  ;;  %v3079_v49 = vsel %vm112_vm0, %v146_v35, %v147_v41  ;;  %v158_v56 = vrot.slane %v3048_v10, 7 }
  0x2c   :  { %8225 = vst [vmem:[#allocation38_spill] sm:$0xff] %v2985_v45  ;;  %8226 = vst [vmem:[#allocation39_spill] sm:$0xff] %v2990_v46  ;;  %v159_v44 = vrot.slane %v3053_v18, 7  ;;  %v3084_v30 = vsel %vm112_vm0, %v149_v23, %v150_v4  ;;  %v8248_v24 = vrot.slane %v2826_v0, 7  ;;  %v8253_v4 = vrot.slane %v2847_v5, 7  ;;  %s3486_s29 = sld [smem:[#allocation2 + $0x3]] }
  0x2d   :  { %8227 = vst [vmem:[#allocation40_spill] sm:$0xff] %v2995_v47  ;;  %8228 = vst [vmem:[#allocation41_spill] sm:$0xff] %v3002_v51  ;;  %v156_v51 = vrot.slane %v3037_v60, 7  ;;  %v3087_v62 = vsel %vm112_vm0, %v152_v28, %v153_v43  ;;  %vm209_vm1 = vcmask 1046528   ;;  %s3492_s30 = sld [smem:[#allocation2 + $0x4]]  ;;  %s3780_s4 = sld [smem:[#allocation2 + $0x5]] }
  0x2e   :  { %8229 = vst [vmem:[#allocation42_spill] sm:$0xff] %v3007_v52  ;;  %8230 = vst [vmem:[#allocation43_spill] sm:$0xff] %v3012_v53  ;;  %v3095_v6 = vsel %vm112_vm0, 0.0, %v8248_v24  ;;  %v3098_v41 = vsel %vm112_vm0, %v158_v56, %v159_v44  ;;  %v3108_v43 = vsel %vm112_vm0, 0.0, %v8253_v4  ;;  %v3116_v24 = vsel %vm112_vm0, 0.0, %v125_v34  ;;  %s3782_s5 = sld [smem:[#allocation2 + $0x6]] }
  0x2f   :  { %8231 = vst [vmem:[#allocation44_spill] sm:$0xff] %v3017_v54  ;;  %8232 = vst [vmem:[#allocation45_spill] sm:$0xff] %v3020_v55  ;;  %v3090_v37 = vsel %vm112_vm0, %v155_v12, %v156_v51  ;;  %v8255_v51 = vrot.slane %v2859_v9, 7  ;;  %v3119_v44 = vsel %vm112_vm0, 0.0, %v128_v36  ;;  %v3128_v4 = vsel %vm112_vm0, 0.0, %v137_v50  ;;  %s3794_s6 = sld [smem:[#allocation2 + $0x7]] }
  0x30   :  { %8233 = vst [vmem:[#allocation46_spill] sm:$0xff] %v3027_v58  ;;  %8234 = vst [vmem:[#allocation47_spill] sm:$0xff] %v3032_v59  ;;  %v3137_v34 = vsel %vm112_vm0, 0.0, %v146_v35  ;;  %v3140_v36 = vsel %vm112_vm0, 0.0, %v149_v23  ;;  %v211_v50 = vrot.slane %v2831_v1, 1  ;;  %v3151_v35 = vsel %vm112_vm0, 0.0, %v155_v12 }
  0x31   :  { %8235 = vst [vmem:[#allocation48_spill] sm:$0xff] %v3037_v60  ;;  %8236 = vst [vmem:[#allocation49_spill] sm:$0xff] %v3040_v61  ;;  %v217_v23 = vrot.slane %v2853_v7, 1  ;;  %v222_v1 = vrot.slane %v2876_v14, 1  ;;  %v226_v7 = vrot.slane %v2899_v20, 1  ;;  %s3796_s7 = sld [smem:[#allocation2 + $0x8]] }
  0x32   :  { %8237 = vst [vmem:[#allocation50_spill] sm:$0xff] %v3048_v10  ;;  %8238 = vst [vmem:[#allocation51_spill] sm:$0xff] %v3053_v18  ;;  %s4462_s10 = sld [smem:[#allocation4]]  ;;  %s4468_s11 = sld [smem:[#allocation2 + $0x9]] }
  0x33   :  { %8239 = vst [vmem:[#allocation52_spill] sm:$0xff] %v3056_v29  ;;  %8240 = vst [vmem:[#allocation53_spill] sm:$0xff] %v3062_v13  ;;  %s4470_s12 = sld [smem:[#allocation2 + $0xa]]  ;;  %s5002_s13 = sld [smem:[#allocation2 + $0xb]] }
  0x34   :  { %8241 = vst [vmem:[#allocation54_spill] sm:$0xff] %v3065_v8  ;;  %8242 = vst [vmem:[#allocation55_spill] sm:$0xff] %v3070_v17  ;;  %s5012_s14 = sld [smem:[#allocation2 + $0xc]]  ;;  %s5014_s15 = sld [smem:[#allocation2 + $0xd]] }
  0x35   :  { %8243 = vst [vmem:[#allocation56_spill] sm:$0xff] %v3076_v31  ;;  %8244 = vst [vmem:[#allocation57_spill] sm:$0xff] %v3079_v49  ;;  %v8251_v49 = vrot.slane %v2836_v2, 7  ;;  %s5455_s16 = sld [smem:[#allocation2 + $0xe]]  ;;  %s5465_s17 = sld [smem:[#allocation2 + $0xf]] }
  0x36   :  { %8245 = vst [vmem:[#allocation58_spill] sm:$0xff] %v3084_v30  ;;  %8246 = vst [vmem:[#allocation59_spill] sm:$0xff] %v3087_v62  ;;  %v3131_v62 = vsel %vm112_vm0, 0.0, %v140_v57  ;;  %v213_v57 = vrot.slane %v2836_v2, 1  ;;  %v214_v30 = vrot.slane %v2841_v3, 1  ;;  %v225_v3 = vrot.slane %v2886_v16, 1 }
  0x37   :  { %8247 = vst [vmem:[#allocation60_spill] sm:$0xff] %v3090_v37  ;;  %8249 = vst [vmem:[#allocation61_spill] sm:$0xff] %v3095_v6  ;;  %v3103_v31 = vsel %vm112_vm0, 0.0, %v8251_v49  ;;  %v3113_v37 = vsel %vm112_vm0, 0.0, %v8255_v51  ;;  %v3125_v49 = vsel %vm112_vm0, 0.0, %v134_v48  ;;  %v3134_v51 = vsel %vm112_vm0, 0.0, %v143_v63 }
  0x38   :  { %8250 = vst [vmem:[#allocation62_spill] sm:$0xff] %v3098_v41  ;;  %8252 = vst [vmem:[#allocation63_spill] sm:$0xff] %v3103_v31  ;;  %v3122_v41 = vsel %vm112_vm0, 0.0, %v131_v42  ;;  %v3143_v42 = vsel %vm112_vm0, 0.0, %v152_v28  ;;  %v210_v48 = vrot.slane %v2826_v0, 1  ;;  %v216_v63 = vrot.slane %v2847_v5, 1 }
  0x39   :  { %8254 = vst [vmem:[#allocation64_spill] sm:$0xff] %v3108_v43  ;;  %8256 = vst [vmem:[#allocation65_spill] sm:$0xff] %v3113_v37  ;;  %v220_v28 = vrot.slane %v2865_v11, 1  ;;  %v223_v0 = vrot.slane %v2881_v15, 1  ;;  %v3166_v12 = vsel %vm209_vm1, %v213_v57, %v214_v30  ;;  %v232_v15 = vrot.slane %v2922_v26, 1  ;;  %s5747_s18 = sld [smem:[#allocation2 + $0x10]] }
  0x3a   :  { %8257 = vst [vmem:[#allocation66_spill] sm:$0xff] %v3116_v24  ;;  %8258 = vst [vmem:[#allocation67_spill] sm:$0xff] %v3119_v44  ;;  %v3163_v5 = vsel %vm209_vm1, %v210_v48, %v211_v50  ;;  %v3171_v11 = vsel %vm209_vm1, %v216_v63, %v217_v23  ;;  %v234_v48 = vrot.slane %v2927_v27, 1  ;;  %v235_v57 = vrot.slane %v2946_v32, 1  ;;  %s5881_s19 = sld [smem:[#allocation2 + $0x11]]  ;;  %s6277_s1 = sld [smem:[#allocation2 + $0x12]] }
  0x3b   :  { %8259 = vst [vmem:[#allocation68_spill] sm:$0xff] %v3122_v41  ;;  %8260 = vst [vmem:[#allocation69_spill] sm:$0xff] %v3125_v49  ;;  %v3186_v63 = vsel %vm209_vm1, %v225_v3, %v226_v7  ;;  %v244_v32 = vrot.slane %v2990_v46, 1  ;;  %v247_v3 = vrot.slane %v3007_v52, 1  ;;  %v256_v52 = vrot.slane %v3053_v18, 1  ;;  %s6014_s20 = sld [smem:[#allocation4 + $0x1]] }
  0x3c   :  { %8261 = vst [vmem:[#allocation70_spill] sm:$0xff] %v3128_v4  ;;  %8262 = vst [vmem:[#allocation71_spill] sm:$0xff] %v3131_v62  ;;  %v3235_v18 = vsel %vm209_vm1, %v214_v30, 0.0  ;;  %v3256_v30 = vsel %vm209_vm1, %v235_v57, 0.0  ;;  %s6279_s2 = sld [smem:[#allocation2 + $0x13]]  ;;  %s6289_s21 = sld [smem:[#allocation2 + $0x14]] }
  0x3d   :  { %8263 = vst [vmem:[#allocation72_spill] sm:$0xff] %v3134_v51  ;;  %8264 = vst [vmem:[#allocation73_spill] sm:$0xff] %v3137_v34  ;;  %s6297_s22 = sld [smem:[#allocation2 + $0x15]]  ;;  %s6661_s23 = sld [smem:[#allocation2 + $0x16]] }
  0x3e   :  { %8265 = vst [vmem:[#allocation74_spill] sm:$0xff] %v3140_v36  ;;  %8266 = vst [vmem:[#allocation75_spill] sm:$0xff] %v3143_v42  ;;  %v219_v36 = vrot.slane %v2859_v9, 1  ;;  %v3157_v42 = vsel %vm112_vm0, 0.0, %v158_v56  ;;  %v228_v9 = vrot.slane %v2904_v21, 1  ;;  %v229_v56 = vrot.slane %v2909_v22, 1 }
  0x3f   :  { %8267 = vst [vmem:[#allocation76_spill] sm:$0xff] %v3151_v35  ;;  %8268 = vst [vmem:[#allocation77_spill] sm:$0xff] %v3157_v42  ;;  %v231_v42 = vrot.slane %v2917_v25, 1  ;;  %v240_v25 = vrot.slane %v2968_v39, 1  ;;  %s6800_s24 = sld [smem:[#allocation2 + $0x17]]  ;;  %s6802_s25 = sld [smem:[#allocation2 + $0x18]] }
  0x40   :  { %8269 = vst [vmem:[#allocation78_spill] sm:$0xff] %v3163_v5  ;;  %8270 = vst [vmem:[#allocation79_spill] sm:$0xff] %v3166_v12  ;;  %v3177_v16 = vsel %vm209_vm1, %v219_v36, %v220_v28  ;;  %v237_v12 = vrot.slane %v2951_v33, 1  ;;  %v3183_v5 = vsel %vm209_vm1, %v222_v1, %v223_v0  ;;  %v3191_v26 = vsel %vm209_vm1, %v228_v9, %v229_v56  ;;  %s6812_s26 = sld [smem:[#allocation2 + $0x19]]  ;;  %s6814_s27 = sld [smem:[#allocation2 + $0x1a]] }
  0x41   :  { %8271 = vst [vmem:[#allocation80_spill] sm:$0xff] %v3171_v11  ;;  %8272 = vst [vmem:[#allocation81_spill] sm:$0xff] %v3177_v16  ;;  %v238_v11 = vrot.slane %v2963_v38, 1  ;;  %v241_v36 = vrot.slane %v2973_v40, 1  ;;  %v243_v16 = vrot.slane %v2985_v45, 1  ;;  %v3197_v33 = vsel %vm209_vm1, %v231_v42, %v232_v15 }
  0x42   :  { %8273 = vst [vmem:[#allocation82_spill] sm:$0xff] %v3183_v5  ;;  %8274 = vst [vmem:[#allocation83_spill] sm:$0xff] %v3186_v63  ;;  %v246_v1 = vrot.slane %v2995_v47, 1  ;;  %v249_v63 = vrot.slane %v3012_v53, 1  ;;  %v3203_v5 = vsel %vm209_vm1, %v234_v48, %v235_v57  ;;  %v252_v45 = vrot.slane %v3032_v59, 1 }
  0x43   :  { %8275 = vst [vmem:[#allocation84_spill] sm:$0xff] %v3191_v26  ;;  %8276 = vst [vmem:[#allocation85_spill] sm:$0xff] %v3197_v33  ;;  %v3206_v9 = vsel %vm209_vm1, %v237_v12, %v238_v11  ;;  %v250_v26 = vrot.slane %v3027_v58, 1  ;;  %v3211_v46 = vsel %vm209_vm1, %v240_v25, %v241_v36  ;;  %v253_v42 = vrot.slane %v3037_v60, 1 }
  0x44   :  { %8277 = vst [vmem:[#allocation86_spill] sm:$0xff] %v3203_v5  ;;  %8278 = vst [vmem:[#allocation87_spill] sm:$0xff] %v3206_v9  ;;  %v255_v33 = vrot.slane %v3048_v10, 1  ;;  %v3217_v53 = vsel %vm209_vm1, %v243_v16, %v244_v32  ;;  %v3220_v48 = vsel %vm209_vm1, %v246_v1, %v247_v3  ;;  %v3226_v9 = vsel %vm209_vm1, %v211_v50, 0.0  ;;  %v8314_v5 = vld [vmem:[#allocation18_spill] sm:$0xff] }
  0x45   :  { %8279 = vst [vmem:[#allocation88_spill] sm:$0xff] %v3211_v46  ;;  %8280 = vst [vmem:[#allocation89_spill] sm:$0xff] %v3217_v53  ;;  %v3223_v12 = vsel %vm209_vm1, %v249_v63, %v250_v26  ;;  %v3229_v25 = vsel %vm209_vm1, %v252_v45, %v253_v42  ;;  %v3238_v16 = vsel %vm209_vm1, %v217_v23, 0.0  ;;  %v3241_v1 = vsel %vm209_vm1, %v220_v28, 0.0  ;;  %v8310_v53 = vld [vmem:[#allocation12_spill] sm:$0xff] }
  0x46   :  { %8281 = vst [vmem:[#allocation90_spill] sm:$0xff] %v3220_v48  ;;  %8282 = vst [vmem:[#allocation91_spill] sm:$0xff] %v3223_v12  ;;  %v3232_v46 = vsel %vm209_vm1, %v255_v33, %v256_v52  ;;  %v3244_v63 = vsel %vm209_vm1, %v223_v0, 0.0  ;;  %v3247_v50 = vsel %vm209_vm1, %v226_v7, 0.0  ;;  %v3250_v45 = vsel %vm209_vm1, %v229_v56, 0.0  ;;  %v8306_v12 = vld [vmem:[#allocation59_spill] sm:$0xff] }
  0x47   :  { %8283 = vst [vmem:[#allocation92_spill] sm:$0xff] %v3226_v9  ;;  %8284 = vst [vmem:[#allocation93_spill] sm:$0xff] %v3229_v25  ;;  %v3253_v33 = vsel %vm209_vm1, %v232_v15, 0.0  ;;  %v3259_v23 = vsel %vm209_vm1, %v238_v11, 0.0  ;;  %v3262_v28 = vsel %vm209_vm1, %v241_v36, 0.0  ;;  %v3265_v0 = vsel %vm209_vm1, %v244_v32, 0.0 }
  0x48   :  { %8285 = vst [vmem:[#allocation94_spill] sm:$0xff] %v3232_v46  ;;  %8286 = vst [vmem:[#allocation95_spill] sm:$0xff] %v3235_v18  ;;  %v3268_v7 = vsel %vm209_vm1, %v247_v3, 0.0  ;;  %v3271_v56 = vsel %vm209_vm1, %v250_v26, 0.0  ;;  %v3274_v15 = vsel %vm209_vm1, %v253_v42, 0.0  ;;  %v3277_v57 = vsel %vm209_vm1, %v256_v52, 0.0 }
  0x49   :  { %8287 = vst [vmem:[#allocation96_spill] sm:$0xff] %v3238_v16  ;;  %8288 = vst [vmem:[#allocation97_spill] sm:$0xff] %v3241_v1  ;;  %v307_v11 = vmul.f32 0.0, %v2894_v19  ;;  %v308_v36 = vmul.f32 %v2894_v19, %v3095_v6  ;;  %v310_v32 = vmul.f32 %v2894_v19, %v3103_v31  ;;  %v312_v3 = vmul.f32 %v2894_v19, %v3108_v43  ;;  %v8301_v31 = vld [vmem:[#allocation56_spill] sm:$0xff]  ;;  %v8302_v6 = vld [vmem:[#allocation57_spill] sm:$0xff] }
  0x4a   :  { %8289 = vst [vmem:[#allocation98_spill] sm:$0xff] %v3244_v63  ;;  %8290 = vst [vmem:[#allocation99_spill] sm:$0xff] %v3247_v50  ;;  %v314_v26 = vmul.f32 %v2894_v19, %v3113_v37  ;;  %v315_v42 = vmul.f32 %v2894_v19, %v3017_v54  ;;  %v316_v52 = vmul.f32 %v2894_v19, %v3116_v24  ;;  %v8304_v25 = vld [vmem:[#allocation58_spill] sm:$0xff]  ;;  %v8308_v48 = vld [vmem:[#allocation24_spill] sm:$0xff] }
  0x4b   :  { %8291 = vst [vmem:[#allocation100_spill] sm:$0xff] %v3250_v45  ;;  %8292 = vst [vmem:[#allocation101_spill] sm:$0xff] %v3253_v33  ;;  %v318_v46 = vmul.f32 %v2894_v19, %v3119_v44  ;;  %v319_v10 = vmul.f32 %v2894_v19, %v3040_v61  ;;  %v320_v43 = vmul.f32 %v2894_v19, %v3122_v41  ;;  %v8315_v33 = vld [vmem:[#allocation19_spill] sm:$0xff]  ;;  %v8316_v45 = vld [vmem:[#allocation25_spill] sm:$0xff] }
  0x4c   :  { %8293 = vst [vmem:[#allocation102_spill] sm:$0xff] %v3256_v30  ;;  %8294 = vst [vmem:[#allocation103_spill] sm:$0xff] %v3259_v23  ;;  %v321_v37 = vmul.f32 %v2894_v19, %v3056_v29  ;;  %v322_v54 = vmul.f32 %v2894_v19, %v3125_v49  ;;  %v323_v24 = vmul.f32 %v2894_v19, %v3062_v13  ;;  %v8312_v23 = vld [vmem:[#allocation14_spill] sm:$0xff]  ;;  %v8313_v30 = vld [vmem:[#allocation15_spill] sm:$0xff] }
  0x4d   :  { %8295 = vst [vmem:[#allocation104_spill] sm:$0xff] %v3262_v28  ;;  %8296 = vst [vmem:[#allocation105_spill] sm:$0xff] %v3265_v0  ;;  %v325_v44 = vmul.f32 %v2894_v19, %v3065_v8  ;;  %v326_v61 = vmul.f32 %v2894_v19, %v3131_v62  ;;  %v327_v41 = vmul.f32 %v2894_v19, %v3070_v17  ;;  %v8309_v0 = vld [vmem:[#allocation11_spill] sm:$0xff]  ;;  %v8311_v28 = vld [vmem:[#allocation13_spill] sm:$0xff] }
  0x4e   :  { %8297 = vst [vmem:[#allocation106_spill] sm:$0xff] %v3268_v7  ;;  %8298 = vst [vmem:[#allocation107_spill] sm:$0xff] %v3271_v56  ;;  %v328_v29 = vmul.f32 %v2894_v19, %v3134_v51  ;;  %v329_v49 = vmul.f32 %v2894_v19, %v8301_v31  ;;  %v330_v13 = vmul.f32 %v2894_v19, %v3137_v34  ;;  %v8305_v56 = vld [vmem:[#allocation75_spill] sm:$0xff]  ;;  %v8307_v7 = vld [vmem:[#allocation60_spill] sm:$0xff] }
  0x4f   :  { %8299 = vst [vmem:[#allocation108_spill] sm:$0xff] %v3274_v15  ;;  %8300 = vst [vmem:[#allocation109_spill] sm:$0xff] %v3277_v57  ;;  %v317_v57 = vmul.f32 %v2894_v19, %v3020_v55  ;;  %v324_v55 = vmul.f32 %v2894_v19, %v3128_v4  ;;  %v331_v4 = vmul.f32 %v2894_v19, %v8302_v6  ;;  %v8303_v15 = vld [vmem:[#allocation74_spill] sm:$0xff]  ;;  %v339_v6 = vmul.f32 0.0, %v8308_v48  ;;  %v8318_v63 = vld [vmem:[#allocation31_spill] sm:$0xff] }
  0x50   :  { %v332_v8 = vmul.f32 %v2894_v19, %v8303_v15  ;;  %v333_v62 = vmul.f32 %v2894_v19, %v8304_v25  ;;  %v334_v17 = vmul.f32 %v2894_v19, %v8305_v56  ;;  %v335_v51 = vmul.f32 %v2894_v19, %v8306_v12  ;;  %v8317_v50 = vld [vmem:[#allocation26_spill] sm:$0xff]  ;;  %v8319_v1 = vld [vmem:[#allocation32_spill] sm:$0xff]  ;;  %v8321_v18 = vld [vmem:[#allocation39_spill] sm:$0xff] }
  0x51   :  { %v336_v31 = vmul.f32 %v2894_v19, %v3151_v35  ;;  %v337_v34 = vmul.f32 %v2894_v19, %v8307_v7  ;;  %v342_v15 = vmul.f32 %v8308_v48, %v2836_v2  ;;  %v343_v25 = vmul.f32 %v8308_v48, %v8309_v0  ;;  %v8320_v16 = vld [vmem:[#allocation38_spill] sm:$0xff]  ;;  %v8323_v9 = vld [vmem:[#allocation43_spill] sm:$0xff] }
  0x52   :  { %v344_v56 = vmul.f32 %v8308_v48, %v8310_v53  ;;  %v345_v12 = vmul.f32 %v8308_v48, %v8311_v28  ;;  %v346_v35 = vmul.f32 %v8308_v48, %v8312_v23  ;;  %v347_v19 = vmul.f32 %v8308_v48, %v8313_v30 }
  0x53   :  { %v348_v7 = vmul.f32 %v8308_v48, %v2876_v14  ;;  %v349_v2 = vmul.f32 %v8308_v48, %v8314_v5  ;;  %v350_v0 = vmul.f32 %v8308_v48, %v8315_v33  ;;  %v351_v53 = vmul.f32 %v8308_v48, %v2899_v20 }
  0x54   :  { %v352_v28 = vmul.f32 %v8308_v48, %v2904_v21  ;;  %v353_v23 = vmul.f32 %v8308_v48, %v2909_v22  ;;  %v354_v30 = vmul.f32 %v8308_v48, %v8316_v45  ;;  %v355_v14 = vmul.f32 %v8308_v48, %v8317_v50 }
  0x55   :  { %v356_v5 = vmul.f32 %v8308_v48, %v2927_v27  ;;  %v357_v33 = vmul.f32 %v8308_v48, %v8318_v63  ;;  %v358_v20 = vmul.f32 %v8308_v48, %v8319_v1  ;;  %v359_v21 = vmul.f32 %v8308_v48, %v2963_v38  ;;  %v8322_v63 = vld [vmem:[#allocation42_spill] sm:$0xff] }
  0x56   :  { %v360_v22 = vmul.f32 %v8308_v48, %v2968_v39  ;;  %v361_v45 = vmul.f32 %v8308_v48, %v2973_v40  ;;  %v362_v50 = vmul.f32 %v8308_v48, %v8320_v16  ;;  %v363_v27 = vmul.f32 %v8308_v48, %v8321_v18 }
  0x57   :  { %v364_v1 = vmul.f32 %v8308_v48, %v2995_v47  ;;  %v365_v38 = vmul.f32 %v8308_v48, %v8322_v63  ;;  %v366_v39 = vmul.f32 %v8308_v48, %v8323_v9  ;;  %v367_v40 = vmul.f32 %v8308_v48, %v3027_v58  ;;  %v8325_v63 = vld [vmem:[#allocation33_spill] sm:$0xff] }
  0x58   :  { %v368_v16 = vmul.f32 %v8308_v48, %v3032_v59  ;;  %v369_v18 = vmul.f32 %v8308_v48, %v3037_v60  ;;  %v3393_v47 = vadd.f32 %v339_v6, %v307_v11  ;;  %v3396_v9 = vadd.f32 %v8325_v63, %v308_v36  ;;  %v8327_v58 = vld [vmem:[#allocation29_spill] sm:$0xff]  ;;  %v8331_v6 = vld [vmem:[#allocation30_spill] sm:$0xff] }
  0x59   :  { %v8328_v59 = vld [vmem:[#allocation37_spill] sm:$0xff]  ;;  %v3402_v60 = vadd.f32 %v342_v15, %v310_v32  ;;  %v3405_v11 = vadd.f32 %v343_v25, %v8331_v6  ;;  %v3420_v15 = vadd.f32 %v350_v0, %v318_v46  ;;  %v3422_v32 = vadd.f32 %v351_v53, %v319_v10 }
  0x5a   :  { %8324 = vst [vmem:[#allocation24_spill] sm:$0xff] %v3393_v47  ;;  %8326 = vst [vmem:[#allocation33_spill] sm:$0xff] %v3396_v9  ;;  %v3400_v48 = vadd.f32 %v8328_v59, %v8327_v58  ;;  %v3407_v47 = vadd.f32 %v344_v56, %v312_v3  ;;  %v8332_v36 = vld [vmem:[#allocation41_spill] sm:$0xff]  ;;  %v3412_v9 = vadd.f32 %v346_v35, %v314_v26 }
  0x5b   :  { %8330 = vst [vmem:[#allocation37_spill] sm:$0xff] %v3402_v60  ;;  %v3410_v63 = vadd.f32 %v345_v12, %v8332_v36  ;;  %v3414_v58 = vadd.f32 %v347_v19, %v315_v42  ;;  %v3416_v59 = vadd.f32 %v348_v7, %v316_v52  ;;  %v3424_v60 = vadd.f32 %v352_v28, %v320_v43  ;;  %v8353_v28 = vld [vmem:[#allocation100_spill] sm:$0xff]  ;;  %v8355_v42 = vld [vmem:[#allocation101_spill] sm:$0xff]  ;;  %v8356_v19 = vld [vmem:[#allocation86_spill] sm:$0xff] }
  0x5c   :  { %8329 = vst [vmem:[#allocation29_spill] sm:$0xff] %v3400_v48  ;;  %v3418_v48 = vadd.f32 %v349_v2, %v317_v57  ;;  %v3426_v25 = vadd.f32 %v353_v23, %v321_v37  ;;  %v3428_v56 = vadd.f32 %v354_v30, %v322_v54  ;;  %v3430_v12 = vadd.f32 %v355_v14, %v323_v24  ;;  %v8352_v30 = vld [vmem:[#allocation84_spill] sm:$0xff]  ;;  %v8354_v57 = vld [vmem:[#allocation85_spill] sm:$0xff]  ;;  %v8357_v36 = vld [vmem:[#allocation102_spill] sm:$0xff] }
  0x5d   :  { %v3432_v35 = vadd.f32 %v356_v5, %v324_v55  ;;  %v3434_v3 = vadd.f32 %v357_v33, %v325_v44  ;;  %v3436_v7 = vadd.f32 %v358_v20, %v326_v61  ;;  %v3438_v2 = vadd.f32 %v359_v21, %v327_v41 }
  0x5e   :  { %v3440_v46 = vadd.f32 %v360_v22, %v328_v29  ;;  %v3442_v53 = vadd.f32 %v361_v45, %v329_v49  ;;  %v3444_v10 = vadd.f32 %v362_v50, %v330_v13  ;;  %v3446_v37 = vadd.f32 %v363_v27, %v331_v4  ;;  %v8340_v29 = vld [vmem:[#allocation78_spill] sm:$0xff]  ;;  %v8341_v13 = vld [vmem:[#allocation92_spill] sm:$0xff]  ;;  %v8342_v27 = vld [vmem:[#allocation79_spill] sm:$0xff] }
  0x5f   :  { %v3448_v54 = vadd.f32 %v364_v1, %v332_v8  ;;  %v3450_v14 = vadd.f32 %v365_v38, %v333_v62  ;;  %v3452_v5 = vadd.f32 %v366_v39, %v334_v17  ;;  %v3454_v55 = vadd.f32 %v367_v40, %v335_v51  ;;  %v8343_v8 = vld [vmem:[#allocation95_spill] sm:$0xff]  ;;  %v8344_v38 = vld [vmem:[#allocation80_spill] sm:$0xff]  ;;  %v8346_v40 = vld [vmem:[#allocation81_spill] sm:$0xff] }
  0x60   :  { %8333 = vst [vmem:[#allocation30_spill] sm:$0xff] %v3446_v37  ;;  %v401_v20 = vstv %s3379_s28  ;;  %v3457_v61 = vadd.f32 %v368_v16, %v336_v31  ;;  %v3459_v21 = vadd.f32 %v369_v18, %v337_v34  ;;  %v8345_v17 = vld [vmem:[#allocation96_spill] sm:$0xff]  ;;  %v8347_v4 = vld [vmem:[#allocation97_spill] sm:$0xff]  ;;  %v8348_v51 = vld [vmem:[#allocation82_spill] sm:$0xff]  ;;  %s7420_s28 = sld [smem:[#allocation4 + $0x2]] }
  0x61   :  { %8334 = vst [vmem:[#allocation41_spill] sm:$0xff] %v3448_v54  ;;  %8335 = vst [vmem:[#allocation110_spill] sm:$0xff] %v3450_v14  ;;  %v402_v22 = vmul.f32 0.0, %v401_v20  ;;  %v403_v41 = vmul.f32 %v401_v20, %v8340_v29  ;;  %v404_v43 = vmul.f32 %v401_v20, %v8341_v13  ;;  %v405_v24 = vmul.f32 %v401_v20, %v8342_v27  ;;  %v8349_v34 = vld [vmem:[#allocation98_spill] sm:$0xff]  ;;  %v8350_v1 = vld [vmem:[#allocation83_spill] sm:$0xff] }
  0x62   :  { %8336 = vst [vmem:[#allocation111_spill] sm:$0xff] %v3452_v5  ;;  %8337 = vst [vmem:[#allocation112_spill] sm:$0xff] %v3454_v55  ;;  %v406_v44 = vmul.f32 %v401_v20, %v8343_v8  ;;  %v407_v62 = vmul.f32 %v401_v20, %v8344_v38  ;;  %v408_v39 = vmul.f32 %v401_v20, %v8345_v17  ;;  %v8351_v45 = vld [vmem:[#allocation99_spill] sm:$0xff]  ;;  %v8360_v38 = vld [vmem:[#allocation88_spill] sm:$0xff] }
  0x63   :  { %8338 = vst [vmem:[#allocation113_spill] sm:$0xff] %v3457_v61  ;;  %8339 = vst [vmem:[#allocation114_spill] sm:$0xff] %v3459_v21  ;;  %v409_v49 = vmul.f32 %v401_v20, %v8346_v40  ;;  %v410_v31 = vmul.f32 %v401_v20, %v8347_v4  ;;  %v411_v18 = vmul.f32 %v401_v20, %v8348_v51  ;;  %v8358_v40 = vld [vmem:[#allocation87_spill] sm:$0xff]  ;;  %v8361_v8 = vld [vmem:[#allocation104_spill] sm:$0xff] }
  0x64   :  { %v412_v16 = vmul.f32 %v401_v20, %v8349_v34  ;;  %v413_v50 = vmul.f32 %v401_v20, %v8350_v1  ;;  %v414_v33 = vmul.f32 %v401_v20, %v8351_v45  ;;  %v415_v23 = vmul.f32 %v401_v20, %v8352_v30  ;;  %v8359_v17 = vld [vmem:[#allocation103_spill] sm:$0xff]  ;;  %v8362_v27 = vld [vmem:[#allocation89_spill] sm:$0xff]  ;;  %v8364_v29 = vld [vmem:[#allocation90_spill] sm:$0xff] }
  0x65   :  { %v416_v0 = vmul.f32 %v401_v20, %v8353_v28  ;;  %v417_v26 = vmul.f32 %v401_v20, %v8354_v57  ;;  %v418_v52 = vmul.f32 %v401_v20, %v8355_v42  ;;  %v419_v6 = vmul.f32 %v401_v20, %v8356_v19  ;;  %v8363_v13 = vld [vmem:[#allocation105_spill] sm:$0xff]  ;;  %v8365_v42 = vld [vmem:[#allocation106_spill] sm:$0xff]  ;;  %v8366_v21 = vld [vmem:[#allocation91_spill] sm:$0xff] }
  0x66   :  { %v420_v4 = vmul.f32 %v401_v20, %v8357_v36  ;;  %v421_v51 = vmul.f32 %v401_v20, %v8358_v40  ;;  %v422_v34 = vmul.f32 %v401_v20, %v8359_v17  ;;  %v423_v1 = vmul.f32 %v401_v20, %v8360_v38  ;;  %v8367_v61 = vld [vmem:[#allocation107_spill] sm:$0xff]  ;;  %v8368_v55 = vld [vmem:[#allocation93_spill] sm:$0xff]  ;;  %v8369_v38 = vld [vmem:[#allocation108_spill] sm:$0xff] }
  0x67   :  { %v424_v45 = vmul.f32 %v401_v20, %v8361_v8  ;;  %v425_v30 = vmul.f32 %v401_v20, %v8362_v27  ;;  %v426_v28 = vmul.f32 %v401_v20, %v8363_v13  ;;  %v427_v57 = vmul.f32 %v401_v20, %v8364_v29  ;;  %v8370_v5 = vld [vmem:[#allocation24_spill] sm:$0xff]  ;;  %v8371_v13 = vld [vmem:[#allocation33_spill] sm:$0xff] }
  0x68   :  { %v428_v19 = vmul.f32 %v401_v20, %v8365_v42  ;;  %v429_v36 = vmul.f32 %v401_v20, %v8366_v21  ;;  %v430_v40 = vmul.f32 %v401_v20, %v8367_v61  ;;  %v431_v17 = vmul.f32 %v401_v20, %v8368_v55  ;;  %v8372_v29 = vld [vmem:[#allocation29_spill] sm:$0xff]  ;;  %v8412_v21 = vld [vmem:[#allocation72_spill] sm:$0xff] }
  0x69   :  { %v432_v8 = vmul.f32 %v401_v20, %v8369_v38  ;;  %v3496_v27 = vadd.f32 %v402_v22, %v8370_v5  ;;  %v3499_v14 = vadd.f32 %v403_v41, %v8371_v13  ;;  %v3502_v54 = vadd.f32 %v404_v43, %v8372_v29  ;;  %v8373_v42 = vld [vmem:[#allocation37_spill] sm:$0xff]  ;;  %v8411_v38 = vld [vmem:[#allocation55_spill] sm:$0xff] }
  0x6a   :  { %v3505_v37 = vadd.f32 %v405_v24, %v8373_v42  ;;  %v3508_v61 = vadd.f32 %v406_v44, %v3405_v11  ;;  %v3511_v55 = vadd.f32 %v407_v62, %v3407_v47  ;;  %v3514_v20 = vadd.f32 %v408_v39, %v3410_v63 }
  0x6b   :  { %v3517_v5 = vadd.f32 %v409_v49, %v3412_v9  ;;  %v3520_v22 = vadd.f32 %v410_v31, %v3414_v58  ;;  %v3523_v29 = vadd.f32 %v411_v18, %v3416_v59  ;;  %v3526_v41 = vadd.f32 %v412_v16, %v3418_v48  ;;  %v8389_v49 = vld [vmem:[#allocation114_spill] sm:$0xff]  ;;  %v8391_v31 = vld [vmem:[#allocation61_spill] sm:$0xff]  ;;  %v8392_v18 = vld [vmem:[#allocation16_spill] sm:$0xff] }
  0x6c   :  { %v3529_v11 = vadd.f32 %v413_v50, %v3420_v15  ;;  %v3532_v47 = vadd.f32 %v414_v33, %v3422_v32  ;;  %v3535_v63 = vadd.f32 %v415_v23, %v3424_v60  ;;  %v3538_v9 = vadd.f32 %v416_v0, %v3426_v25  ;;  %v8397_v23 = vld [vmem:[#allocation28_spill] sm:$0xff] }
  0x6d   :  { %v3541_v58 = vadd.f32 %v417_v26, %v3428_v56  ;;  %v3544_v59 = vadd.f32 %v418_v52, %v3430_v12  ;;  %v3547_v48 = vadd.f32 %v419_v6, %v3432_v35  ;;  %v3550_v15 = vadd.f32 %v420_v4, %v3434_v3  ;;  %v8377_v35 = vld [vmem:[#allocation30_spill] sm:$0xff]  ;;  %v8379_v3 = vld [vmem:[#allocation41_spill] sm:$0xff]  ;;  %v8402_v6 = vld [vmem:[#allocation67_spill] sm:$0xff] }
  0x6e   :  { %v3553_v60 = vadd.f32 %v421_v51, %v3436_v7  ;;  %v3556_v32 = vadd.f32 %v422_v34, %v3438_v2  ;;  %v3559_v25 = vadd.f32 %v423_v1, %v3440_v46  ;;  %v3562_v56 = vadd.f32 %v424_v45, %v3442_v53  ;;  %v8381_v7 = vld [vmem:[#allocation110_spill] sm:$0xff]  ;;  %v8383_v2 = vld [vmem:[#allocation111_spill] sm:$0xff]  ;;  %v8385_v46 = vld [vmem:[#allocation112_spill] sm:$0xff] }
  0x6f   :  { %v3565_v12 = vadd.f32 %v425_v30, %v3444_v10  ;;  %v3568_v13 = vadd.f32 %v426_v28, %v8377_v35  ;;  %v3571_v43 = vadd.f32 %v427_v57, %v8379_v3  ;;  %v3574_v24 = vadd.f32 %v428_v19, %v8381_v7  ;;  %v8387_v53 = vld [vmem:[#allocation113_spill] sm:$0xff]  ;;  %v8394_v1 = vld [vmem:[#allocation63_spill] sm:$0xff]  ;;  %v8395_v45 = vld [vmem:[#allocation20_spill] sm:$0xff] }
  0x70   :  { %8374 = vst [vmem:[#allocation24_spill] sm:$0xff] %v3559_v25  ;;  %8375 = vst [vmem:[#allocation33_spill] sm:$0xff] %v3562_v56  ;;  %v3577_v44 = vadd.f32 %v429_v36, %v8383_v2  ;;  %v3580_v62 = vadd.f32 %v430_v40, %v8385_v46  ;;  %v3583_v39 = vadd.f32 %v431_v17, %v8387_v53  ;;  %v464_v10 = vstv %s3486_s29  ;;  %v8396_v30 = vld [vmem:[#allocation64_spill] sm:$0xff]  ;;  %v8398_v17 = vld [vmem:[#allocation65_spill] sm:$0xff] }
  0x71   :  { %8376 = vst [vmem:[#allocation29_spill] sm:$0xff] %v3565_v12  ;;  %8378 = vst [vmem:[#allocation37_spill] sm:$0xff] %v3568_v13  ;;  %v3587_v4 = vadd.f32 %v432_v8, %v8389_v49  ;;  %v465_v51 = vmul.f32 %v464_v10, %v8391_v31  ;;  %v466_v34 = vmul.f32 %v464_v10, %v8392_v18  ;;  %v3592_v16 = vstv %s3492_s30  ;;  %v8399_v57 = vld [vmem:[#allocation44_spill] sm:$0xff]  ;;  %v8400_v8 = vld [vmem:[#allocation66_spill] sm:$0xff] }
  0x72   :  { %8380 = vst [vmem:[#allocation30_spill] sm:$0xff] %v3571_v43  ;;  %8382 = vst [vmem:[#allocation41_spill] sm:$0xff] %v3574_v24  ;;  %v467_v50 = vmul.f32 %v464_v10, %v8394_v1  ;;  %v468_v33 = vmul.f32 %v464_v10, %v8395_v45  ;;  %v469_v40 = vmul.f32 %v464_v10, %v8396_v30  ;;  %v8401_v52 = vld [vmem:[#allocation45_spill] sm:$0xff]  ;;  %v8404_v7 = vld [vmem:[#allocation68_spill] sm:$0xff] }
  0x73   :  { %8384 = vst [vmem:[#allocation110_spill] sm:$0xff] %v3577_v44  ;;  %8386 = vst [vmem:[#allocation111_spill] sm:$0xff] %v3580_v62  ;;  %v470_v28 = vmul.f32 %v464_v10, %v8397_v23  ;;  %v471_v0 = vmul.f32 %v464_v10, %v8398_v17  ;;  %v472_v26 = vmul.f32 %v464_v10, %v8399_v57  ;;  %v8403_v35 = vld [vmem:[#allocation49_spill] sm:$0xff]  ;;  %v8405_v46 = vld [vmem:[#allocation52_spill] sm:$0xff] }
  0x74   :  { %8388 = vst [vmem:[#allocation112_spill] sm:$0xff] %v3583_v39  ;;  %8390 = vst [vmem:[#allocation113_spill] sm:$0xff] %v3587_v4  ;;  %v473_v42 = vmul.f32 %v464_v10, %v8400_v8  ;;  %v474_v19 = vmul.f32 %v464_v10, %v8401_v52  ;;  %v475_v36 = vmul.f32 %v464_v10, %v8402_v6  ;;  %v8406_v49 = vld [vmem:[#allocation69_spill] sm:$0xff]  ;;  %v8408_v30 = vld [vmem:[#allocation70_spill] sm:$0xff] }
  0x75   :  { %8393 = vst [vmem:[#allocation114_spill] sm:$0xff] %v3592_v16  ;;  %v476_v3 = vmul.f32 %v464_v10, %v8403_v35  ;;  %v477_v2 = vmul.f32 %v464_v10, %v8404_v7  ;;  %v478_v53 = vmul.f32 %v464_v10, %v8405_v46  ;;  %v479_v31 = vmul.f32 %v464_v10, %v8406_v49  ;;  %v8407_v18 = vld [vmem:[#allocation53_spill] sm:$0xff]  ;;  %v8409_v45 = vld [vmem:[#allocation54_spill] sm:$0xff]  ;;  %v8410_v1 = vld [vmem:[#allocation71_spill] sm:$0xff] }
  0x76   :  { %v480_v23 = vmul.f32 %v464_v10, %v8407_v18  ;;  %v481_v17 = vmul.f32 %v464_v10, %v8408_v30  ;;  %v482_v57 = vmul.f32 %v464_v10, %v8409_v45  ;;  %v483_v8 = vmul.f32 %v464_v10, %v8410_v1  ;;  %v8413_v16 = vld [vmem:[#allocation56_spill] sm:$0xff]  ;;  %v8414_v4 = vld [vmem:[#allocation73_spill] sm:$0xff]  ;;  %v8416_v62 = vld [vmem:[#allocation74_spill] sm:$0xff] }
  0x77   :  { %v484_v52 = vmul.f32 %v464_v10, %v8411_v38  ;;  %v485_v6 = vmul.f32 %v464_v10, %v8412_v21  ;;  %v486_v35 = vmul.f32 %v464_v10, %v8413_v16  ;;  %v487_v7 = vmul.f32 %v464_v10, %v8414_v4  ;;  %v8415_v39 = vld [vmem:[#allocation57_spill] sm:$0xff]  ;;  %v8417_v44 = vld [vmem:[#allocation58_spill] sm:$0xff]  ;;  %v8418_v24 = vld [vmem:[#allocation75_spill] sm:$0xff] }
  0x78   :  { %v488_v46 = vmul.f32 %v464_v10, %v8415_v39  ;;  %v489_v49 = vmul.f32 %v464_v10, %v8416_v62  ;;  %v490_v18 = vmul.f32 %v464_v10, %v8417_v44  ;;  %v491_v30 = vmul.f32 %v464_v10, %v8418_v24  ;;  %v8419_v43 = vld [vmem:[#allocation59_spill] sm:$0xff]  ;;  %v8420_v13 = vld [vmem:[#allocation76_spill] sm:$0xff]  ;;  %v8422_v56 = vld [vmem:[#allocation77_spill] sm:$0xff] }
  0x79   :  { %v492_v45 = vmul.f32 %v464_v10, %v8419_v43  ;;  %v493_v1 = vmul.f32 %v464_v10, %v8420_v13  ;;  %v8421_v12 = vld [vmem:[#allocation60_spill] sm:$0xff]  ;;  %v495_v21 = vmul.f32 %v464_v10, %v8422_v56  ;;  %v8423_v25 = vld [vmem:[#allocation62_spill] sm:$0xff]  ;;  %v3625_v4 = vadd.f32 %v465_v51, %v3496_v27  ;;  %v8465_v62 = vld [vmem:[#allocation39_spill] sm:$0xff] }
  0x7a   :  { %v494_v38 = vmul.f32 %v464_v10, %v8421_v12  ;;  %v496_v16 = vmul.f32 %v464_v10, %v8423_v25  ;;  %v3628_v39 = vadd.f32 %v466_v34, %v3496_v27  ;;  %v3631_v44 = vadd.f32 %v467_v50, %v3499_v14  ;;  %v8462_v25 = vld [vmem:[#allocation35_spill] sm:$0xff]  ;;  %v8463_v56 = vld [vmem:[#allocation36_spill] sm:$0xff]  ;;  %v8464_v43 = vld [vmem:[#allocation38_spill] sm:$0xff] }
  0x7b   :  { %v3634_v24 = vadd.f32 %v468_v33, %v3502_v54  ;;  %v3637_v13 = vadd.f32 %v469_v40, %v3505_v37  ;;  %v3640_v12 = vadd.f32 %v470_v28, %v3508_v61  ;;  %v3643_v10 = vadd.f32 %v471_v0, %v3511_v55  ;;  %v8435_v0 = vld [vmem:[#allocation111_spill] sm:$0xff] }
  0x7c   :  { %v3646_v51 = vadd.f32 %v472_v26, %v3514_v20  ;;  %v3649_v27 = vadd.f32 %v473_v42, %v3517_v5  ;;  %v3652_v14 = vadd.f32 %v474_v19, %v3520_v22  ;;  %v3655_v54 = vadd.f32 %v475_v36, %v3523_v29  ;;  %v8437_v26 = vld [vmem:[#allocation112_spill] sm:$0xff]  ;;  %v8439_v42 = vld [vmem:[#allocation113_spill] sm:$0xff] }
  0x7d   :  { %v3658_v37 = vadd.f32 %v476_v3, %v3526_v41  ;;  %v3661_v61 = vadd.f32 %v477_v2, %v3529_v11  ;;  %v3664_v55 = vadd.f32 %v478_v53, %v3532_v47  ;;  %v3667_v20 = vadd.f32 %v479_v31, %v3535_v63  ;;  %v8441_v19 = vld [vmem:[#allocation8_spill] sm:$0xff] }
  0x7e   :  { %v3670_v5 = vadd.f32 %v480_v23, %v3538_v9  ;;  %v3673_v22 = vadd.f32 %v481_v17, %v3541_v58  ;;  %v3676_v29 = vadd.f32 %v482_v57, %v3544_v59  ;;  %v3679_v41 = vadd.f32 %v483_v8, %v3547_v48  ;;  %v8424_v9 = vld [vmem:[#allocation24_spill] sm:$0xff]  ;;  %v8425_v58 = vld [vmem:[#allocation33_spill] sm:$0xff] }
  0x7f   :  { %v3682_v11 = vadd.f32 %v484_v52, %v3550_v15  ;;  %v3685_v47 = vadd.f32 %v485_v6, %v3553_v60  ;;  %v3688_v63 = vadd.f32 %v486_v35, %v3556_v32  ;;  %v3691_v34 = vadd.f32 %v487_v7, %v8424_v9  ;;  %v8426_v59 = vld [vmem:[#allocation29_spill] sm:$0xff]  ;;  %v8429_v15 = vld [vmem:[#allocation30_spill] sm:$0xff] }
  0x80   :  { %v3694_v50 = vadd.f32 %v488_v46, %v8425_v58  ;;  %v3697_v33 = vadd.f32 %v489_v49, %v8426_v59  ;;  %v8427_v48 = vld [vmem:[#allocation37_spill] sm:$0xff]  ;;  %v3703_v23 = vadd.f32 %v491_v30, %v8429_v15  ;;  %v8433_v32 = vld [vmem:[#allocation110_spill] sm:$0xff]  ;;  %v3712_v57 = vadd.f32 %v494_v38, %v8435_v0  ;;  %v8446_v38 = vld [vmem:[#allocation12_spill] sm:$0xff] }
  0x81   :  { %v3700_v40 = vadd.f32 %v490_v18, %v8427_v48  ;;  %v8431_v60 = vld [vmem:[#allocation41_spill] sm:$0xff]  ;;  %v3709_v17 = vadd.f32 %v493_v1, %v8433_v32  ;;  %v3715_v8 = vadd.f32 %v495_v21, %v8437_v26  ;;  %v3718_v52 = vadd.f32 %v496_v16, %v8439_v42  ;;  %v8442_v6 = vld [vmem:[#allocation114_spill] sm:$0xff]  ;;  %v8445_v1 = vld [vmem:[#allocation11_spill] sm:$0xff] }
  0x82   :  { %8430 = vst [vmem:[#allocation16_spill] sm:$0xff] %v3703_v23  ;;  %v3706_v28 = vadd.f32 %v492_v45, %v8431_v60  ;;  %8436 = vst [vmem:[#allocation29_spill] sm:$0xff] %v3712_v57  ;;  %v530_v36 = vmul.f32 %v8442_v6, %v8441_v19  ;;  %v8443_v30 = vld [vmem:[#allocation9_spill] sm:$0xff]  ;;  %v8444_v45 = vld [vmem:[#allocation10_spill] sm:$0xff]  ;;  %v533_v7 = vmul.f32 %v8442_v6, %v8445_v1 }
  0x83   :  { %8428 = vst [vmem:[#allocation61_spill] sm:$0xff] %v3700_v40  ;;  %8434 = vst [vmem:[#allocation33_spill] sm:$0xff] %v3709_v17  ;;  %v531_v35 = vmul.f32 %v8442_v6, %v8443_v30  ;;  %v532_v3 = vmul.f32 %v8442_v6, %v8444_v45  ;;  %v534_v2 = vmul.f32 %v8442_v6, %v8446_v38  ;;  %v8447_v21 = vld [vmem:[#allocation13_spill] sm:$0xff]  ;;  %v8448_v16 = vld [vmem:[#allocation14_spill] sm:$0xff] }
  0x84   :  { %8432 = vst [vmem:[#allocation24_spill] sm:$0xff] %v3706_v28  ;;  %8438 = vst [vmem:[#allocation37_spill] sm:$0xff] %v3715_v8  ;;  %v535_v46 = vmul.f32 %v8442_v6, %v8447_v21  ;;  %v536_v53 = vmul.f32 %v8442_v6, %v8448_v16  ;;  %v8449_v49 = vld [vmem:[#allocation15_spill] sm:$0xff]  ;;  %v8450_v18 = vld [vmem:[#allocation17_spill] sm:$0xff] }
  0x85   :  { %8440 = vst [vmem:[#allocation30_spill] sm:$0xff] %v3718_v52  ;;  %v537_v31 = vmul.f32 %v8442_v6, %v8449_v49  ;;  %v538_v9 = vmul.f32 %v8442_v6, %v8450_v18  ;;  %v8451_v58 = vld [vmem:[#allocation18_spill] sm:$0xff]  ;;  %v8452_v48 = vld [vmem:[#allocation19_spill] sm:$0xff]  ;;  %v8453_v60 = vld [vmem:[#allocation21_spill] sm:$0xff] }
  0x86   :  { %v539_v59 = vmul.f32 %v8442_v6, %v8451_v58  ;;  %v540_v15 = vmul.f32 %v8442_v6, %v8452_v48  ;;  %v541_v32 = vmul.f32 %v8442_v6, %v8453_v60  ;;  %v8454_v0 = vld [vmem:[#allocation22_spill] sm:$0xff]  ;;  %v8455_v42 = vld [vmem:[#allocation23_spill] sm:$0xff]  ;;  %v8456_v30 = vld [vmem:[#allocation25_spill] sm:$0xff] }
  0x87   :  { %v542_v26 = vmul.f32 %v8442_v6, %v8454_v0  ;;  %v543_v19 = vmul.f32 %v8442_v6, %v8455_v42  ;;  %v544_v45 = vmul.f32 %v8442_v6, %v8456_v30  ;;  %v8457_v1 = vld [vmem:[#allocation26_spill] sm:$0xff]  ;;  %v8458_v21 = vld [vmem:[#allocation27_spill] sm:$0xff]  ;;  %v8460_v58 = vld [vmem:[#allocation32_spill] sm:$0xff]  ;;  %v550_v42 = vmul.f32 %v8442_v6, %v8462_v25 }
  0x88   :  { %v545_v38 = vmul.f32 %v8442_v6, %v8457_v1  ;;  %v546_v16 = vmul.f32 %v8442_v6, %v8458_v21  ;;  %v8459_v49 = vld [vmem:[#allocation31_spill] sm:$0xff]  ;;  %v548_v48 = vmul.f32 %v8442_v6, %v8460_v58  ;;  %v8461_v60 = vld [vmem:[#allocation34_spill] sm:$0xff]  ;;  %v551_v30 = vmul.f32 %v8442_v6, %v8463_v56  ;;  %v8466_v52 = vld [vmem:[#allocation40_spill] sm:$0xff] }
  0x89   :  { %v547_v18 = vmul.f32 %v8442_v6, %v8459_v49  ;;  %v549_v0 = vmul.f32 %v8442_v6, %v8461_v60  ;;  %v552_v1 = vmul.f32 %v8442_v6, %v8464_v43  ;;  %v553_v21 = vmul.f32 %v8442_v6, %v8465_v62  ;;  %v8467_v8 = vld [vmem:[#allocation42_spill] sm:$0xff]  ;;  %v8468_v57 = vld [vmem:[#allocation43_spill] sm:$0xff]  ;;  %v8471_v23 = vld [vmem:[#allocation48_spill] sm:$0xff] }
  0x8a   :  { %v554_v49 = vmul.f32 %v8442_v6, %v8466_v52  ;;  %v555_v58 = vmul.f32 %v8442_v6, %v8467_v8  ;;  %v556_v60 = vmul.f32 %v8442_v6, %v8468_v57  ;;  %v8469_v17 = vld [vmem:[#allocation46_spill] sm:$0xff]  ;;  %v8470_v28 = vld [vmem:[#allocation47_spill] sm:$0xff]  ;;  %v559_v43 = vmul.f32 %v8442_v6, %v8471_v23 }
  0x8b   :  { %v557_v25 = vmul.f32 %v8442_v6, %v8469_v17  ;;  %v558_v56 = vmul.f32 %v8442_v6, %v8470_v28  ;;  %v8472_v62 = vld [vmem:[#allocation50_spill] sm:$0xff]  ;;  %v8473_v8 = vld [vmem:[#allocation51_spill] sm:$0xff]  ;;  %v3789_v57 = vadd.f32 %v530_v36, %v3625_v4  ;;  %v3792_v17 = vadd.f32 %v531_v35, %v3628_v39  ;;  %v8480_v35 = vld [vmem:[#allocation16_spill] sm:$0xff] }
  0x8c   :  { %v560_v52 = vmul.f32 %v8442_v6, %v8472_v62  ;;  %v561_v40 = vmul.f32 %v8442_v6, %v8473_v8  ;;  %v3799_v23 = vadd.f32 %v532_v3, %v3631_v44  ;;  %v3802_v28 = vadd.f32 %v533_v7, %v3634_v24  ;;  %v8482_v3 = vld [vmem:[#allocation24_spill] sm:$0xff]  ;;  %v8505_v8 = vld [vmem:[#allocation83_spill] sm:$0xff] }
  0x8d   :  { %v3805_v62 = vadd.f32 %v534_v2, %v3637_v13  ;;  %v3808_v6 = vadd.f32 %v535_v46, %v3640_v12  ;;  %v3811_v4 = vadd.f32 %v536_v53, %v3643_v10  ;;  %v3814_v39 = vadd.f32 %v537_v31, %v3646_v51 }
  0x8e   :  { %v3817_v36 = vadd.f32 %v538_v9, %v3649_v27  ;;  %v3820_v44 = vadd.f32 %v539_v59, %v3652_v14  ;;  %v3823_v24 = vadd.f32 %v540_v15, %v3655_v54  ;;  %v3826_v13 = vadd.f32 %v541_v32, %v3658_v37  ;;  %v8493_v15 = vld [vmem:[#allocation78_spill] sm:$0xff] }
  0x8f   :  { %v3829_v12 = vadd.f32 %v542_v26, %v3661_v61  ;;  %v3832_v10 = vadd.f32 %v543_v19, %v3664_v55  ;;  %v3835_v51 = vadd.f32 %v544_v45, %v3667_v20  ;;  %v3838_v27 = vadd.f32 %v545_v38, %v3670_v5  ;;  %v8494_v26 = vld [vmem:[#allocation92_spill] sm:$0xff] }
  0x90   :  { %v3841_v14 = vadd.f32 %v546_v16, %v3673_v22  ;;  %v3844_v54 = vadd.f32 %v547_v18, %v3676_v29  ;;  %v3847_v37 = vadd.f32 %v548_v48, %v3679_v41  ;;  %v3850_v61 = vadd.f32 %v549_v0, %v3682_v11  ;;  %v8478_v41 = vld [vmem:[#allocation61_spill] sm:$0xff]  ;;  %v8497_v16 = vld [vmem:[#allocation79_spill] sm:$0xff] }
  0x91   :  { %v3853_v55 = vadd.f32 %v550_v42, %v3685_v47  ;;  %v3856_v20 = vadd.f32 %v551_v30, %v3688_v63  ;;  %v3859_v5 = vadd.f32 %v552_v1, %v3691_v34  ;;  %v3862_v22 = vadd.f32 %v553_v21, %v3694_v50  ;;  %v8484_v63 = vld [vmem:[#allocation33_spill] sm:$0xff]  ;;  %v8498_v48 = vld [vmem:[#allocation95_spill] sm:$0xff]  ;;  %v8499_v42 = vld [vmem:[#allocation80_spill] sm:$0xff] }
  0x92   :  { %v3865_v29 = vadd.f32 %v554_v49, %v3697_v33  ;;  %v3868_v11 = vadd.f32 %v555_v58, %v8478_v41  ;;  %v3871_v47 = vadd.f32 %v556_v60, %v8480_v35  ;;  %v3874_v7 = vadd.f32 %v557_v25, %v8482_v3  ;;  %v8486_v34 = vld [vmem:[#allocation29_spill] sm:$0xff]  ;;  %v8490_v33 = vld [vmem:[#allocation30_spill] sm:$0xff]  ;;  %v8500_v1 = vld [vmem:[#allocation96_spill] sm:$0xff] }
  0x93   :  { %8474 = vst [vmem:[#allocation41_spill] sm:$0xff] %v3856_v20  ;;  %8475 = vst [vmem:[#allocation110_spill] sm:$0xff] %v3859_v5  ;;  %v3877_v2 = vadd.f32 %v558_v56, %v8484_v63  ;;  %v3880_v46 = vadd.f32 %v559_v43, %v8486_v34  ;;  %v8488_v50 = vld [vmem:[#allocation37_spill] sm:$0xff]  ;;  %v3886_v31 = vadd.f32 %v561_v40, %v8490_v33  ;;  %v594_v9 = vstv %s3780_s4  ;;  %v8503_v25 = vld [vmem:[#allocation82_spill] sm:$0xff] }
  0x94   :  { %8476 = vst [vmem:[#allocation111_spill] sm:$0xff] %v3862_v22  ;;  %8477 = vst [vmem:[#allocation112_spill] sm:$0xff] %v3865_v29  ;;  %v3883_v53 = vadd.f32 %v560_v52, %v8488_v50  ;;  %v3890_v59 = vstv %s3782_s5  ;;  %v595_v32 = vmul.f32 %v594_v9, %v8493_v15  ;;  %v596_v19 = vmul.f32 %v594_v9, %v8494_v26  ;;  %v8501_v21 = vld [vmem:[#allocation81_spill] sm:$0xff]  ;;  %v8504_v43 = vld [vmem:[#allocation98_spill] sm:$0xff] }
  0x95   :  { %8479 = vst [vmem:[#allocation113_spill] sm:$0xff] %v3868_v11  ;;  %8481 = vst [vmem:[#allocation8_spill] sm:$0xff] %v3871_v47  ;;  %v3895_v45 = vstv %s3794_s6  ;;  %v3898_v38 = vstv %s3796_s7  ;;  %v597_v18 = vmul.f32 %v594_v9, %v8497_v16  ;;  %v598_v0 = vmul.f32 %v594_v9, %v8498_v48  ;;  %v8502_v58 = vld [vmem:[#allocation97_spill] sm:$0xff]  ;;  %v8506_v35 = vld [vmem:[#allocation99_spill] sm:$0xff] }
  0x96   :  { %8483 = vst [vmem:[#allocation114_spill] sm:$0xff] %v3874_v7  ;;  %8485 = vst [vmem:[#allocation9_spill] sm:$0xff] %v3877_v2  ;;  %v599_v30 = vmul.f32 %v594_v9, %v8499_v42  ;;  %v600_v40 = vmul.f32 %v594_v9, %v8500_v1  ;;  %v601_v49 = vmul.f32 %v594_v9, %v8501_v21  ;;  %v8507_v63 = vld [vmem:[#allocation84_spill] sm:$0xff]  ;;  %v8509_v15 = vld [vmem:[#allocation85_spill] sm:$0xff] }
  0x97   :  { %8487 = vst [vmem:[#allocation10_spill] sm:$0xff] %v3880_v46  ;;  %8489 = vst [vmem:[#allocation11_spill] sm:$0xff] %v3883_v53  ;;  %v602_v60 = vmul.f32 %v594_v9, %v8502_v58  ;;  %v603_v56 = vmul.f32 %v594_v9, %v8503_v25  ;;  %v604_v52 = vmul.f32 %v594_v9, %v8504_v43  ;;  %v8508_v50 = vld [vmem:[#allocation100_spill] sm:$0xff]  ;;  %v8510_v42 = vld [vmem:[#allocation101_spill] sm:$0xff] }
  0x98   :  { %8491 = vst [vmem:[#allocation12_spill] sm:$0xff] %v3886_v31  ;;  %8492 = vst [vmem:[#allocation13_spill] sm:$0xff] %v3890_v59  ;;  %v605_v41 = vmul.f32 %v594_v9, %v8505_v8  ;;  %v606_v3 = vmul.f32 %v594_v9, %v8506_v35  ;;  %v607_v34 = vmul.f32 %v594_v9, %v8507_v63  ;;  %v8511_v48 = vld [vmem:[#allocation86_spill] sm:$0xff]  ;;  %v8513_v16 = vld [vmem:[#allocation87_spill] sm:$0xff] }
  0x99   :  { %8495 = vst [vmem:[#allocation14_spill] sm:$0xff] %v3895_v45  ;;  %8496 = vst [vmem:[#allocation15_spill] sm:$0xff] %v3898_v38  ;;  %v608_v33 = vmul.f32 %v594_v9, %v8508_v50  ;;  %v609_v26 = vmul.f32 %v594_v9, %v8509_v15  ;;  %v610_v1 = vmul.f32 %v594_v9, %v8510_v42  ;;  %v8512_v38 = vld [vmem:[#allocation102_spill] sm:$0xff]  ;;  %v8514_v45 = vld [vmem:[#allocation103_spill] sm:$0xff] }
  0x9a   :  { %v611_v21 = vmul.f32 %v594_v9, %v8511_v48  ;;  %v612_v58 = vmul.f32 %v594_v9, %v8512_v38  ;;  %v613_v25 = vmul.f32 %v594_v9, %v8513_v16  ;;  %v614_v43 = vmul.f32 %v594_v9, %v8514_v45  ;;  %v8515_v59 = vld [vmem:[#allocation88_spill] sm:$0xff]  ;;  %v8517_v53 = vld [vmem:[#allocation89_spill] sm:$0xff]  ;;  %v8519_v2 = vld [vmem:[#allocation90_spill] sm:$0xff] }
  0x9b   :  { %v615_v8 = vmul.f32 %v594_v9, %v8515_v59  ;;  %v8516_v31 = vld [vmem:[#allocation104_spill] sm:$0xff]  ;;  %v617_v63 = vmul.f32 %v594_v9, %v8517_v53  ;;  %v8518_v46 = vld [vmem:[#allocation105_spill] sm:$0xff]  ;;  %v619_v15 = vmul.f32 %v594_v9, %v8519_v2  ;;  %v8520_v7 = vld [vmem:[#allocation106_spill] sm:$0xff]  ;;  %v3931_v53 = vadd.f32 %v595_v32, %v3789_v57 }
  0x9c   :  { %v616_v35 = vmul.f32 %v594_v9, %v8516_v31  ;;  %v618_v50 = vmul.f32 %v594_v9, %v8518_v46  ;;  %v620_v42 = vmul.f32 %v594_v9, %v8520_v7  ;;  %v8521_v47 = vld [vmem:[#allocation91_spill] sm:$0xff]  ;;  %v8523_v29 = vld [vmem:[#allocation93_spill] sm:$0xff]  ;;  %v8524_v22 = vld [vmem:[#allocation108_spill] sm:$0xff]  ;;  %v3934_v46 = vadd.f32 %v596_v19, %v3792_v17 }
  0x9d   :  { %v621_v48 = vmul.f32 %v594_v9, %v8521_v47  ;;  %v8522_v11 = vld [vmem:[#allocation107_spill] sm:$0xff]  ;;  %v623_v16 = vmul.f32 %v594_v9, %v8523_v29  ;;  %v624_v45 = vmul.f32 %v594_v9, %v8524_v22  ;;  %v8525_v5 = vld [vmem:[#allocation94_spill] sm:$0xff]  ;;  %v8526_v20 = vld [vmem:[#allocation109_spill] sm:$0xff]  ;;  %v3937_v7 = vadd.f32 %v597_v18, %v3799_v23 }
  0x9e   :  { %v622_v38 = vmul.f32 %v594_v9, %v8522_v11  ;;  %v625_v59 = vmul.f32 %v594_v9, %v8525_v5  ;;  %v626_v31 = vmul.f32 %v594_v9, %v8526_v20  ;;  %v3940_v47 = vadd.f32 %v598_v0, %v3802_v28  ;;  %v8566_v20 = vld [vmem:[#allocation73_spill] sm:$0xff]  ;;  %v8568_v11 = vld [vmem:[#allocation74_spill] sm:$0xff] }
  0x9f   :  { %v3943_v29 = vadd.f32 %v599_v30, %v3805_v62  ;;  %v3946_v22 = vadd.f32 %v600_v40, %v3808_v6  ;;  %v3949_v9 = vadd.f32 %v601_v49, %v3811_v4  ;;  %v3952_v57 = vadd.f32 %v602_v60, %v3814_v39  ;;  %v8567_v5 = vld [vmem:[#allocation57_spill] sm:$0xff]  ;;  %v8569_v2 = vld [vmem:[#allocation58_spill] sm:$0xff] }
  0xa0   :  { %v3955_v17 = vadd.f32 %v603_v56, %v3817_v36  ;;  %v3958_v23 = vadd.f32 %v604_v52, %v3820_v44  ;;  %v3961_v28 = vadd.f32 %v605_v41, %v3823_v24  ;;  %v3964_v62 = vadd.f32 %v606_v3, %v3826_v13 }
  0xa1   :  { %v3967_v6 = vadd.f32 %v607_v34, %v3829_v12  ;;  %v3970_v4 = vadd.f32 %v608_v33, %v3832_v10  ;;  %v3973_v39 = vadd.f32 %v609_v26, %v3835_v51  ;;  %v3976_v36 = vadd.f32 %v610_v1, %v3838_v27  ;;  %v8527_v51 = vld [vmem:[#allocation41_spill] sm:$0xff]  ;;  %v8528_v27 = vld [vmem:[#allocation110_spill] sm:$0xff] }
  0xa2   :  { %v3979_v44 = vadd.f32 %v611_v21, %v3841_v14  ;;  %v3982_v24 = vadd.f32 %v612_v58, %v3844_v54  ;;  %v3985_v13 = vadd.f32 %v613_v25, %v3847_v37  ;;  %v3988_v12 = vadd.f32 %v614_v43, %v3850_v61  ;;  %v8529_v14 = vld [vmem:[#allocation111_spill] sm:$0xff]  ;;  %v8530_v54 = vld [vmem:[#allocation112_spill] sm:$0xff]  ;;  %v8531_v37 = vld [vmem:[#allocation113_spill] sm:$0xff] }
  0xa3   :  { %v3991_v10 = vadd.f32 %v615_v8, %v3853_v55  ;;  %v3994_v32 = vadd.f32 %v616_v35, %v8527_v51  ;;  %v3997_v19 = vadd.f32 %v617_v63, %v8528_v27  ;;  %v4000_v18 = vadd.f32 %v618_v50, %v8529_v14  ;;  %v8533_v61 = vld [vmem:[#allocation8_spill] sm:$0xff]  ;;  %v8535_v55 = vld [vmem:[#allocation114_spill] sm:$0xff]  ;;  %v8537_v21 = vld [vmem:[#allocation9_spill] sm:$0xff] }
  0xa4   :  { %v4003_v0 = vadd.f32 %v619_v15, %v8530_v54  ;;  %v4006_v30 = vadd.f32 %v620_v42, %v8531_v37  ;;  %v4009_v1 = vadd.f32 %v621_v48, %v8533_v61  ;;  %v4012_v40 = vadd.f32 %v622_v38, %v8535_v55  ;;  %v8539_v58 = vld [vmem:[#allocation10_spill] sm:$0xff]  ;;  %v8541_v25 = vld [vmem:[#allocation11_spill] sm:$0xff]  ;;  %v8543_v43 = vld [vmem:[#allocation12_spill] sm:$0xff] }
  0xa5   :  { %v4015_v49 = vadd.f32 %v623_v16, %v8537_v21  ;;  %v4018_v60 = vadd.f32 %v624_v45, %v8539_v58  ;;  %v4021_v56 = vadd.f32 %v625_v59, %v8541_v25  ;;  %v4024_v52 = vadd.f32 %v626_v31, %v8543_v43  ;;  %v8545_v42 = vld [vmem:[#allocation63_spill] sm:$0xff]  ;;  %v8546_v8 = vld [vmem:[#allocation13_spill] sm:$0xff]  ;;  %v8547_v48 = vld [vmem:[#allocation20_spill] sm:$0xff] }
  0xa6   :  { %8532 = vst [vmem:[#allocation17_spill] sm:$0xff] %v4006_v30  ;;  %8534 = vst [vmem:[#allocation18_spill] sm:$0xff] %v4009_v1  ;;  %v660_v41 = vmul.f32 %v8546_v8, %v8545_v42  ;;  %v661_v35 = vmul.f32 %v8546_v8, %v8547_v48  ;;  %v8548_v38 = vld [vmem:[#allocation64_spill] sm:$0xff]  ;;  %v8550_v45 = vld [vmem:[#allocation65_spill] sm:$0xff] }
  0xa7   :  { %8536 = vst [vmem:[#allocation19_spill] sm:$0xff] %v4012_v40  ;;  %8538 = vst [vmem:[#allocation21_spill] sm:$0xff] %v4015_v49  ;;  %v662_v3 = vmul.f32 %v8546_v8, %v8548_v38  ;;  %v8549_v16 = vld [vmem:[#allocation28_spill] sm:$0xff]  ;;  %v664_v34 = vmul.f32 %v8546_v8, %v8550_v45  ;;  %v8552_v31 = vld [vmem:[#allocation66_spill] sm:$0xff] }
  0xa8   :  { %8540 = vst [vmem:[#allocation22_spill] sm:$0xff] %v4018_v60  ;;  %8542 = vst [vmem:[#allocation23_spill] sm:$0xff] %v4021_v56  ;;  %v663_v63 = vmul.f32 %v8546_v8, %v8549_v16  ;;  %v8551_v59 = vld [vmem:[#allocation44_spill] sm:$0xff]  ;;  %v666_v33 = vmul.f32 %v8546_v8, %v8552_v31  ;;  %v8553_v15 = vld [vmem:[#allocation45_spill] sm:$0xff]  ;;  %v4088_v30 = vadd.f32 %v660_v41, %v3931_v53 }
  0xa9   :  { %8544 = vst [vmem:[#allocation25_spill] sm:$0xff] %v4024_v52  ;;  %v665_v50 = vmul.f32 %v8546_v8, %v8551_v59  ;;  %v667_v26 = vmul.f32 %v8546_v8, %v8553_v15  ;;  %v8554_v51 = vld [vmem:[#allocation67_spill] sm:$0xff]  ;;  %v8555_v14 = vld [vmem:[#allocation49_spill] sm:$0xff]  ;;  %v8556_v37 = vld [vmem:[#allocation68_spill] sm:$0xff] }
  0xaa   :  { %v668_v27 = vmul.f32 %v8546_v8, %v8554_v51  ;;  %v669_v54 = vmul.f32 %v8546_v8, %v8555_v14  ;;  %v670_v61 = vmul.f32 %v8546_v8, %v8556_v37  ;;  %v8557_v55 = vld [vmem:[#allocation52_spill] sm:$0xff]  ;;  %v8558_v58 = vld [vmem:[#allocation69_spill] sm:$0xff]  ;;  %v8560_v48 = vld [vmem:[#allocation70_spill] sm:$0xff] }
  0xab   :  { %v671_v21 = vmul.f32 %v8546_v8, %v8557_v55  ;;  %v672_v25 = vmul.f32 %v8546_v8, %v8558_v58  ;;  %v8559_v43 = vld [vmem:[#allocation53_spill] sm:$0xff]  ;;  %v674_v38 = vmul.f32 %v8546_v8, %v8560_v48  ;;  %v8561_v16 = vld [vmem:[#allocation54_spill] sm:$0xff]  ;;  %v8562_v59 = vld [vmem:[#allocation71_spill] sm:$0xff]  ;;  %v681_v48 = vmul.f32 %v8546_v8, %v8567_v5 }
  0xac   :  { %v673_v42 = vmul.f32 %v8546_v8, %v8559_v43  ;;  %v675_v45 = vmul.f32 %v8546_v8, %v8561_v16  ;;  %v676_v31 = vmul.f32 %v8546_v8, %v8562_v59  ;;  %v8563_v15 = vld [vmem:[#allocation55_spill] sm:$0xff]  ;;  %v8564_v14 = vld [vmem:[#allocation72_spill] sm:$0xff]  ;;  %v680_v43 = vmul.f32 %v8546_v8, %v8566_v20  ;;  %v8574_v40 = vld [vmem:[#allocation77_spill] sm:$0xff] }
  0xad   :  { %v677_v51 = vmul.f32 %v8546_v8, %v8563_v15  ;;  %v678_v37 = vmul.f32 %v8546_v8, %v8564_v14  ;;  %v8565_v55 = vld [vmem:[#allocation56_spill] sm:$0xff]  ;;  %v682_v16 = vmul.f32 %v8546_v8, %v8568_v11  ;;  %v683_v59 = vmul.f32 %v8546_v8, %v8569_v2  ;;  %v8570_v52 = vld [vmem:[#allocation75_spill] sm:$0xff]  ;;  %v8575_v1 = vld [vmem:[#allocation62_spill] sm:$0xff] }
  0xae   :  { %v679_v58 = vmul.f32 %v8546_v8, %v8565_v55  ;;  %v684_v15 = vmul.f32 %v8546_v8, %v8570_v52  ;;  %v8571_v56 = vld [vmem:[#allocation59_spill] sm:$0xff]  ;;  %v8572_v60 = vld [vmem:[#allocation76_spill] sm:$0xff]  ;;  %v688_v5 = vmul.f32 %v8546_v8, %v8574_v40  ;;  %v689_v11 = vmul.f32 %v8546_v8, %v8575_v1 }
  0xaf   :  { %v685_v14 = vmul.f32 %v8546_v8, %v8571_v56  ;;  %v686_v55 = vmul.f32 %v8546_v8, %v8572_v60  ;;  %v8573_v49 = vld [vmem:[#allocation60_spill] sm:$0xff]  ;;  %v690_v2 = vmul.f32 0.0, %v8546_v8  ;;  %v4091_v52 = vadd.f32 %v661_v35, %v3934_v46 }
  0xb0   :  { %v687_v20 = vmul.f32 %v8546_v8, %v8573_v49  ;;  %v4094_v56 = vadd.f32 %v662_v3, %v3937_v7  ;;  %v4097_v60 = vadd.f32 %v663_v63, %v3940_v47  ;;  %v4100_v49 = vadd.f32 %v664_v34, %v3943_v29 }
  0xb1   :  { %v4103_v40 = vadd.f32 %v665_v50, %v3946_v22  ;;  %v4106_v1 = vadd.f32 %v666_v33, %v3949_v9  ;;  %v4109_v53 = vadd.f32 %v667_v26, %v3952_v57  ;;  %v4112_v46 = vadd.f32 %v668_v27, %v3955_v17  ;;  %v2705_v33 = vld [vmem:[%s7748_s0 + $0x10] sm:$0xff] }
  0xb2   :  { %v4115_v7 = vadd.f32 %v669_v54, %v3958_v23  ;;  %v4118_v47 = vadd.f32 %v670_v61, %v3961_v28  ;;  %v4121_v29 = vadd.f32 %v671_v21, %v3964_v62  ;;  %v4124_v22 = vadd.f32 %v672_v25, %v3967_v6  ;;  %v8590_v26 = vld [vmem:[#allocation14_spill] sm:$0xff]  ;;  %v2706_v54 = vld [vmem:[%s7748_s0 + $0x18] sm:$0xff]  ;;  %v2707_v21 = vld [vmem:[%s7748_s0 + $0x20] sm:$0xff] }
  0xb3   :  { %v4127_v9 = vadd.f32 %v673_v42, %v3970_v4  ;;  %v4130_v57 = vadd.f32 %v674_v38, %v3973_v39  ;;  %v4133_v17 = vadd.f32 %v675_v45, %v3976_v36  ;;  %v4136_v23 = vadd.f32 %v676_v31, %v3979_v44  ;;  %v2708_v42 = vld [vmem:[%s7748_s0 + $0x28] sm:$0xff]  ;;  %v2709_v45 = vld [vmem:[%s7748_s0 + $0x30] sm:$0xff] }
  0xb4   :  { %v4139_v28 = vadd.f32 %v677_v51, %v3982_v24  ;;  %v4142_v62 = vadd.f32 %v678_v37, %v3985_v13  ;;  %v4145_v6 = vadd.f32 %v679_v58, %v3988_v12  ;;  %v4148_v4 = vadd.f32 %v680_v43, %v3991_v10  ;;  %v8576_v13 = vld [vmem:[#allocation17_spill] sm:$0xff]  ;;  %v8578_v12 = vld [vmem:[#allocation18_spill] sm:$0xff]  ;;  %v8580_v10 = vld [vmem:[#allocation19_spill] sm:$0xff] }
  0xb5   :  { %v4151_v39 = vadd.f32 %v681_v48, %v3994_v32  ;;  %v4154_v36 = vadd.f32 %v682_v16, %v3997_v19  ;;  %v4157_v44 = vadd.f32 %v683_v59, %v4000_v18  ;;  %v4160_v24 = vadd.f32 %v684_v15, %v4003_v0  ;;  %v8582_v32 = vld [vmem:[#allocation21_spill] sm:$0xff]  ;;  %v8584_v19 = vld [vmem:[#allocation22_spill] sm:$0xff]  ;;  %v8586_v18 = vld [vmem:[#allocation23_spill] sm:$0xff] }
  0xb6   :  { %v4163_v8 = vadd.f32 %v685_v14, %v8576_v13  ;;  %v4166_v41 = vadd.f32 %v686_v55, %v8578_v12  ;;  %v4169_v35 = vadd.f32 %v687_v20, %v8580_v10  ;;  %v4172_v3 = vadd.f32 %v688_v5, %v8582_v32  ;;  %v8588_v0 = vld [vmem:[#allocation25_spill] sm:$0xff]  ;;  %v2710_v51 = vld [vmem:[%s7748_s0 + $0x38] sm:$0xff]  ;;  %v2711_v58 = vld [vmem:[%s7748_s0 + $0x40] sm:$0xff] }
  0xb7   :  { %v4175_v63 = vadd.f32 %v689_v11, %v8584_v19  ;;  %v4178_v34 = vadd.f32 %v690_v2, %v8586_v18  ;;  %v4181_v50 = vadd.f32 %v690_v2, %v8588_v0  ;;  %v724_v27 = vmul.f32 %v2705_v33, %v8590_v26  ;;  %v2712_v48 = vld [vmem:[%s7748_s0 + $0x48] sm:$0xff]  ;;  %v2713_v59 = vld [vmem:[%s7748_s0 + $0x50] sm:$0xff]  ;;  %v2714_v14 = vld [vmem:[%s7748_s0 + $0x58] sm:$0xff] }
  0xb8   :  { %8577 = vst [vmem:[#allocation26_spill] sm:$0xff] %v4163_v8  ;;  %8579 = vst [vmem:[#allocation27_spill] sm:$0xff] %v4166_v41  ;;  %v725_v61 = vmul.f32 %v2706_v54, %v8590_v26  ;;  %v726_v25 = vmul.f32 %v2707_v21, %v8590_v26  ;;  %v727_v38 = vmul.f32 %v2708_v42, %v8590_v26  ;;  %v2715_v20 = vld [vmem:[%s7748_s0 + $0x60] sm:$0xff]  ;;  %v2716_v11 = vld [vmem:[%s7748_s0 + $0x68] sm:$0xff] }
  0xb9   :  { %8581 = vst [vmem:[#allocation31_spill] sm:$0xff] %v4169_v35  ;;  %8583 = vst [vmem:[#allocation32_spill] sm:$0xff] %v4172_v3  ;;  %v728_v31 = vmul.f32 %v2709_v45, %v8590_v26  ;;  %v729_v37 = vmul.f32 %v2710_v51, %v8590_v26  ;;  %v730_v43 = vmul.f32 %v2711_v58, %v8590_v26  ;;  %v2717_v13 = vld [vmem:[%s7748_s0 + $0x70] sm:$0xff]  ;;  %v2718_v10 = vld [vmem:[%s7748_s0 + $0x78] sm:$0xff] }
  0xba   :  { %8585 = vst [vmem:[#allocation34_spill] sm:$0xff] %v4175_v63  ;;  %8587 = vst [vmem:[#allocation35_spill] sm:$0xff] %v4178_v34  ;;  %v731_v16 = vmul.f32 %v2712_v48, %v8590_v26  ;;  %v732_v15 = vmul.f32 %v2713_v59, %v8590_v26  ;;  %v733_v55 = vmul.f32 %v2714_v14, %v8590_v26  ;;  %v2719_v19 = vld [vmem:[%s7748_s0 + $0x80] sm:$0xff]  ;;  %v2720_v0 = vld [vmem:[%s7748_s0 + $0x88] sm:$0xff] }
  0xbb   :  { %8589 = vst [vmem:[#allocation36_spill] sm:$0xff] %v4181_v50  ;;  %v734_v5 = vmul.f32 %v2715_v20, %v8590_v26  ;;  %v735_v2 = vmul.f32 %v2716_v11, %v8590_v26  ;;  %v736_v12 = vmul.f32 %v2717_v13, %v8590_v26  ;;  %v737_v32 = vmul.f32 %v2718_v10, %v8590_v26  ;;  %v2721_v54 = vld [vmem:[%s7748_s0 + $0x90] sm:$0xff]  ;;  %v2722_v42 = vld [vmem:[%s7748_s0 + $0x98] sm:$0xff]  ;;  %v2723_v51 = vld [vmem:[%s7748_s0 + $0xa0] sm:$0xff] }
  0xbc   :  { %v738_v18 = vmul.f32 %v2719_v19, %v8590_v26  ;;  %v739_v33 = vmul.f32 %v2720_v0, %v8590_v26  ;;  %v740_v21 = vmul.f32 %v2721_v54, %v8590_v26  ;;  %v741_v45 = vmul.f32 %v2722_v42, %v8590_v26  ;;  %v2724_v48 = vld [vmem:[%s7748_s0 + $0xa8] sm:$0xff]  ;;  %v2725_v14 = vld [vmem:[%s7748_s0 + $0xb0] sm:$0xff]  ;;  %v2726_v11 = vld [vmem:[%s7748_s0 + $0xb8] sm:$0xff] }
  0xbd   :  { %v742_v58 = vmul.f32 %v2723_v51, %v8590_v26  ;;  %v743_v59 = vmul.f32 %v2724_v48, %v8590_v26  ;;  %v744_v20 = vmul.f32 %v2725_v14, %v8590_v26  ;;  %v745_v13 = vmul.f32 %v2726_v11, %v8590_v26  ;;  %v2727_v10 = vld [vmem:[%s7748_s0 + $0xc0] sm:$0xff]  ;;  %v2728_v0 = vld [vmem:[%s7748_s0 + $0xc8] sm:$0xff]  ;;  %v2729_v42 = vld [vmem:[%s7748_s0 + $0xd0] sm:$0xff] }
  0xbe   :  { %v746_v19 = vmul.f32 %v2727_v10, %v8590_v26  ;;  %v747_v54 = vmul.f32 %v2728_v0, %v8590_v26  ;;  %v748_v51 = vmul.f32 %v2729_v42, %v8590_v26  ;;  %v2730_v48 = vld [vmem:[%s7748_s0 + $0xd8] sm:$0xff]  ;;  %v2731_v11 = vld [vmem:[%s7748_s0 + $0xe0] sm:$0xff]  ;;  %v2732_v0 = vld [vmem:[%s7748_s0 + $0xe8] sm:$0xff]  ;;  %v4305_v3 = vadd.f32 %v724_v27, %v4088_v30 }
  0xbf   :  { %v749_v14 = vmul.f32 %v2730_v48, %v8590_v26  ;;  %v750_v10 = vmul.f32 %v2731_v11, %v8590_v26  ;;  %v751_v50 = vmul.f32 %v2732_v0, %v8590_v26  ;;  %v2733_v42 = vld [vmem:[%s7748_s0 + $0xf0] sm:$0xff]  ;;  %v2734_v48 = vld [vmem:[%s7748_s0 + $0xf8] sm:$0xff]  ;;  %v754_v11 = vmul.f32 0.0, %v8590_v26 }
  0xc0   :  { %v752_v34 = vmul.f32 %v2733_v42, %v8590_v26  ;;  %v753_v63 = vmul.f32 %v2734_v48, %v8590_v26  ;;  %v4308_v35 = vadd.f32 %v725_v61, %v4091_v52  ;;  %v4311_v0 = vadd.f32 %v726_v25, %v4094_v56  ;;  %v8617_v48 = vld [vmem:[#allocation100_spill] sm:$0xff] }
  0xc1   :  { %v4314_v41 = vadd.f32 %v727_v38, %v4097_v60  ;;  %v4317_v42 = vadd.f32 %v728_v31, %v4100_v49  ;;  %v4320_v8 = vadd.f32 %v729_v37, %v4103_v40  ;;  %v4323_v26 = vadd.f32 %v730_v43, %v4106_v1 }
  0xc2   :  { %v4326_v30 = vadd.f32 %v731_v16, %v4109_v53  ;;  %v4329_v52 = vadd.f32 %v732_v15, %v4112_v46  ;;  %v4332_v56 = vadd.f32 %v733_v55, %v4115_v7  ;;  %v4335_v60 = vadd.f32 %v734_v5, %v4118_v47  ;;  %v8605_v16 = vld [vmem:[#allocation79_spill] sm:$0xff] }
  0xc3   :  { %v4338_v49 = vadd.f32 %v735_v2, %v4121_v29  ;;  %v4341_v40 = vadd.f32 %v736_v12, %v4124_v22  ;;  %v4344_v1 = vadd.f32 %v737_v32, %v4127_v9  ;;  %v4347_v53 = vadd.f32 %v738_v18, %v4130_v57  ;;  %v8606_v15 = vld [vmem:[#allocation15_spill] sm:$0xff] }
  0xc4   :  { %v4350_v46 = vadd.f32 %v739_v33, %v4133_v17  ;;  %v4353_v7 = vadd.f32 %v740_v21, %v4136_v23  ;;  %v4356_v47 = vadd.f32 %v741_v45, %v4139_v28  ;;  %v4359_v29 = vadd.f32 %v742_v58, %v4142_v62  ;;  %v8591_v62 = vld [vmem:[#allocation26_spill] sm:$0xff]  ;;  %v8607_v5 = vld [vmem:[#allocation95_spill] sm:$0xff]  ;;  %v8611_v33 = vld [vmem:[#allocation97_spill] sm:$0xff] }
  0xc5   :  { %v4362_v22 = vadd.f32 %v743_v59, %v4145_v6  ;;  %v4365_v9 = vadd.f32 %v744_v20, %v4148_v4  ;;  %v4368_v57 = vadd.f32 %v745_v13, %v4151_v39  ;;  %v4371_v17 = vadd.f32 %v746_v19, %v4154_v36  ;;  %v8593_v6 = vld [vmem:[#allocation27_spill] sm:$0xff]  ;;  %v8597_v39 = vld [vmem:[#allocation32_spill] sm:$0xff]  ;;  %v8599_v36 = vld [vmem:[#allocation34_spill] sm:$0xff] }
  0xc6   :  { %v4374_v23 = vadd.f32 %v747_v54, %v4157_v44  ;;  %v4377_v28 = vadd.f32 %v748_v51, %v4160_v24  ;;  %v4380_v27 = vadd.f32 %v749_v14, %v8591_v62  ;;  %v4383_v61 = vadd.f32 %v750_v10, %v8593_v6  ;;  %v8595_v4 = vld [vmem:[#allocation31_spill] sm:$0xff]  ;;  %v8603_v24 = vld [vmem:[#allocation36_spill] sm:$0xff]  ;;  %v8612_v45 = vld [vmem:[#allocation82_spill] sm:$0xff] }
  0xc7   :  { %v4386_v25 = vadd.f32 %v751_v50, %v8595_v4  ;;  %v4389_v38 = vadd.f32 %v752_v34, %v8597_v39  ;;  %v4392_v31 = vadd.f32 %v753_v63, %v8599_v36  ;;  %v8601_v44 = vld [vmem:[#allocation35_spill] sm:$0xff]  ;;  %v4398_v43 = vadd.f32 %v754_v11, %v8603_v24  ;;  %v8608_v50 = vld [vmem:[#allocation80_spill] sm:$0xff]  ;;  %v8610_v63 = vld [vmem:[#allocation81_spill] sm:$0xff] }
  0xc8   :  { %8592 = vst [vmem:[#allocation38_spill] sm:$0xff] %v4380_v27  ;;  %8594 = vst [vmem:[#allocation39_spill] sm:$0xff] %v4383_v61  ;;  %v4395_v37 = vadd.f32 %v754_v11, %v8601_v44  ;;  %v788_v55 = vmul.f32 %v8606_v15, %v8605_v16  ;;  %v789_v2 = vmul.f32 %v8606_v15, %v8607_v5  ;;  %v8609_v34 = vld [vmem:[#allocation96_spill] sm:$0xff]  ;;  %v8613_v59 = vld [vmem:[#allocation98_spill] sm:$0xff] }
  0xc9   :  { %8596 = vst [vmem:[#allocation40_spill] sm:$0xff] %v4386_v25  ;;  %8598 = vst [vmem:[#allocation42_spill] sm:$0xff] %v4389_v38  ;;  %v790_v12 = vmul.f32 %v8606_v15, %v8608_v50  ;;  %v791_v32 = vmul.f32 %v8606_v15, %v8609_v34  ;;  %v792_v18 = vmul.f32 %v8606_v15, %v8610_v63  ;;  %v8614_v13 = vld [vmem:[#allocation83_spill] sm:$0xff]  ;;  %v8616_v14 = vld [vmem:[#allocation84_spill] sm:$0xff] }
  0xca   :  { %8600 = vst [vmem:[#allocation43_spill] sm:$0xff] %v4392_v31  ;;  %8602 = vst [vmem:[#allocation46_spill] sm:$0xff] %v4395_v37  ;;  %v793_v21 = vmul.f32 %v8606_v15, %v8611_v33  ;;  %v794_v58 = vmul.f32 %v8606_v15, %v8612_v45  ;;  %v795_v20 = vmul.f32 %v8606_v15, %v8613_v59  ;;  %v8615_v54 = vld [vmem:[#allocation99_spill] sm:$0xff]  ;;  %v8618_v62 = vld [vmem:[#allocation85_spill] sm:$0xff] }
  0xcb   :  { %8604 = vst [vmem:[#allocation47_spill] sm:$0xff] %v4398_v43  ;;  %v796_v19 = vmul.f32 %v8606_v15, %v8614_v13  ;;  %v797_v51 = vmul.f32 %v8606_v15, %v8615_v54  ;;  %v798_v10 = vmul.f32 %v8606_v15, %v8616_v14  ;;  %v799_v11 = vmul.f32 %v8606_v15, %v8617_v48  ;;  %v8619_v4 = vld [vmem:[#allocation101_spill] sm:$0xff]  ;;  %v8620_v36 = vld [vmem:[#allocation86_spill] sm:$0xff]  ;;  %v8622_v5 = vld [vmem:[#allocation87_spill] sm:$0xff] }
  0xcc   :  { %v800_v6 = vmul.f32 %v8606_v15, %v8618_v62  ;;  %v801_v39 = vmul.f32 %v8606_v15, %v8619_v4  ;;  %v802_v44 = vmul.f32 %v8606_v15, %v8620_v36  ;;  %v8621_v24 = vld [vmem:[#allocation102_spill] sm:$0xff]  ;;  %v804_v50 = vmul.f32 %v8606_v15, %v8622_v5  ;;  %v8623_v34 = vld [vmem:[#allocation103_spill] sm:$0xff]  ;;  %v8624_v33 = vld [vmem:[#allocation88_spill] sm:$0xff] }
  0xcd   :  { %v803_v16 = vmul.f32 %v8606_v15, %v8621_v24  ;;  %v805_v63 = vmul.f32 %v8606_v15, %v8623_v34  ;;  %v806_v45 = vmul.f32 %v8606_v15, %v8624_v33  ;;  %v8625_v59 = vld [vmem:[#allocation104_spill] sm:$0xff]  ;;  %v8626_v54 = vld [vmem:[#allocation89_spill] sm:$0xff]  ;;  %v8628_v4 = vld [vmem:[#allocation90_spill] sm:$0xff]  ;;  %v819_v27 = vadd.f32 %v788_v55, %v4305_v3 }
  0xce   :  { %v807_v13 = vmul.f32 %v8606_v15, %v8625_v59  ;;  %v808_v14 = vmul.f32 %v8606_v15, %v8626_v54  ;;  %v8627_v48 = vld [vmem:[#allocation105_spill] sm:$0xff]  ;;  %v810_v36 = vmul.f32 %v8606_v15, %v8628_v4  ;;  %v8629_v24 = vld [vmem:[#allocation106_spill] sm:$0xff]  ;;  %v8630_v43 = vld [vmem:[#allocation91_spill] sm:$0xff]  ;;  %v826_v3 = vadd.f32 %v795_v20, %v4326_v30 }
  0xcf   :  { %v809_v62 = vmul.f32 %v8606_v15, %v8627_v48  ;;  %v811_v5 = vmul.f32 %v8606_v15, %v8629_v24  ;;  %v812_v34 = vmul.f32 %v8606_v15, %v8630_v43  ;;  %v8631_v37 = vld [vmem:[#allocation107_spill] sm:$0xff]  ;;  %v8632_v31 = vld [vmem:[#allocation93_spill] sm:$0xff]  ;;  %v8633_v38 = vld [vmem:[#allocation108_spill] sm:$0xff]  ;;  %v818_v24 = vmul.f32 0.0, %v8606_v15 }
  0xd0   :  { %v813_v33 = vmul.f32 %v8606_v15, %v8631_v37  ;;  %v814_v59 = vmul.f32 %v8606_v15, %v8632_v31  ;;  %v815_v54 = vmul.f32 %v8606_v15, %v8633_v38  ;;  %v8634_v25 = vld [vmem:[#allocation94_spill] sm:$0xff]  ;;  %v8635_v61 = vld [vmem:[#allocation109_spill] sm:$0xff]  ;;  %v820_v37 = vadd.f32 %v789_v2, %v4308_v35 }
  0xd1   :  { %v816_v48 = vmul.f32 %v8606_v15, %v8634_v25  ;;  %v817_v4 = vmul.f32 %v8606_v15, %v8635_v61  ;;  %v821_v43 = vadd.f32 %v790_v12, %v4311_v0  ;;  %v822_v31 = vadd.f32 %v791_v32, %v4314_v41  ;;  %v8637_v12 = vld [vmem:[#allocation39_spill] sm:$0xff]  ;;  %v8638_v32 = vld [vmem:[#allocation40_spill] sm:$0xff] }
  0xd2   :  { %v823_v38 = vadd.f32 %v792_v18, %v4317_v42  ;;  %v824_v61 = vadd.f32 %v793_v21, %v4320_v8  ;;  %v825_v25 = vadd.f32 %v794_v58, %v4323_v26  ;;  %v827_v15 = vadd.f32 %v796_v19, %v4329_v52  ;;  %v8639_v18 = vld [vmem:[#allocation42_spill] sm:$0xff]  ;;  %v8640_v21 = vld [vmem:[#allocation43_spill] sm:$0xff] }
  0xd3   :  { %v828_v35 = vadd.f32 %v797_v51, %v4332_v56  ;;  %v829_v0 = vadd.f32 %v798_v10, %v4335_v60  ;;  %v830_v41 = vadd.f32 %v799_v11, %v4338_v49  ;;  %v831_v42 = vadd.f32 %v800_v6, %v4341_v40  ;;  %v8642_v19 = vld [vmem:[#allocation47_spill] sm:$0xff] }
  0xd4   :  { %v832_v55 = vadd.f32 %v801_v39, %v4344_v1  ;;  %v833_v2 = vadd.f32 %v802_v44, %v4347_v53  ;;  %v834_v8 = vadd.f32 %v803_v16, %v4350_v46  ;;  %v835_v26 = vadd.f32 %v804_v50, %v4353_v7  ;;  %v8636_v46 = vld [vmem:[#allocation38_spill] sm:$0xff] }
  0xd5   :  { %v836_v30 = vadd.f32 %v805_v63, %v4356_v47  ;;  %v837_v52 = vadd.f32 %v806_v45, %v4359_v29  ;;  %v838_v56 = vadd.f32 %v807_v13, %v4362_v22  ;;  %v839_v60 = vadd.f32 %v808_v14, %v4365_v9  ;;  %v8641_v9 = vld [vmem:[#allocation46_spill] sm:$0xff] }
  0xd6   :  { %v840_v49 = vadd.f32 %v809_v62, %v4368_v57  ;;  %v841_v40 = vadd.f32 %v810_v36, %v4371_v17  ;;  %v842_v1 = vadd.f32 %v811_v5, %v4374_v23  ;;  %v843_v53 = vadd.f32 %v812_v34, %v4377_v28 }
  0xd7   :  { %v844_v7 = vadd.f32 %v813_v33, %v8636_v46  ;;  %v845_v47 = vadd.f32 %v814_v59, %v8637_v12  ;;  %v846_v29 = vadd.f32 %v815_v54, %v8638_v32  ;;  %v847_v22 = vadd.f32 %v816_v48, %v8639_v18 }
  0xd8   :  { %v848_v58 = vadd.f32 %v817_v4, %v8640_v21  ;;  %v849_v20 = vadd.f32 %v818_v24, %v8641_v9  ;;  %v850_v57 = vadd.f32 %v818_v24, %v8642_v19  ;;  %v852_v51 = vstv %s4462_s10 }
  0xd9   :  { %v853_v17 = vadd.f32 %v852_v51, %v819_v27  ;;  %v854_v10 = vadd.f32 %v852_v51, %v820_v37  ;;  %v4501_v23 = vstv %s4468_s11  ;;  %v4504_v28 = vstv %s4470_s12 }
  0xda   :  { %8643 = vst [vmem:[#allocation48_spill] sm:$0xff] %v4504_v28  ;;  %v855_v11 = vadd.f32 %v852_v51, %v821_v43  ;;  %v856_v6 = vadd.f32 %v852_v51, %v822_v31  ;;  %v857_v39 = vadd.f32 %v852_v51, %v823_v38  ;;  %v858_v44 = vadd.f32 %v852_v51, %v824_v61 }
  0xdb   :  { %v859_v16 = vadd.f32 %v852_v51, %v825_v25  ;;  %v860_v50 = vadd.f32 %v852_v51, %v826_v3  ;;  %v861_v63 = vadd.f32 %v852_v51, %v827_v15  ;;  %v862_v45 = vadd.f32 %v852_v51, %v828_v35 }
  0xdc   :  { %v863_v13 = vadd.f32 %v852_v51, %v829_v0  ;;  %v864_v14 = vadd.f32 %v852_v51, %v830_v41  ;;  %v865_v62 = vadd.f32 %v852_v51, %v831_v42  ;;  %v866_v36 = vadd.f32 %v852_v51, %v832_v55 }
  0xdd   :  { %v867_v5 = vadd.f32 %v852_v51, %v833_v2  ;;  %v868_v34 = vadd.f32 %v852_v51, %v834_v8  ;;  %v869_v27 = vadd.f32 %v852_v51, %v835_v26  ;;  %v870_v33 = vadd.f32 %v852_v51, %v836_v30 }
  0xde   :  { %v871_v59 = vadd.f32 %v852_v51, %v837_v52  ;;  %v872_v54 = vadd.f32 %v852_v51, %v838_v56  ;;  %v873_v48 = vadd.f32 %v852_v51, %v839_v60  ;;  %v874_v4 = vadd.f32 %v852_v51, %v840_v49 }
  0xdf   :  { %v875_v24 = vadd.f32 %v852_v51, %v841_v40  ;;  %v876_v37 = vadd.f32 %v852_v51, %v842_v1  ;;  %v877_v43 = vadd.f32 %v852_v51, %v843_v53  ;;  %v878_v31 = vadd.f32 %v852_v51, %v844_v7 }
  0xe0   :  { %v879_v38 = vadd.f32 %v852_v51, %v845_v47  ;;  %v880_v61 = vadd.f32 %v852_v51, %v846_v29  ;;  %v881_v25 = vadd.f32 %v852_v51, %v847_v22  ;;  %v882_v3 = vadd.f32 %v852_v51, %v848_v58 }
  0xe1   :  { %v883_v15 = vadd.f32 %v852_v51, %v849_v20  ;;  %v884_v35 = vadd.f32 %v852_v51, %v850_v57  ;;  %v4506_v0 = vmax.f32 %v853_v17, 0.0  ;;  %v4508_v41 = vmax.f32 %v854_v10, 0.0 }
  0xe2   :  { %v4510_v42 = vmax.f32 %v855_v11, 0.0  ;;  %v4512_v55 = vmax.f32 %v856_v6, 0.0  ;;  %v4514_v2 = vmax.f32 %v857_v39, 0.0  ;;  %v4516_v8 = vmax.f32 %v858_v44, 0.0 }
  0xe3   :  { %8644 = vst [vmem:[#allocation50_spill] sm:$0xff] %v4506_v0  ;;  %8645 = vst [vmem:[#allocation51_spill] sm:$0xff] %v4508_v41  ;;  %v4518_v26 = vmax.f32 %v859_v16, 0.0  ;;  %v4520_v30 = vmax.f32 %v860_v50, 0.0  ;;  %v4522_v52 = vmax.f32 %v861_v63, 0.0  ;;  %v4524_v56 = vmax.f32 %v862_v45, 0.0 }
  0xe4   :  { %8646 = vst [vmem:[#allocation61_spill] sm:$0xff] %v4510_v42  ;;  %8647 = vst [vmem:[#allocation16_spill] sm:$0xff] %v4512_v55  ;;  %v4526_v60 = vmax.f32 %v863_v13, 0.0  ;;  %v4528_v49 = vmax.f32 %v864_v14, 0.0  ;;  %v4530_v40 = vmax.f32 %v865_v62, 0.0  ;;  %v4532_v1 = vmax.f32 %v866_v36, 0.0 }
  0xe5   :  { %8648 = vst [vmem:[#allocation24_spill] sm:$0xff] %v4514_v2  ;;  %8649 = vst [vmem:[#allocation33_spill] sm:$0xff] %v4516_v8  ;;  %v4534_v53 = vmax.f32 %v867_v5, 0.0  ;;  %v4536_v46 = vmax.f32 %v868_v34, 0.0  ;;  %v4538_v7 = vmax.f32 %v869_v27, 0.0  ;;  %v4540_v12 = vmax.f32 %v870_v33, 0.0 }
  0xe6   :  { %8650 = vst [vmem:[#allocation29_spill] sm:$0xff] %v4518_v26  ;;  %8651 = vst [vmem:[#allocation37_spill] sm:$0xff] %v4520_v30  ;;  %v4542_v47 = vmax.f32 %v871_v59, 0.0  ;;  %v4544_v32 = vmax.f32 %v872_v54, 0.0  ;;  %v4546_v29 = vmax.f32 %v873_v48, 0.0  ;;  %v4548_v18 = vmax.f32 %v874_v4, 0.0 }
  0xe7   :  { %8652 = vst [vmem:[#allocation30_spill] sm:$0xff] %v4522_v52  ;;  %8653 = vst [vmem:[#allocation78_spill] sm:$0xff] %v4524_v56  ;;  %v4550_v22 = vmax.f32 %v875_v24, 0.0  ;;  %v4552_v21 = vmax.f32 %v876_v37, 0.0  ;;  %v4554_v58 = vmax.f32 %v877_v43, 0.0  ;;  %v4556_v9 = vmax.f32 %v878_v31, 0.0 }
  0xe8   :  { %8654 = vst [vmem:[#allocation92_spill] sm:$0xff] %v4526_v60  ;;  %8655 = vst [vmem:[#allocation41_spill] sm:$0xff] %v4528_v49  ;;  %v4558_v20 = vmax.f32 %v879_v38, 0.0  ;;  %v4560_v19 = vmax.f32 %v880_v61, 0.0  ;;  %v4562_v57 = vmax.f32 %v881_v25, 0.0  ;;  %v4564_v51 = vmax.f32 %v882_v3, 0.0 }
  0xe9   :  { %8656 = vst [vmem:[#allocation110_spill] sm:$0xff] %v4530_v40  ;;  %8657 = vst [vmem:[#allocation111_spill] sm:$0xff] %v4532_v1  ;;  %v958_v17 = vrot.slane %v4506_v0, 7  ;;  %v959_v10 = vrot.slane %v4508_v41, 7  ;;  %v961_v11 = vrot.slane %v4510_v42, 7  ;;  %v962_v6 = vrot.slane %v4512_v55, 7 }
  0xea   :  { %8658 = vst [vmem:[#allocation112_spill] sm:$0xff] %v4534_v53  ;;  %8659 = vst [vmem:[#allocation113_spill] sm:$0xff] %v4536_v46  ;;  %v964_v39 = vrot.slane %v4514_v2, 7  ;;  %v965_v44 = vrot.slane %v4516_v8, 7  ;;  %v967_v16 = vrot.slane %v4518_v26, 7  ;;  %v968_v50 = vrot.slane %v4520_v30, 7 }
  0xeb   :  { %8660 = vst [vmem:[#allocation8_spill] sm:$0xff] %v4538_v7  ;;  %8661 = vst [vmem:[#allocation114_spill] sm:$0xff] %v4540_v12  ;;  %v4574_v63 = vmax.f32 %v883_v15, 0.0  ;;  %v4576_v45 = vmax.f32 %v884_v35, 0.0  ;;  %v970_v13 = vrot.slane %v4522_v52, 7  ;;  %v971_v14 = vrot.slane %v4524_v56, 7 }
  0xec   :  { %8662 = vst [vmem:[#allocation9_spill] sm:$0xff] %v4542_v47  ;;  %8663 = vst [vmem:[#allocation10_spill] sm:$0xff] %v4544_v32  ;;  %v4581_v62 = vsel %vm112_vm0, %v958_v17, %v959_v10  ;;  %v4584_v36 = vsel %vm112_vm0, %v961_v11, %v962_v6  ;;  %v973_v5 = vrot.slane %v4526_v60, 7  ;;  %v974_v34 = vrot.slane %v4528_v49, 7 }
  0xed   :  { %8664 = vst [vmem:[#allocation11_spill] sm:$0xff] %v4546_v29  ;;  %8665 = vst [vmem:[#allocation12_spill] sm:$0xff] %v4548_v18  ;;  %v4589_v27 = vsel %vm112_vm0, %v964_v39, %v965_v44  ;;  %v976_v33 = vrot.slane %v4530_v40, 7  ;;  %v977_v59 = vrot.slane %v4532_v1, 7  ;;  %v979_v54 = vrot.slane %v4534_v53, 7 }
  0xee   :  { %8666 = vst [vmem:[#allocation63_spill] sm:$0xff] %v4550_v22  ;;  %8667 = vst [vmem:[#allocation13_spill] sm:$0xff] %v4552_v21  ;;  %v4595_v48 = vsel %vm112_vm0, %v967_v16, %v968_v50  ;;  %v980_v4 = vrot.slane %v4536_v46, 7  ;;  %v982_v24 = vrot.slane %v4538_v7, 7  ;;  %v983_v37 = vrot.slane %v4540_v12, 7 }
  0xef   :  { %8668 = vst [vmem:[#allocation20_spill] sm:$0xff] %v4554_v58  ;;  %8669 = vst [vmem:[#allocation64_spill] sm:$0xff] %v4556_v9  ;;  %v4601_v43 = vsel %vm112_vm0, %v970_v13, %v971_v14  ;;  %v985_v31 = vrot.slane %v4542_v47, 7  ;;  %v986_v38 = vrot.slane %v4544_v32, 7  ;;  %v988_v61 = vrot.slane %v4546_v29, 7 }
  0xf0   :  { %8670 = vst [vmem:[#allocation28_spill] sm:$0xff] %v4558_v20  ;;  %8671 = vst [vmem:[#allocation65_spill] sm:$0xff] %v4560_v19  ;;  %v4607_v25 = vsel %vm112_vm0, %v973_v5, %v974_v34  ;;  %v4610_v3 = vsel %vm112_vm0, %v976_v33, %v977_v59  ;;  %v989_v15 = vrot.slane %v4548_v18, 7  ;;  %v991_v35 = vrot.slane %v4550_v22, 7 }
  0xf1   :  { %8672 = vst [vmem:[#allocation44_spill] sm:$0xff] %v4562_v57  ;;  %8673 = vst [vmem:[#allocation66_spill] sm:$0xff] %v4564_v51  ;;  %v4615_v10 = vsel %vm112_vm0, %v979_v54, %v980_v4  ;;  %v992_v6 = vrot.slane %v4552_v21, 7  ;;  %v994_v44 = vrot.slane %v4554_v58, 7  ;;  %v995_v50 = vrot.slane %v4556_v9, 7 }
  0xf2   :  { %8674 = vst [vmem:[#allocation45_spill] sm:$0xff] %v4574_v63  ;;  %8675 = vst [vmem:[#allocation67_spill] sm:$0xff] %v4576_v45  ;;  %v4621_v14 = vsel %vm112_vm0, %v982_v24, %v983_v37  ;;  %v997_v34 = vrot.slane %v4558_v20, 7  ;;  %v998_v59 = vrot.slane %v4560_v19, 7  ;;  %v1000_v28 = vrot.slane %v4562_v57, 7 }
  0xf3   :  { %8676 = vst [vmem:[#allocation49_spill] sm:$0xff] %v4581_v62  ;;  %8677 = vst [vmem:[#allocation68_spill] sm:$0xff] %v4584_v36  ;;  %v4630_v4 = vsel %vm112_vm0, %v988_v61, %v989_v15  ;;  %v4638_v37 = vsel %vm112_vm0, %v994_v44, %v995_v50  ;;  %v4648_v15 = vsel %vm112_vm0, 0.0, %v958_v17  ;;  %v4669_v17 = vsel %vm112_vm0, 0.0, %v976_v33 }
  0xf4   :  { %8678 = vst [vmem:[#allocation52_spill] sm:$0xff] %v4589_v27  ;;  %8679 = vst [vmem:[#allocation69_spill] sm:$0xff] %v4595_v48  ;;  %v1004_v48 = vrot.slane %v4576_v45, 7  ;;  %v4690_v33 = vsel %vm112_vm0, 0.0, %v997_v34 }
  0xf5   :  { %8680 = vst [vmem:[#allocation53_spill] sm:$0xff] %v4601_v43  ;;  %8681 = vst [vmem:[#allocation70_spill] sm:$0xff] %v4607_v25  ;;  %v1003_v25 = vrot.slane %v4574_v63, 7  ;;  %v4635_v43 = vsel %vm112_vm0, %v991_v35, %v992_v6  ;;  %v4654_v6 = vsel %vm112_vm0, 0.0, %v964_v39  ;;  %v4675_v39 = vsel %vm112_vm0, 0.0, %v982_v24 }
  0xf6   :  { %8682 = vst [vmem:[#allocation54_spill] sm:$0xff] %v4610_v3  ;;  %8683 = vst [vmem:[#allocation71_spill] sm:$0xff] %v4615_v10  ;;  %v4627_v3 = vsel %vm112_vm0, %v985_v31, %v986_v38  ;;  %v1001_v10 = vrot.slane %v4564_v51, 7  ;;  %v1055_v24 = vrot.slane %v4508_v41, 1  ;;  %v1066_v41 = vrot.slane %v4522_v52, 1 }
  0xf7   :  { %8684 = vst [vmem:[#allocation55_spill] sm:$0xff] %v4621_v14  ;;  %8685 = vst [vmem:[#allocation72_spill] sm:$0xff] %v4627_v3  ;;  %v4641_v14 = vsel %vm112_vm0, %v997_v34, %v998_v59  ;;  %v4657_v50 = vsel %vm112_vm0, %v1003_v25, %v1004_v48  ;;  %v4660_v59 = vsel %vm112_vm0, 0.0, %v967_v16  ;;  %v4678_v48 = vsel %vm112_vm0, 0.0, %v985_v31 }
  0xf8   :  { %8686 = vst [vmem:[#allocation56_spill] sm:$0xff] %v4630_v4  ;;  %8687 = vst [vmem:[#allocation73_spill] sm:$0xff] %v4635_v43  ;;  %v4645_v38 = vsel %vm112_vm0, %v1000_v28, %v1001_v10  ;;  %v4651_v4 = vsel %vm112_vm0, 0.0, %v961_v11  ;;  %v4666_v10 = vsel %vm112_vm0, 0.0, %v973_v5  ;;  %v4672_v11 = vsel %vm112_vm0, 0.0, %v979_v54 }
  0xf9   :  { %8688 = vst [vmem:[#allocation57_spill] sm:$0xff] %v4638_v37  ;;  %8689 = vst [vmem:[#allocation74_spill] sm:$0xff] %v4641_v14  ;;  %v4663_v14 = vsel %vm112_vm0, 0.0, %v970_v13  ;;  %v4681_v16 = vsel %vm112_vm0, 0.0, %v988_v61  ;;  %v4684_v13 = vsel %vm112_vm0, 0.0, %v991_v35  ;;  %v4687_v5 = vsel %vm112_vm0, 0.0, %v994_v44 }
  0xfa   :  { %8690 = vst [vmem:[#allocation58_spill] sm:$0xff] %v4645_v38  ;;  %8691 = vst [vmem:[#allocation75_spill] sm:$0xff] %v4648_v15  ;;  %v1054_v54 = vrot.slane %v4506_v0, 1  ;;  %v1058_v31 = vrot.slane %v4512_v55, 1  ;;  %v1060_v61 = vrot.slane %v4514_v2, 1  ;;  %v1061_v38 = vrot.slane %v4516_v8, 1 }
  0xfb   :  { %8692 = vst [vmem:[#allocation59_spill] sm:$0xff] %v4651_v4  ;;  %8693 = vst [vmem:[#allocation76_spill] sm:$0xff] %v4654_v6  ;;  %v1063_v35 = vrot.slane %v4518_v26, 1  ;;  %v1064_v44 = vrot.slane %v4520_v30, 1  ;;  %v4701_v37 = vsel %vm112_vm0, 0.0, %v1000_v28  ;;  %v4704_v34 = vsel %vm112_vm0, 0.0, %v1003_v25 }
  0xfc   :  { %8694 = vst [vmem:[#allocation60_spill] sm:$0xff] %v4657_v50  ;;  %8695 = vst [vmem:[#allocation77_spill] sm:$0xff] %v4660_v59  ;;  %v1057_v50 = vrot.slane %v4510_v42, 1  ;;  %v1067_v42 = vrot.slane %v4524_v56, 1  ;;  %v4709_v55 = vsel %vm209_vm1, %v1054_v54, %v1055_v24  ;;  %v1069_v26 = vrot.slane %v4526_v60, 1 }
  0xfd   :  { %8696 = vst [vmem:[#allocation62_spill] sm:$0xff] %v4663_v14  ;;  %8697 = vst [vmem:[#allocation17_spill] sm:$0xff] %v4666_v10  ;;  %v1070_v30 = vrot.slane %v4528_v49, 1  ;;  %v4717_v28 = vsel %vm209_vm1, %v1060_v61, %v1061_v38  ;;  %v1072_v25 = vrot.slane %v4530_v40, 1  ;;  %v1075_v52 = vrot.slane %v4534_v53, 1 }
  0xfe   :  { %8698 = vst [vmem:[#allocation18_spill] sm:$0xff] %v4669_v17  ;;  %8699 = vst [vmem:[#allocation19_spill] sm:$0xff] %v4672_v11  ;;  %v4712_v2 = vsel %vm209_vm1, %v1057_v50, %v1058_v31  ;;  %v4723_v56 = vsel %vm209_vm1, %v1063_v35, %v1064_v44  ;;  %v1076_v54 = vrot.slane %v4536_v46, 1  ;;  %v1078_v50 = vrot.slane %v4538_v7, 1 }
  0xff   :  { %8700 = vst [vmem:[#allocation21_spill] sm:$0xff] %v4675_v39  ;;  %8701 = vst [vmem:[#allocation22_spill] sm:$0xff] %v4678_v48  ;;  %v1081_v61 = vrot.slane %v4542_v47, 1  ;;  %v4735_v53 = vsel %vm209_vm1, %v1069_v26, %v1070_v30  ;;  %v1087_v7 = vrot.slane %v4550_v22, 1  ;;  %v1093_v26 = vrot.slane %v4558_v20, 1 }
 0x100   :  { %8702 = vst [vmem:[#allocation23_spill] sm:$0xff] %v4681_v16  ;;  %8703 = vst [vmem:[#allocation25_spill] sm:$0xff] %v4684_v13 }
 0x101   :  { %8704 = vst [vmem:[#allocation14_spill] sm:$0xff] %v4687_v5  ;;  %8705 = vst [vmem:[#allocation26_spill] sm:$0xff] %v4690_v33 }
 0x102   :  { %8706 = vst [vmem:[#allocation27_spill] sm:$0xff] %v4701_v37  ;;  %8707 = vst [vmem:[#allocation31_spill] sm:$0xff] %v4704_v34  ;;  %v1073_v34 = vrot.slane %v4532_v1, 1  ;;  %v1084_v1 = vrot.slane %v4546_v29, 1 }
 0x103   :  { %8708 = vst [vmem:[#allocation32_spill] sm:$0xff] %v4709_v55  ;;  %8709 = vst [vmem:[#allocation34_spill] sm:$0xff] %v4712_v2  ;;  %v1079_v2 = vrot.slane %v4540_v12, 1  ;;  %v4729_v55 = vsel %vm209_vm1, %v1066_v41, %v1067_v42  ;;  %v4743_v12 = vsel %vm209_vm1, %v1075_v52, %v1076_v54  ;;  %v1088_v41 = vrot.slane %v4552_v21, 1 }
 0x104   :  { %8710 = vst [vmem:[#allocation35_spill] sm:$0xff] %v4717_v28  ;;  %8711 = vst [vmem:[#allocation36_spill] sm:$0xff] %v4723_v56  ;;  %v1082_v28 = vrot.slane %v4544_v32, 1  ;;  %v4738_v35 = vsel %vm209_vm1, %v1072_v25, %v1073_v34  ;;  %v1085_v56 = vrot.slane %v4548_v18, 1  ;;  %v1091_v32 = vrot.slane %v4556_v9, 1 }
 0x105   :  { %8712 = vst [vmem:[#allocation79_spill] sm:$0xff] %v4729_v55  ;;  %8713 = vst [vmem:[#allocation15_spill] sm:$0xff] %v4735_v53  ;;  %v1090_v55 = vrot.slane %v4554_v58, 1  ;;  %v4749_v29 = vsel %vm209_vm1, %v1078_v50, %v1079_v2  ;;  %v1094_v25 = vrot.slane %v4560_v19, 1  ;;  %v1099_v58 = vrot.slane %v4574_v63, 1 }
 0x106   :  { %8714 = vst [vmem:[#allocation95_spill] sm:$0xff] %v4738_v35  ;;  %8715 = vst [vmem:[#allocation80_spill] sm:$0xff] %v4743_v12  ;;  %v1096_v35 = vrot.slane %v4562_v57, 1  ;;  %v4755_v53 = vsel %vm209_vm1, %v1081_v61, %v1082_v28  ;;  %v4758_v52 = vsel %vm209_vm1, %v1084_v1, %v1085_v56  ;;  %v1097_v12 = vrot.slane %v4564_v51, 1 }
 0x107   :  { %8716 = vst [vmem:[#allocation96_spill] sm:$0xff] %v4749_v29  ;;  %8717 = vst [vmem:[#allocation81_spill] sm:$0xff] %v4755_v53  ;;  %v4763_v9 = vsel %vm209_vm1, %v1087_v7, %v1088_v41  ;;  %v4766_v50 = vsel %vm209_vm1, %v1090_v55, %v1091_v32  ;;  %v4769_v29 = vsel %vm209_vm1, %v1093_v26, %v1094_v25  ;;  %v1100_v57 = vrot.slane %v4576_v45, 1  ;;  %v8758_v53 = vld [vmem:[#allocation16_spill] sm:$0xff] }
 0x108   :  { %8718 = vst [vmem:[#allocation97_spill] sm:$0xff] %v4758_v52  ;;  %8719 = vst [vmem:[#allocation82_spill] sm:$0xff] %v4763_v9  ;;  %v4773_v61 = vsel %vm209_vm1, %v1096_v35, %v1097_v12  ;;  %v4776_v1 = vsel %vm209_vm1, %v1055_v24, 0.0  ;;  %v4779_v52 = vsel %vm209_vm1, %v1058_v31, 0.0  ;;  %v4782_v7 = vsel %vm209_vm1, %v1061_v38, 0.0 }
 0x109   :  { %8720 = vst [vmem:[#allocation98_spill] sm:$0xff] %v4766_v50  ;;  %8721 = vst [vmem:[#allocation83_spill] sm:$0xff] %v4769_v29  ;;  %v4785_v55 = vsel %vm209_vm1, %v1099_v58, %v1100_v57  ;;  %v4788_v26 = vsel %vm209_vm1, %v1064_v44, 0.0  ;;  %v4791_v45 = vsel %vm209_vm1, %v1067_v42, 0.0  ;;  %v4794_v35 = vsel %vm209_vm1, %v1070_v30, 0.0  ;;  %v8747_v29 = vld [vmem:[#allocation57_spill] sm:$0xff] }
 0x10a   :  { %8722 = vst [vmem:[#allocation99_spill] sm:$0xff] %v4773_v61  ;;  %8723 = vst [vmem:[#allocation84_spill] sm:$0xff] %v4776_v1  ;;  %v4797_v24 = vsel %vm209_vm1, %v1073_v34, 0.0  ;;  %v4800_v31 = vsel %vm209_vm1, %v1076_v54, 0.0  ;;  %v4803_v38 = vsel %vm209_vm1, %v1079_v2, 0.0  ;;  %v4806_v58 = vsel %vm209_vm1, %v1082_v28, 0.0 }
 0x10b   :  { %8724 = vst [vmem:[#allocation100_spill] sm:$0xff] %v4779_v52  ;;  %8725 = vst [vmem:[#allocation85_spill] sm:$0xff] %v4782_v7  ;;  %v4809_v44 = vsel %vm209_vm1, %v1085_v56, 0.0  ;;  %v4812_v42 = vsel %vm209_vm1, %v1088_v41, 0.0  ;;  %v4815_v30 = vsel %vm209_vm1, %v1091_v32, 0.0  ;;  %v4818_v34 = vsel %vm209_vm1, %v1094_v25, 0.0 }
 0x10c   :  { %8726 = vst [vmem:[#allocation101_spill] sm:$0xff] %v4785_v55  ;;  %8727 = vst [vmem:[#allocation86_spill] sm:$0xff] %v4788_v26  ;;  %v4821_v54 = vsel %vm209_vm1, %v1097_v12, 0.0  ;;  %v4824_v2 = vsel %vm209_vm1, %v1100_v57, 0.0  ;;  %v4827_v28 = vmul.f32 0.0, %v4501_v23  ;;  %v4831_v56 = vmul.f32 %v4501_v23, %v4648_v15  ;;  %v8740_v55 = vld [vmem:[#allocation69_spill] sm:$0xff] }
 0x10d   :  { %8728 = vst [vmem:[#allocation102_spill] sm:$0xff] %v4791_v45  ;;  %8729 = vst [vmem:[#allocation87_spill] sm:$0xff] %v4794_v35  ;;  %v4835_v32 = vmul.f32 %v4501_v23, %v4581_v62  ;;  %v4839_v41 = vmul.f32 %v4501_v23, %v4651_v4  ;;  %v4843_v12 = vmul.f32 %v4501_v23, %v4584_v36  ;;  %v8741_v4 = vld [vmem:[#allocation53_spill] sm:$0xff]  ;;  %v8742_v62 = vld [vmem:[#allocation70_spill] sm:$0xff] }
 0x10e   :  { %8730 = vst [vmem:[#allocation103_spill] sm:$0xff] %v4797_v24  ;;  %8731 = vst [vmem:[#allocation88_spill] sm:$0xff] %v4800_v31  ;;  %v4847_v57 = vmul.f32 %v4501_v23, %v4654_v6  ;;  %v4851_v25 = vmul.f32 %v4501_v23, %v4589_v27  ;;  %v4859_v63 = vmul.f32 %v4501_v23, %v8740_v55  ;;  %v8743_v15 = vld [vmem:[#allocation54_spill] sm:$0xff]  ;;  %v8745_v61 = vld [vmem:[#allocation55_spill] sm:$0xff] }
 0x10f   :  { %8732 = vst [vmem:[#allocation104_spill] sm:$0xff] %v4803_v38  ;;  %8733 = vst [vmem:[#allocation89_spill] sm:$0xff] %v4806_v58  ;;  %v4863_v36 = vmul.f32 %v4501_v23, %v4663_v14  ;;  %v4867_v6 = vmul.f32 %v4501_v23, %v8741_v4  ;;  %v4871_v27 = vmul.f32 %v4501_v23, %v4666_v10  ;;  %v8753_v50 = vld [vmem:[#allocation58_spill] sm:$0xff]  ;;  %v8757_v58 = vld [vmem:[#allocation61_spill] sm:$0xff] }
 0x110   :  { %8734 = vst [vmem:[#allocation105_spill] sm:$0xff] %v4809_v44  ;;  %8735 = vst [vmem:[#allocation90_spill] sm:$0xff] %v4812_v42  ;;  %v4879_v55 = vmul.f32 %v4501_v23, %v4669_v17  ;;  %v4883_v14 = vmul.f32 %v4501_v23, %v8743_v15  ;;  %v4887_v4 = vmul.f32 %v4501_v23, %v4672_v11  ;;  %v8755_v42 = vld [vmem:[#allocation48_spill] sm:$0xff]  ;;  %v8756_v44 = vld [vmem:[#allocation51_spill] sm:$0xff] }
 0x111   :  { %8736 = vst [vmem:[#allocation106_spill] sm:$0xff] %v4815_v30  ;;  %8737 = vst [vmem:[#allocation91_spill] sm:$0xff] %v4818_v34  ;;  %v4899_v17 = vmul.f32 %v4501_v23, %v8745_v61  ;;  %v4903_v15 = vmul.f32 %v4501_v23, %v4678_v48  ;;  %v4907_v11 = vmul.f32 %v4501_v23, %v4627_v3  ;;  %v8746_v34 = vld [vmem:[#allocation56_spill] sm:$0xff]  ;;  %v8750_v30 = vld [vmem:[#allocation74_spill] sm:$0xff]  ;;  %v1183_v9 = vmul.f32 0.0, %v8755_v42 }
 0x112   :  { %8738 = vst [vmem:[#allocation107_spill] sm:$0xff] %v4821_v54  ;;  %8739 = vst [vmem:[#allocation93_spill] sm:$0xff] %v4824_v2  ;;  %v4855_v2 = vmul.f32 %v4501_v23, %v4660_v59  ;;  %v4875_v59 = vmul.f32 %v4501_v23, %v8742_v62  ;;  %v8744_v54 = vld [vmem:[#allocation71_spill] sm:$0xff]  ;;  %v4895_v62 = vmul.f32 %v4501_v23, %v4675_v39  ;;  %v8761_v35 = vld [vmem:[#allocation37_spill] sm:$0xff] }
 0x113   :  { %v4891_v10 = vmul.f32 %v4501_v23, %v8744_v54  ;;  %v4911_v54 = vmul.f32 %v4501_v23, %v4681_v16  ;;  %v4915_v39 = vmul.f32 %v4501_v23, %v8746_v34  ;;  %v4919_v61 = vmul.f32 %v4501_v23, %v4684_v13  ;;  %v8762_v45 = vld [vmem:[#allocation30_spill] sm:$0xff]  ;;  %v8764_v7 = vld [vmem:[#allocation111_spill] sm:$0xff]  ;;  %v8765_v52 = vld [vmem:[#allocation112_spill] sm:$0xff] }
 0x114   :  { %v4923_v48 = vmul.f32 %v4501_v23, %v4635_v43  ;;  %v4927_v3 = vmul.f32 %v4501_v23, %v4687_v5  ;;  %v4931_v16 = vmul.f32 %v4501_v23, %v8747_v29  ;;  %v4935_v34 = vmul.f32 %v4501_v23, %v4690_v33  ;;  %v8763_v26 = vld [vmem:[#allocation78_spill] sm:$0xff]  ;;  %v8766_v1 = vld [vmem:[#allocation8_spill] sm:$0xff] }
 0x115   :  { %v4939_v13 = vmul.f32 %v4501_v23, %v8750_v30  ;;  %v4943_v43 = vmul.f32 %v4501_v23, %v4701_v37  ;;  %v4947_v5 = vmul.f32 %v4501_v23, %v8753_v50  ;;  %v1184_v29 = vmul.f32 %v8755_v42, %v4506_v0  ;;  %v8759_v37 = vld [vmem:[#allocation24_spill] sm:$0xff]  ;;  %v8760_v50 = vld [vmem:[#allocation29_spill] sm:$0xff] }
 0x116   :  { %8748 = vst [vmem:[#allocation108_spill] sm:$0xff] %v4931_v16  ;;  %8749 = vst [vmem:[#allocation94_spill] sm:$0xff] %v4935_v34  ;;  %v1185_v33 = vmul.f32 %v8755_v42, %v8756_v44  ;;  %v1186_v30 = vmul.f32 %v8755_v42, %v8757_v58  ;;  %v1187_v38 = vmul.f32 %v8755_v42, %v8758_v53  ;;  %v8770_v34 = vld [vmem:[#allocation20_spill] sm:$0xff] }
 0x117   :  { %8751 = vst [vmem:[#allocation109_spill] sm:$0xff] %v4939_v13  ;;  %8752 = vst [vmem:[#allocation38_spill] sm:$0xff] %v4943_v43  ;;  %v1188_v31 = vmul.f32 %v8755_v42, %v8759_v37  ;;  %v1189_v23 = vmul.f32 %v8755_v42, %v4516_v8  ;;  %v1190_v24 = vmul.f32 %v8755_v42, %v8760_v50  ;;  %v8768_v43 = vld [vmem:[#allocation10_spill] sm:$0xff]  ;;  %v8769_v13 = vld [vmem:[#allocation11_spill] sm:$0xff] }
 0x118   :  { %8754 = vst [vmem:[#allocation39_spill] sm:$0xff] %v4947_v5  ;;  %v1191_v0 = vmul.f32 %v8755_v42, %v8761_v35  ;;  %v1192_v44 = vmul.f32 %v8755_v42, %v8762_v45  ;;  %v1193_v58 = vmul.f32 %v8755_v42, %v8763_v26  ;;  %v1194_v53 = vmul.f32 %v8755_v42, %v4526_v60  ;;  %v8767_v5 = vld [vmem:[#allocation114_spill] sm:$0xff]  ;;  %v8771_v16 = vld [vmem:[#allocation64_spill] sm:$0xff] }
 0x119   :  { %v1195_v37 = vmul.f32 %v8755_v42, %v4528_v49  ;;  %v1196_v8 = vmul.f32 %v8755_v42, %v4530_v40  ;;  %v1197_v50 = vmul.f32 %v8755_v42, %v8764_v7  ;;  %v1198_v35 = vmul.f32 %v8755_v42, %v8765_v52 }
 0x11a   :  { %v1199_v45 = vmul.f32 %v8755_v42, %v4536_v46  ;;  %v1200_v26 = vmul.f32 %v8755_v42, %v8766_v1  ;;  %v1201_v60 = vmul.f32 %v8755_v42, %v8767_v5  ;;  %v1202_v49 = vmul.f32 %v8755_v42, %v4542_v47 }
 0x11b   :  { %v1203_v40 = vmul.f32 %v8755_v42, %v8768_v43  ;;  %v1204_v7 = vmul.f32 %v8755_v42, %v8769_v13  ;;  %v1205_v52 = vmul.f32 %v8755_v42, %v4548_v18  ;;  %v1206_v46 = vmul.f32 %v8755_v42, %v4550_v22  ;;  %v8772_v43 = vld [vmem:[#allocation44_spill] sm:$0xff] }
 0x11c   :  { %v1207_v1 = vmul.f32 %v8755_v42, %v4552_v21  ;;  %v1208_v5 = vmul.f32 %v8755_v42, %v8770_v34  ;;  %v1209_v47 = vmul.f32 %v8755_v42, %v8771_v16  ;;  %v1210_v13 = vmul.f32 %v8755_v42, %v4558_v20 }
 0x11d   :  { %v1211_v18 = vmul.f32 %v8755_v42, %v4560_v19  ;;  %v1212_v22 = vmul.f32 %v8755_v42, %v8772_v43  ;;  %v1213_v21 = vmul.f32 %v8755_v42, %v4564_v51  ;;  %v5017_v16 = vadd.f32 %v1183_v9, %v4827_v28 }
 0x11e   :  { %v5020_v34 = vadd.f32 %v1184_v29, %v4831_v56  ;;  %v5023_v20 = vadd.f32 %v1185_v33, %v4835_v32  ;;  %v5026_v19 = vadd.f32 %v1186_v30, %v4839_v41  ;;  %v5029_v43 = vadd.f32 %v1187_v38, %v4843_v12  ;;  %v8798_v32 = vld [vmem:[#allocation102_spill] sm:$0xff]  ;;  %v8799_v12 = vld [vmem:[#allocation15_spill] sm:$0xff] }
 0x11f   :  { %v5032_v42 = vadd.f32 %v1188_v31, %v4847_v57  ;;  %v5035_v51 = vadd.f32 %v1189_v23, %v4851_v25  ;;  %v5038_v9 = vadd.f32 %v1190_v24, %v4855_v2  ;;  %v5041_v29 = vadd.f32 %v1191_v0, %v4859_v63  ;;  %v8797_v2 = vld [vmem:[#allocation79_spill] sm:$0xff] }
 0x120   :  { %v5044_v33 = vadd.f32 %v1192_v44, %v4863_v36  ;;  %v5047_v30 = vadd.f32 %v1193_v58, %v4867_v6  ;;  %v5050_v38 = vadd.f32 %v1194_v53, %v4871_v27  ;;  %v5053_v31 = vadd.f32 %v1195_v37, %v4875_v59  ;;  %v8781_v6 = vld [vmem:[#allocation109_spill] sm:$0xff]  ;;  %v8796_v44 = vld [vmem:[#allocation86_spill] sm:$0xff]  ;;  %v8800_v25 = vld [vmem:[#allocation87_spill] sm:$0xff] }
 0x121   :  { %v5056_v28 = vadd.f32 %v1196_v8, %v4879_v55  ;;  %v5059_v24 = vadd.f32 %v1197_v50, %v4883_v14  ;;  %v5062_v0 = vadd.f32 %v1198_v35, %v4887_v4  ;;  %v5065_v63 = vadd.f32 %v1199_v45, %v4891_v10  ;;  %v8783_v10 = vld [vmem:[#allocation38_spill] sm:$0xff]  ;;  %v8790_v50 = vld [vmem:[#allocation84_spill] sm:$0xff]  ;;  %v8793_v55 = vld [vmem:[#allocation35_spill] sm:$0xff] }
 0x122   :  { %v5068_v36 = vadd.f32 %v1200_v26, %v4895_v62  ;;  %v5071_v53 = vadd.f32 %v1201_v60, %v4899_v17  ;;  %v5074_v8 = vadd.f32 %v1202_v49, %v4903_v15  ;;  %v5077_v27 = vadd.f32 %v1203_v40, %v4907_v11  ;;  %v8777_v49 = vld [vmem:[#allocation108_spill] sm:$0xff]  ;;  %v8779_v40 = vld [vmem:[#allocation94_spill] sm:$0xff]  ;;  %v8794_v26 = vld [vmem:[#allocation85_spill] sm:$0xff] }
 0x123   :  { %v5080_v14 = vadd.f32 %v1204_v7, %v4911_v54  ;;  %v5083_v45 = vadd.f32 %v1205_v52, %v4915_v39  ;;  %v5086_v62 = vadd.f32 %v1206_v46, %v4919_v61  ;;  %v5089_v60 = vadd.f32 %v1207_v1, %v4923_v48  ;;  %v8785_v46 = vld [vmem:[#allocation39_spill] sm:$0xff]  ;;  %v8787_v52 = vld [vmem:[#allocation32_spill] sm:$0xff]  ;;  %v8791_v61 = vld [vmem:[#allocation34_spill] sm:$0xff] }
 0x124   :  { %v5092_v4 = vadd.f32 %v1208_v5, %v4927_v3  ;;  %v5095_v37 = vadd.f32 %v1209_v47, %v8777_v49  ;;  %v5098_v15 = vadd.f32 %v1210_v13, %v8779_v40  ;;  %v5101_v59 = vadd.f32 %v1211_v18, %v8781_v6  ;;  %v8792_v18 = vld [vmem:[#allocation100_spill] sm:$0xff]  ;;  %v8801_v49 = vld [vmem:[#allocation95_spill] sm:$0xff] }
 0x125   :  { %8773 = vst [vmem:[#allocation40_spill] sm:$0xff] %v5083_v45  ;;  %8774 = vst [vmem:[#allocation42_spill] sm:$0xff] %v5086_v62  ;;  %v5104_v17 = vadd.f32 %v1212_v22, %v8783_v10  ;;  %v5107_v11 = vadd.f32 %v1213_v21, %v8785_v46  ;;  %v1245_v39 = vstv %s5002_s13  ;;  %v5112_v5 = vstv %s5012_s14  ;;  %v8795_v21 = vld [vmem:[#allocation36_spill] sm:$0xff]  ;;  %v8802_v6 = vld [vmem:[#allocation103_spill] sm:$0xff] }
 0x126   :  { %8775 = vst [vmem:[#allocation43_spill] sm:$0xff] %v5089_v60  ;;  %8776 = vst [vmem:[#allocation46_spill] sm:$0xff] %v5092_v4  ;;  %v1246_v48 = vmul.f32 0.0, %v1245_v39  ;;  %v1247_v3 = vmul.f32 %v1245_v39, %v8787_v52  ;;  %v5115_v47 = vstv %s5014_s15  ;;  %v1248_v13 = vmul.f32 %v1245_v39, %v8790_v50  ;;  %v8803_v46 = vld [vmem:[#allocation80_spill] sm:$0xff]  ;;  %v8807_v52 = vld [vmem:[#allocation81_spill] sm:$0xff] }
 0x127   :  { %8778 = vst [vmem:[#allocation47_spill] sm:$0xff] %v5095_v37  ;;  %8780 = vst [vmem:[#allocation48_spill] sm:$0xff] %v5098_v15  ;;  %v1249_v1 = vmul.f32 %v1245_v39, %v8791_v61  ;;  %v1250_v7 = vmul.f32 %v1245_v39, %v8792_v18  ;;  %v1251_v22 = vmul.f32 %v1245_v39, %v8793_v55  ;;  %v8804_v18 = vld [vmem:[#allocation88_spill] sm:$0xff]  ;;  %v8813_v15 = vld [vmem:[#allocation98_spill] sm:$0xff] }
 0x128   :  { %8782 = vst [vmem:[#allocation108_spill] sm:$0xff] %v5101_v59  ;;  %8784 = vst [vmem:[#allocation94_spill] sm:$0xff] %v5104_v17  ;;  %v1252_v35 = vmul.f32 %v1245_v39, %v8794_v26  ;;  %v1253_v58 = vmul.f32 %v1245_v39, %v8795_v21  ;;  %v1254_v54 = vmul.f32 %v1245_v39, %v8796_v44  ;;  %v8805_v61 = vld [vmem:[#allocation96_spill] sm:$0xff]  ;;  %v8811_v17 = vld [vmem:[#allocation82_spill] sm:$0xff] }
 0x129   :  { %8786 = vst [vmem:[#allocation109_spill] sm:$0xff] %v5107_v11  ;;  %8788 = vst [vmem:[#allocation38_spill] sm:$0xff] %v5112_v5  ;;  %v1255_v56 = vmul.f32 %v1245_v39, %v8797_v2  ;;  %v1256_v41 = vmul.f32 %v1245_v39, %v8798_v32  ;;  %v1257_v57 = vmul.f32 %v1245_v39, %v8799_v12  ;;  %v8806_v50 = vld [vmem:[#allocation104_spill] sm:$0xff]  ;;  %v8809_v5 = vld [vmem:[#allocation97_spill] sm:$0xff] }
 0x12a   :  { %8789 = vst [vmem:[#allocation39_spill] sm:$0xff] %v5115_v47  ;;  %v1258_v23 = vmul.f32 %v1245_v39, %v8800_v25  ;;  %v1259_v40 = vmul.f32 %v1245_v39, %v8801_v49  ;;  %v1260_v10 = vmul.f32 %v1245_v39, %v8802_v6  ;;  %v1261_v55 = vmul.f32 %v1245_v39, %v8803_v46  ;;  %v8808_v47 = vld [vmem:[#allocation89_spill] sm:$0xff]  ;;  %v8812_v59 = vld [vmem:[#allocation90_spill] sm:$0xff]  ;;  %v8815_v4 = vld [vmem:[#allocation83_spill] sm:$0xff] }
 0x12b   :  { %v1262_v26 = vmul.f32 %v1245_v39, %v8804_v18  ;;  %v1263_v21 = vmul.f32 %v1245_v39, %v8805_v61  ;;  %v1264_v44 = vmul.f32 %v1245_v39, %v8806_v50  ;;  %v1265_v2 = vmul.f32 %v1245_v39, %v8807_v52  ;;  %v8810_v11 = vld [vmem:[#allocation105_spill] sm:$0xff]  ;;  %v8814_v37 = vld [vmem:[#allocation106_spill] sm:$0xff]  ;;  %v8816_v60 = vld [vmem:[#allocation91_spill] sm:$0xff] }
 0x12c   :  { %v1266_v32 = vmul.f32 %v1245_v39, %v8808_v47  ;;  %v1267_v12 = vmul.f32 %v1245_v39, %v8809_v5  ;;  %v1268_v25 = vmul.f32 %v1245_v39, %v8810_v11  ;;  %v1269_v49 = vmul.f32 %v1245_v39, %v8811_v17  ;;  %v8817_v62 = vld [vmem:[#allocation99_spill] sm:$0xff]  ;;  %v8860_v17 = vld [vmem:[#allocation14_spill] sm:$0xff] }
 0x12d   :  { %v1270_v6 = vmul.f32 %v1245_v39, %v8812_v59  ;;  %v1271_v46 = vmul.f32 %v1245_v39, %v8813_v15  ;;  %v1272_v18 = vmul.f32 %v1245_v39, %v8814_v37  ;;  %v1273_v61 = vmul.f32 %v1245_v39, %v8815_v4  ;;  %v8818_v45 = vld [vmem:[#allocation107_spill] sm:$0xff]  ;;  %v8859_v37 = vld [vmem:[#allocation73_spill] sm:$0xff] }
 0x12e   :  { %v1274_v50 = vmul.f32 %v1245_v39, %v8816_v60  ;;  %v1275_v52 = vmul.f32 %v1245_v39, %v8817_v62  ;;  %v1276_v47 = vmul.f32 %v1245_v39, %v8818_v45  ;;  %v5147_v5 = vadd.f32 %v1246_v48, %v5017_v16  ;;  %v8857_v45 = vld [vmem:[#allocation56_spill] sm:$0xff]  ;;  %v8858_v62 = vld [vmem:[#allocation25_spill] sm:$0xff] }
 0x12f   :  { %v5150_v11 = vadd.f32 %v1247_v3, %v5020_v34  ;;  %v5153_v59 = vadd.f32 %v1248_v13, %v5023_v20  ;;  %v5156_v15 = vadd.f32 %v1249_v1, %v5026_v19  ;;  %v5159_v4 = vadd.f32 %v1250_v7, %v5029_v43 }
 0x130   :  { %v5162_v60 = vadd.f32 %v1251_v22, %v5032_v42  ;;  %v5165_v39 = vadd.f32 %v1252_v35, %v5035_v51  ;;  %v5168_v16 = vadd.f32 %v1253_v58, %v5038_v9  ;;  %v5171_v34 = vadd.f32 %v1254_v54, %v5041_v29  ;;  %v8836_v54 = vld [vmem:[#allocation38_spill] sm:$0xff] }
 0x131   :  { %v5174_v20 = vadd.f32 %v1255_v56, %v5044_v33  ;;  %v5177_v19 = vadd.f32 %v1256_v41, %v5047_v30  ;;  %v5180_v43 = vadd.f32 %v1257_v57, %v5050_v38  ;;  %v5183_v42 = vadd.f32 %v1258_v23, %v5053_v31  ;;  %v8837_v56 = vld [vmem:[#allocation49_spill] sm:$0xff] }
 0x132   :  { %v5186_v51 = vadd.f32 %v1259_v40, %v5056_v28  ;;  %v5189_v9 = vadd.f32 %v1260_v10, %v5059_v24  ;;  %v5192_v29 = vadd.f32 %v1261_v55, %v5062_v0  ;;  %v5195_v33 = vadd.f32 %v1262_v26, %v5065_v63  ;;  %v8819_v0 = vld [vmem:[#allocation40_spill] sm:$0xff]  ;;  %v8820_v63 = vld [vmem:[#allocation42_spill] sm:$0xff] }
 0x133   :  { %v5198_v30 = vadd.f32 %v1263_v21, %v5068_v36  ;;  %v5201_v38 = vadd.f32 %v1264_v44, %v5071_v53  ;;  %v5204_v31 = vadd.f32 %v1265_v2, %v5074_v8  ;;  %v5207_v28 = vadd.f32 %v1266_v32, %v5077_v27  ;;  %v8821_v36 = vld [vmem:[#allocation43_spill] sm:$0xff]  ;;  %v8823_v53 = vld [vmem:[#allocation46_spill] sm:$0xff]  ;;  %v8827_v27 = vld [vmem:[#allocation48_spill] sm:$0xff] }
 0x134   :  { %v5210_v24 = vadd.f32 %v1267_v12, %v5080_v14  ;;  %v5213_v48 = vadd.f32 %v1268_v25, %v8819_v0  ;;  %v5216_v3 = vadd.f32 %v1269_v49, %v8820_v63  ;;  %v5219_v13 = vadd.f32 %v1270_v6, %v8821_v36  ;;  %v8825_v8 = vld [vmem:[#allocation47_spill] sm:$0xff]  ;;  %v8829_v14 = vld [vmem:[#allocation108_spill] sm:$0xff]  ;;  %v8831_v26 = vld [vmem:[#allocation94_spill] sm:$0xff] }
 0x135   :  { %v5222_v1 = vadd.f32 %v1271_v46, %v8823_v53  ;;  %v5225_v7 = vadd.f32 %v1272_v18, %v8825_v8  ;;  %v5228_v55 = vadd.f32 %v1273_v61, %v8827_v27  ;;  %v5231_v22 = vadd.f32 %v1274_v50, %v8829_v14  ;;  %v8833_v21 = vld [vmem:[#allocation109_spill] sm:$0xff]  ;;  %v8835_v44 = vld [vmem:[#allocation75_spill] sm:$0xff]  ;;  %v8839_v61 = vld [vmem:[#allocation68_spill] sm:$0xff] }
 0x136   :  { %8822 = vst [vmem:[#allocation40_spill] sm:$0xff] %v5219_v13  ;;  %v5234_v35 = vadd.f32 %v1275_v52, %v8831_v26  ;;  %v5237_v58 = vadd.f32 %v1276_v47, %v8833_v21  ;;  %v1309_v2 = vmul.f32 %v8836_v54, %v8835_v44  ;;  %v1310_v32 = vmul.f32 %v8836_v54, %v8837_v56  ;;  %v8838_v18 = vld [vmem:[#allocation59_spill] sm:$0xff]  ;;  %v8840_v50 = vld [vmem:[#allocation76_spill] sm:$0xff]  ;;  %v8842_v47 = vld [vmem:[#allocation77_spill] sm:$0xff] }
 0x137   :  { %8824 = vst [vmem:[#allocation42_spill] sm:$0xff] %v5222_v1  ;;  %8826 = vst [vmem:[#allocation43_spill] sm:$0xff] %v5225_v7  ;;  %v1311_v41 = vmul.f32 %v8836_v54, %v8838_v18  ;;  %v1312_v12 = vmul.f32 %v8836_v54, %v8839_v61  ;;  %v1313_v57 = vmul.f32 %v8836_v54, %v8840_v50  ;;  %v8841_v52 = vld [vmem:[#allocation52_spill] sm:$0xff]  ;;  %v8843_v49 = vld [vmem:[#allocation69_spill] sm:$0xff] }
 0x138   :  { %8828 = vst [vmem:[#allocation46_spill] sm:$0xff] %v5228_v55  ;;  %8830 = vst [vmem:[#allocation47_spill] sm:$0xff] %v5231_v22  ;;  %v1314_v25 = vmul.f32 %v8836_v54, %v8841_v52  ;;  %v1315_v23 = vmul.f32 %v8836_v54, %v8842_v47  ;;  %v1316_v40 = vmul.f32 %v8836_v54, %v8843_v49  ;;  %v8844_v6 = vld [vmem:[#allocation62_spill] sm:$0xff]  ;;  %v8845_v46 = vld [vmem:[#allocation53_spill] sm:$0xff] }
 0x139   :  { %8832 = vst [vmem:[#allocation48_spill] sm:$0xff] %v5234_v35  ;;  %8834 = vst [vmem:[#allocation108_spill] sm:$0xff] %v5237_v58  ;;  %v1317_v10 = vmul.f32 %v8836_v54, %v8844_v6  ;;  %v1318_v0 = vmul.f32 %v8836_v54, %v8845_v46  ;;  %v8846_v63 = vld [vmem:[#allocation17_spill] sm:$0xff]  ;;  %v8847_v53 = vld [vmem:[#allocation70_spill] sm:$0xff] }
 0x13a   :  { %v1319_v36 = vmul.f32 %v8836_v54, %v8846_v63  ;;  %v1320_v8 = vmul.f32 %v8836_v54, %v8847_v53  ;;  %v8848_v27 = vld [vmem:[#allocation18_spill] sm:$0xff]  ;;  %v8850_v44 = vld [vmem:[#allocation19_spill] sm:$0xff]  ;;  %v8852_v47 = vld [vmem:[#allocation21_spill] sm:$0xff] }
 0x13b   :  { %v1321_v14 = vmul.f32 %v8836_v54, %v8848_v27  ;;  %v8849_v26 = vld [vmem:[#allocation54_spill] sm:$0xff]  ;;  %v1323_v56 = vmul.f32 %v8836_v54, %v8850_v44  ;;  %v8851_v49 = vld [vmem:[#allocation71_spill] sm:$0xff]  ;;  %v1325_v46 = vmul.f32 %v8836_v54, %v8852_v47  ;;  %v8855_v61 = vld [vmem:[#allocation72_spill] sm:$0xff]  ;;  %v1330_v44 = vmul.f32 %v8836_v54, %v8857_v45 }
 0x13c   :  { %v1322_v21 = vmul.f32 %v8836_v54, %v8849_v26  ;;  %v1324_v6 = vmul.f32 %v8836_v54, %v8851_v49  ;;  %v8853_v52 = vld [vmem:[#allocation55_spill] sm:$0xff]  ;;  %v8854_v50 = vld [vmem:[#allocation22_spill] sm:$0xff]  ;;  %v1328_v27 = vmul.f32 %v8836_v54, %v8855_v61  ;;  %v1331_v49 = vmul.f32 %v8836_v54, %v8858_v62  ;;  %v8861_v58 = vld [vmem:[#allocation57_spill] sm:$0xff] }
 0x13d   :  { %v1326_v63 = vmul.f32 %v8836_v54, %v8853_v52  ;;  %v1327_v53 = vmul.f32 %v8836_v54, %v8854_v50  ;;  %v8856_v18 = vld [vmem:[#allocation23_spill] sm:$0xff]  ;;  %v1332_v47 = vmul.f32 %v8836_v54, %v8859_v37  ;;  %v1333_v52 = vmul.f32 %v8836_v54, %v8860_v17  ;;  %v8862_v35 = vld [vmem:[#allocation26_spill] sm:$0xff]  ;;  %v8867_v13 = vld [vmem:[#allocation60_spill] sm:$0xff] }
 0x13e   :  { %v1329_v26 = vmul.f32 %v8836_v54, %v8856_v18  ;;  %v1334_v50 = vmul.f32 %v8836_v54, %v8861_v58  ;;  %v1335_v61 = vmul.f32 %v8836_v54, %v8862_v35  ;;  %v8863_v22 = vld [vmem:[#allocation74_spill] sm:$0xff]  ;;  %v8864_v55 = vld [vmem:[#allocation27_spill] sm:$0xff]  ;;  %v1340_v17 = vmul.f32 %v8836_v54, %v8867_v13  ;;  %v8907_v13 = vld [vmem:[#allocation13_spill] sm:$0xff] }
 0x13f   :  { %v1336_v18 = vmul.f32 %v8836_v54, %v8863_v22  ;;  %v1337_v45 = vmul.f32 %v8836_v54, %v8864_v55  ;;  %v8865_v7 = vld [vmem:[#allocation58_spill] sm:$0xff]  ;;  %v8866_v1 = vld [vmem:[#allocation31_spill] sm:$0xff]  ;;  %v5304_v58 = vadd.f32 %v1309_v2, %v5147_v5  ;;  %v5307_v35 = vadd.f32 %v1310_v32, %v5147_v5 }
 0x140   :  { %v1338_v62 = vmul.f32 %v8836_v54, %v8865_v7  ;;  %v1339_v37 = vmul.f32 %v8836_v54, %v8866_v1  ;;  %v5310_v22 = vadd.f32 %v1311_v41, %v5150_v11  ;;  %v5313_v55 = vadd.f32 %v1312_v12, %v5153_v59 }
 0x141   :  { %v5316_v7 = vadd.f32 %v1313_v57, %v5156_v15  ;;  %v5319_v1 = vadd.f32 %v1314_v25, %v5159_v4  ;;  %v5322_v54 = vadd.f32 %v1315_v23, %v5162_v60  ;;  %v5325_v2 = vadd.f32 %v1316_v40, %v5165_v39  ;;  %v8884_v23 = vld [vmem:[#allocation39_spill] sm:$0xff] }
 0x142   :  { %v5328_v5 = vadd.f32 %v1317_v10, %v5168_v16  ;;  %v5331_v11 = vadd.f32 %v1318_v0, %v5171_v34  ;;  %v5334_v59 = vadd.f32 %v1319_v36, %v5174_v20  ;;  %v5337_v15 = vadd.f32 %v1320_v8, %v5177_v19  ;;  %v8891_v36 = vld [vmem:[#allocation37_spill] sm:$0xff]  ;;  %v8892_v8 = vld [vmem:[#allocation30_spill] sm:$0xff] }
 0x143   :  { %v5340_v4 = vadd.f32 %v1321_v14, %v5180_v43  ;;  %v5343_v60 = vadd.f32 %v1322_v21, %v5183_v42  ;;  %v5346_v39 = vadd.f32 %v1323_v56, %v5186_v51  ;;  %v5349_v16 = vadd.f32 %v1324_v6, %v5189_v9  ;;  %v8893_v14 = vld [vmem:[#allocation78_spill] sm:$0xff]  ;;  %v8894_v21 = vld [vmem:[#allocation92_spill] sm:$0xff]  ;;  %v8895_v56 = vld [vmem:[#allocation41_spill] sm:$0xff] }
 0x144   :  { %v5352_v34 = vadd.f32 %v1325_v46, %v5192_v29  ;;  %v5355_v20 = vadd.f32 %v1326_v63, %v5195_v33  ;;  %v5358_v19 = vadd.f32 %v1327_v53, %v5198_v30  ;;  %v5361_v43 = vadd.f32 %v1328_v27, %v5201_v38  ;;  %v8869_v30 = vld [vmem:[#allocation40_spill] sm:$0xff]  ;;  %v8871_v38 = vld [vmem:[#allocation42_spill] sm:$0xff] }
 0x145   :  { %v5364_v42 = vadd.f32 %v1329_v26, %v5204_v31  ;;  %v5367_v51 = vadd.f32 %v1330_v44, %v5207_v28  ;;  %v5370_v9 = vadd.f32 %v1331_v49, %v5210_v24  ;;  %v5373_v29 = vadd.f32 %v1332_v47, %v5213_v48  ;;  %v8873_v31 = vld [vmem:[#allocation43_spill] sm:$0xff]  ;;  %v8875_v28 = vld [vmem:[#allocation46_spill] sm:$0xff]  ;;  %v8879_v48 = vld [vmem:[#allocation48_spill] sm:$0xff] }
 0x146   :  { %v5376_v33 = vadd.f32 %v1333_v52, %v5216_v3  ;;  %v5379_v32 = vadd.f32 %v1334_v50, %v8869_v30  ;;  %v5382_v41 = vadd.f32 %v1335_v61, %v8871_v38  ;;  %v5385_v12 = vadd.f32 %v1336_v18, %v8873_v31  ;;  %v8877_v24 = vld [vmem:[#allocation47_spill] sm:$0xff]  ;;  %v8881_v3 = vld [vmem:[#allocation108_spill] sm:$0xff]  ;;  %v8883_v50 = vld [vmem:[#allocation50_spill] sm:$0xff] }
 0x147   :  { %v5388_v57 = vadd.f32 %v1337_v45, %v8875_v28  ;;  %v5391_v25 = vadd.f32 %v1338_v62, %v8877_v24  ;;  %v5394_v47 = vadd.f32 %v1339_v37, %v8879_v48  ;;  %v5397_v52 = vadd.f32 %v1340_v17, %v8881_v3  ;;  %v8885_v61 = vld [vmem:[#allocation51_spill] sm:$0xff]  ;;  %v8886_v18 = vld [vmem:[#allocation61_spill] sm:$0xff]  ;;  %v8887_v45 = vld [vmem:[#allocation16_spill] sm:$0xff] }
 0x148   :  { %8868 = vst [vmem:[#allocation94_spill] sm:$0xff] %v5376_v33  ;;  %8870 = vst [vmem:[#allocation109_spill] sm:$0xff] %v5379_v32  ;;  %v1374_v49 = vmul.f32 %v8884_v23, %v8883_v50  ;;  %v1375_v40 = vmul.f32 %v8884_v23, %v8885_v61  ;;  %v1376_v6 = vmul.f32 %v8884_v23, %v8886_v18  ;;  %v8888_v62 = vld [vmem:[#allocation24_spill] sm:$0xff]  ;;  %v8889_v37 = vld [vmem:[#allocation33_spill] sm:$0xff] }
 0x149   :  { %8872 = vst [vmem:[#allocation75_spill] sm:$0xff] %v5382_v41  ;;  %8874 = vst [vmem:[#allocation38_spill] sm:$0xff] %v5385_v12  ;;  %v1377_v10 = vmul.f32 %v8884_v23, %v8887_v45  ;;  %v1378_v46 = vmul.f32 %v8884_v23, %v8888_v62  ;;  %v1379_v0 = vmul.f32 %v8884_v23, %v8889_v37  ;;  %v8890_v17 = vld [vmem:[#allocation29_spill] sm:$0xff]  ;;  %v8896_v38 = vld [vmem:[#allocation110_spill] sm:$0xff] }
 0x14a   :  { %8876 = vst [vmem:[#allocation49_spill] sm:$0xff] %v5388_v57  ;;  %8878 = vst [vmem:[#allocation40_spill] sm:$0xff] %v5391_v25  ;;  %v1380_v63 = vmul.f32 %v8884_v23, %v8890_v17  ;;  %v1381_v53 = vmul.f32 %v8884_v23, %v8891_v36  ;;  %v1382_v27 = vmul.f32 %v8884_v23, %v8892_v8  ;;  %v8897_v28 = vld [vmem:[#allocation111_spill] sm:$0xff]  ;;  %v8898_v48 = vld [vmem:[#allocation112_spill] sm:$0xff] }
 0x14b   :  { %8880 = vst [vmem:[#allocation42_spill] sm:$0xff] %v5394_v47  ;;  %8882 = vst [vmem:[#allocation43_spill] sm:$0xff] %v5397_v52  ;;  %v1383_v26 = vmul.f32 %v8884_v23, %v8893_v14  ;;  %v1384_v44 = vmul.f32 %v8884_v23, %v8894_v21  ;;  %v1385_v30 = vmul.f32 %v8884_v23, %v8895_v56  ;;  %v8899_v50 = vld [vmem:[#allocation113_spill] sm:$0xff]  ;;  %v8900_v8 = vld [vmem:[#allocation8_spill] sm:$0xff] }
 0x14c   :  { %v1386_v31 = vmul.f32 %v8884_v23, %v8896_v38  ;;  %v1387_v24 = vmul.f32 %v8884_v23, %v8897_v28  ;;  %v1388_v3 = vmul.f32 %v8884_v23, %v8898_v48  ;;  %v1389_v61 = vmul.f32 %v8884_v23, %v8899_v50  ;;  %v8901_v36 = vld [vmem:[#allocation114_spill] sm:$0xff]  ;;  %v8902_v17 = vld [vmem:[#allocation9_spill] sm:$0xff]  ;;  %v8904_v62 = vld [vmem:[#allocation11_spill] sm:$0xff] }
 0x14d   :  { %v1390_v14 = vmul.f32 %v8884_v23, %v8900_v8  ;;  %v1391_v21 = vmul.f32 %v8884_v23, %v8901_v36  ;;  %v1392_v56 = vmul.f32 %v8884_v23, %v8902_v17  ;;  %v8903_v37 = vld [vmem:[#allocation10_spill] sm:$0xff]  ;;  %v1394_v28 = vmul.f32 %v8884_v23, %v8904_v62  ;;  %v8905_v45 = vld [vmem:[#allocation12_spill] sm:$0xff]  ;;  %v8906_v18 = vld [vmem:[#allocation63_spill] sm:$0xff] }
 0x14e   :  { %v1393_v38 = vmul.f32 %v8884_v23, %v8903_v37  ;;  %v1395_v48 = vmul.f32 %v8884_v23, %v8905_v45  ;;  %v1396_v50 = vmul.f32 %v8884_v23, %v8906_v18  ;;  %v1397_v8 = vmul.f32 %v8884_v23, %v8907_v13  ;;  %v8908_v52 = vld [vmem:[#allocation20_spill] sm:$0xff]  ;;  %v8911_v57 = vld [vmem:[#allocation65_spill] sm:$0xff]  ;;  %v8913_v12 = vld [vmem:[#allocation66_spill] sm:$0xff] }
 0x14f   :  { %v1398_v36 = vmul.f32 %v8884_v23, %v8908_v52  ;;  %v8909_v47 = vld [vmem:[#allocation64_spill] sm:$0xff]  ;;  %v1401_v62 = vmul.f32 %v8884_v23, %v8911_v57  ;;  %v1403_v13 = vmul.f32 %v8884_v23, %v8913_v12  ;;  %v8914_v41 = vld [vmem:[#allocation45_spill] sm:$0xff]  ;;  %v8915_v32 = vld [vmem:[#allocation67_spill] sm:$0xff]  ;;  %v5471_v57 = vadd.f32 %v1375_v40, %v5307_v35 }
 0x150   :  { %v1399_v17 = vmul.f32 %v8884_v23, %v8909_v47  ;;  %v8910_v25 = vld [vmem:[#allocation28_spill] sm:$0xff]  ;;  %v1404_v52 = vmul.f32 %v8884_v23, %v8914_v41  ;;  %v1405_v47 = vmul.f32 %v8884_v23, %v8915_v32  ;;  %v5474_v33 = vadd.f32 %v1376_v6, %v5310_v22  ;;  %v8955_v32 = vld [vmem:[#allocation89_spill] sm:$0xff] }
 0x151   :  { %v1400_v37 = vmul.f32 %v8884_v23, %v8910_v25  ;;  %v8912_v45 = vld [vmem:[#allocation44_spill] sm:$0xff]  ;;  %v5468_v25 = vadd.f32 %v1374_v49, %v5304_v58  ;;  %v5480_v12 = vadd.f32 %v1378_v46, %v5316_v7  ;;  %v5483_v41 = vadd.f32 %v1379_v0, %v5319_v1 }
 0x152   :  { %v1402_v18 = vmul.f32 %v8884_v23, %v8912_v45  ;;  %v5477_v45 = vadd.f32 %v1377_v10, %v5313_v55  ;;  %v5486_v23 = vadd.f32 %v1380_v63, %v5322_v54  ;;  %v5489_v58 = vadd.f32 %v1381_v53, %v5325_v2  ;;  %v8933_v53 = vld [vmem:[#allocation43_spill] sm:$0xff] }
 0x153   :  { %v5492_v35 = vadd.f32 %v1382_v27, %v5328_v5  ;;  %v5495_v22 = vadd.f32 %v1383_v26, %v5331_v11  ;;  %v5498_v55 = vadd.f32 %v1384_v44, %v5334_v59  ;;  %v5501_v7 = vadd.f32 %v1385_v30, %v5337_v15  ;;  %v8941_v30 = vld [vmem:[#allocation85_spill] sm:$0xff] }
 0x154   :  { %v5504_v1 = vadd.f32 %v1386_v31, %v5340_v4  ;;  %v5507_v54 = vadd.f32 %v1387_v24, %v5343_v60  ;;  %v5510_v2 = vadd.f32 %v1388_v3, %v5346_v39  ;;  %v5513_v5 = vadd.f32 %v1389_v61, %v5349_v16  ;;  %v8945_v3 = vld [vmem:[#allocation102_spill] sm:$0xff]  ;;  %v8946_v61 = vld [vmem:[#allocation15_spill] sm:$0xff] }
 0x155   :  { %v5516_v11 = vadd.f32 %v1390_v14, %v5352_v34  ;;  %v5519_v59 = vadd.f32 %v1391_v21, %v5355_v20  ;;  %v5522_v15 = vadd.f32 %v1392_v56, %v5358_v19  ;;  %v5525_v4 = vadd.f32 %v1393_v38, %v5361_v43  ;;  %v8919_v20 = vld [vmem:[#allocation94_spill] sm:$0xff]  ;;  %v8921_v19 = vld [vmem:[#allocation109_spill] sm:$0xff]  ;;  %v8923_v43 = vld [vmem:[#allocation75_spill] sm:$0xff] }
 0x156   :  { %v5528_v60 = vadd.f32 %v1394_v28, %v5364_v42  ;;  %v5531_v39 = vadd.f32 %v1395_v48, %v5367_v51  ;;  %v5534_v16 = vadd.f32 %v1396_v50, %v5370_v9  ;;  %v5537_v34 = vadd.f32 %v1397_v8, %v5373_v29  ;;  %v8925_v42 = vld [vmem:[#allocation38_spill] sm:$0xff]  ;;  %v8927_v51 = vld [vmem:[#allocation49_spill] sm:$0xff]  ;;  %v8929_v9 = vld [vmem:[#allocation40_spill] sm:$0xff] }
 0x157   :  { %v5540_v49 = vadd.f32 %v1398_v36, %v8919_v20  ;;  %v5543_v40 = vadd.f32 %v1399_v17, %v8921_v19  ;;  %v5546_v6 = vadd.f32 %v1400_v37, %v8923_v43  ;;  %v5549_v10 = vadd.f32 %v1401_v62, %v8925_v42  ;;  %v8931_v29 = vld [vmem:[#allocation42_spill] sm:$0xff]  ;;  %v8935_v17 = vld [vmem:[#allocation32_spill] sm:$0xff]  ;;  %v8940_v56 = vld [vmem:[#allocation35_spill] sm:$0xff] }
 0x158   :  { %8916 = vst [vmem:[#allocation46_spill] sm:$0xff] %v5531_v39  ;;  %8917 = vst [vmem:[#allocation47_spill] sm:$0xff] %v5534_v16  ;;  %v5552_v46 = vadd.f32 %v1402_v18, %v8927_v51  ;;  %v5555_v0 = vadd.f32 %v1403_v13, %v8929_v9  ;;  %v5558_v63 = vadd.f32 %v1404_v52, %v8931_v29  ;;  %v1438_v36 = vstv %s5455_s16  ;;  %v8936_v37 = vld [vmem:[#allocation84_spill] sm:$0xff]  ;;  %v8938_v62 = vld [vmem:[#allocation34_spill] sm:$0xff] }
 0x159   :  { %8918 = vst [vmem:[#allocation48_spill] sm:$0xff] %v5537_v34  ;;  %8920 = vst [vmem:[#allocation108_spill] sm:$0xff] %v5540_v49  ;;  %v5562_v8 = vadd.f32 %v1405_v47, %v8933_v53  ;;  %v1439_v27 = vmul.f32 %v1438_v36, %v8935_v17  ;;  %v1440_v14 = vmul.f32 %v1438_v36, %v8936_v37  ;;  %v5567_v26 = vstv %s5465_s17  ;;  %v8939_v18 = vld [vmem:[#allocation100_spill] sm:$0xff]  ;;  %v8943_v28 = vld [vmem:[#allocation86_spill] sm:$0xff] }
 0x15a   :  { %8922 = vst [vmem:[#allocation50_spill] sm:$0xff] %v5543_v40  ;;  %8924 = vst [vmem:[#allocation39_spill] sm:$0xff] %v5546_v6  ;;  %v1441_v21 = vmul.f32 %v1438_v36, %v8938_v62  ;;  %v1442_v44 = vmul.f32 %v1438_v36, %v8939_v18  ;;  %v1443_v13 = vmul.f32 %v1438_v36, %v8940_v56  ;;  %v8942_v52 = vld [vmem:[#allocation36_spill] sm:$0xff]  ;;  %v8944_v47 = vld [vmem:[#allocation79_spill] sm:$0xff] }
 0x15b   :  { %8926 = vst [vmem:[#allocation51_spill] sm:$0xff] %v5549_v10  ;;  %8928 = vst [vmem:[#allocation94_spill] sm:$0xff] %v5552_v46  ;;  %v1444_v38 = vmul.f32 %v1438_v36, %v8941_v30  ;;  %v1445_v31 = vmul.f32 %v1438_v36, %v8942_v52  ;;  %v1446_v24 = vmul.f32 %v1438_v36, %v8943_v28  ;;  %v8947_v19 = vld [vmem:[#allocation87_spill] sm:$0xff]  ;;  %v8950_v53 = vld [vmem:[#allocation80_spill] sm:$0xff] }
 0x15c   :  { %8930 = vst [vmem:[#allocation109_spill] sm:$0xff] %v5555_v0  ;;  %8932 = vst [vmem:[#allocation75_spill] sm:$0xff] %v5558_v63  ;;  %v1447_v48 = vmul.f32 %v1438_v36, %v8944_v47  ;;  %v1448_v50 = vmul.f32 %v1438_v36, %v8945_v3  ;;  %v1449_v20 = vmul.f32 %v1438_v36, %v8946_v61  ;;  %v8948_v42 = vld [vmem:[#allocation95_spill] sm:$0xff]  ;;  %v8951_v37 = vld [vmem:[#allocation88_spill] sm:$0xff] }
 0x15d   :  { %8934 = vst [vmem:[#allocation38_spill] sm:$0xff] %v5562_v8  ;;  %8937 = vst [vmem:[#allocation49_spill] sm:$0xff] %v5567_v26  ;;  %v1450_v43 = vmul.f32 %v1438_v36, %v8947_v19  ;;  %v1451_v51 = vmul.f32 %v1438_v36, %v8948_v42  ;;  %v8949_v9 = vld [vmem:[#allocation103_spill] sm:$0xff]  ;;  %v1453_v17 = vmul.f32 %v1438_v36, %v8950_v53  ;;  %v8952_v56 = vld [vmem:[#allocation96_spill] sm:$0xff] }
 0x15e   :  { %v1452_v29 = vmul.f32 %v1438_v36, %v8949_v9  ;;  %v1454_v30 = vmul.f32 %v1438_v36, %v8951_v37  ;;  %v1455_v52 = vmul.f32 %v1438_v36, %v8952_v56  ;;  %v8953_v18 = vld [vmem:[#allocation104_spill] sm:$0xff]  ;;  %v8954_v62 = vld [vmem:[#allocation81_spill] sm:$0xff]  ;;  %v1458_v3 = vmul.f32 %v1438_v36, %v8955_v32  ;;  %v8958_v63 = vld [vmem:[#allocation82_spill] sm:$0xff] }
 0x15f   :  { %v1456_v28 = vmul.f32 %v1438_v36, %v8953_v18  ;;  %v1457_v47 = vmul.f32 %v1438_v36, %v8954_v62  ;;  %v8956_v26 = vld [vmem:[#allocation97_spill] sm:$0xff]  ;;  %v1461_v42 = vmul.f32 %v1438_v36, %v8958_v63  ;;  %v8959_v0 = vld [vmem:[#allocation90_spill] sm:$0xff]  ;;  %v8962_v6 = vld [vmem:[#allocation83_spill] sm:$0xff]  ;;  %v5600_v63 = vadd.f32 %v1439_v27, %v5468_v25 }
 0x160   :  { %v1459_v61 = vmul.f32 %v1438_v36, %v8956_v26  ;;  %v8957_v8 = vld [vmem:[#allocation105_spill] sm:$0xff]  ;;  %v1462_v9 = vmul.f32 %v1438_v36, %v8959_v0  ;;  %v8960_v46 = vld [vmem:[#allocation98_spill] sm:$0xff]  ;;  %v1465_v56 = vmul.f32 %v1438_v36, %v8962_v6  ;;  %v8963_v40 = vld [vmem:[#allocation91_spill] sm:$0xff]  ;;  %v5603_v0 = vadd.f32 %v1440_v14, %v5471_v57 }
 0x161   :  { %v1460_v19 = vmul.f32 %v1438_v36, %v8957_v8  ;;  %v1463_v53 = vmul.f32 %v1438_v36, %v8960_v46  ;;  %v8961_v10 = vld [vmem:[#allocation106_spill] sm:$0xff]  ;;  %v1466_v18 = vmul.f32 %v1438_v36, %v8963_v40  ;;  %v8964_v49 = vld [vmem:[#allocation99_spill] sm:$0xff]  ;;  %v8966_v16 = vld [vmem:[#allocation101_spill] sm:$0xff]  ;;  %v5609_v6 = vadd.f32 %v1442_v44, %v5477_v45 }
 0x162   :  { %v1464_v37 = vmul.f32 %v1438_v36, %v8961_v10  ;;  %v1467_v62 = vmul.f32 %v1438_v36, %v8964_v49  ;;  %v8965_v34 = vld [vmem:[#allocation107_spill] sm:$0xff]  ;;  %v1469_v26 = vmul.f32 %v1438_v36, %v8966_v16  ;;  %v8967_v39 = vld [vmem:[#allocation93_spill] sm:$0xff]  ;;  %v5606_v10 = vadd.f32 %v1441_v21, %v5474_v33  ;;  %v9009_v40 = vld [vmem:[#allocation14_spill] sm:$0xff] }
 0x163   :  { %v1468_v32 = vmul.f32 %v1438_v36, %v8965_v34  ;;  %v1470_v8 = vmul.f32 %v1438_v36, %v8967_v39  ;;  %v5612_v49 = vadd.f32 %v1443_v13, %v5480_v12  ;;  %v5615_v34 = vadd.f32 %v1444_v38, %v5483_v41  ;;  %v9007_v39 = vld [vmem:[#allocation25_spill] sm:$0xff] }
 0x164   :  { %v5618_v36 = vadd.f32 %v1445_v31, %v5486_v23  ;;  %v5621_v25 = vadd.f32 %v1446_v24, %v5489_v58  ;;  %v5624_v57 = vadd.f32 %v1447_v48, %v5492_v35  ;;  %v5627_v33 = vadd.f32 %v1448_v50, %v5495_v22  ;;  %v9008_v16 = vld [vmem:[#allocation73_spill] sm:$0xff] }
 0x165   :  { %v5630_v45 = vadd.f32 %v1449_v20, %v5498_v55  ;;  %v5633_v12 = vadd.f32 %v1450_v43, %v5501_v7  ;;  %v5636_v41 = vadd.f32 %v1451_v51, %v5504_v1  ;;  %v5639_v23 = vadd.f32 %v1452_v29, %v5507_v54  ;;  %v8987_v20 = vld [vmem:[#allocation49_spill] sm:$0xff] }
 0x166   :  { %v5642_v58 = vadd.f32 %v1453_v17, %v5510_v2  ;;  %v5645_v35 = vadd.f32 %v1454_v30, %v5513_v5  ;;  %v5648_v22 = vadd.f32 %v1455_v52, %v5516_v11  ;;  %v5651_v55 = vadd.f32 %v1456_v28, %v5519_v59  ;;  %v8968_v2 = vld [vmem:[#allocation46_spill] sm:$0xff]  ;;  %v8969_v5 = vld [vmem:[#allocation47_spill] sm:$0xff]  ;;  %v8970_v11 = vld [vmem:[#allocation48_spill] sm:$0xff] }
 0x167   :  { %v5654_v7 = vadd.f32 %v1457_v47, %v5522_v15  ;;  %v5657_v1 = vadd.f32 %v1458_v3, %v5525_v4  ;;  %v5660_v54 = vadd.f32 %v1459_v61, %v5528_v60  ;;  %v5663_v27 = vadd.f32 %v1460_v19, %v8968_v2  ;;  %v8971_v59 = vld [vmem:[#allocation108_spill] sm:$0xff]  ;;  %v8972_v15 = vld [vmem:[#allocation50_spill] sm:$0xff]  ;;  %v8974_v4 = vld [vmem:[#allocation39_spill] sm:$0xff] }
 0x168   :  { %v5666_v14 = vadd.f32 %v1461_v42, %v8969_v5  ;;  %v5669_v21 = vadd.f32 %v1462_v9, %v8970_v11  ;;  %v5672_v44 = vadd.f32 %v1463_v53, %v8971_v59  ;;  %v5675_v13 = vadd.f32 %v1464_v37, %v8972_v15  ;;  %v8976_v60 = vld [vmem:[#allocation51_spill] sm:$0xff]  ;;  %v8978_v52 = vld [vmem:[#allocation94_spill] sm:$0xff]  ;;  %v8980_v28 = vld [vmem:[#allocation109_spill] sm:$0xff] }
 0x169   :  { %v5678_v30 = vadd.f32 %v1465_v56, %v8974_v4  ;;  %v5681_v38 = vadd.f32 %v1466_v18, %v8976_v60  ;;  %v5684_v31 = vadd.f32 %v1467_v62, %v8978_v52  ;;  %v5687_v24 = vadd.f32 %v1468_v32, %v8980_v28  ;;  %v8982_v47 = vld [vmem:[#allocation75_spill] sm:$0xff]  ;;  %v8984_v3 = vld [vmem:[#allocation38_spill] sm:$0xff]  ;;  %v8988_v56 = vld [vmem:[#allocation68_spill] sm:$0xff] }
 0x16a   :  { %8973 = vst [vmem:[#allocation40_spill] sm:$0xff] %v5675_v13  ;;  %v5690_v48 = vadd.f32 %v1469_v26, %v8982_v47  ;;  %v5693_v50 = vadd.f32 %v1470_v8, %v8984_v3  ;;  %v8986_v61 = vld [vmem:[#allocation59_spill] sm:$0xff]  ;;  %v1505_v43 = vmul.f32 %v8987_v20, %v8988_v56  ;;  %v8989_v18 = vld [vmem:[#allocation76_spill] sm:$0xff]  ;;  %v8991_v32 = vld [vmem:[#allocation77_spill] sm:$0xff] }
 0x16b   :  { %8975 = vst [vmem:[#allocation42_spill] sm:$0xff] %v5678_v30  ;;  %8977 = vst [vmem:[#allocation43_spill] sm:$0xff] %v5681_v38  ;;  %v1504_v19 = vmul.f32 %v8987_v20, %v8986_v61  ;;  %v1506_v42 = vmul.f32 %v8987_v20, %v8989_v18  ;;  %v8990_v62 = vld [vmem:[#allocation52_spill] sm:$0xff]  ;;  %v1508_v9 = vmul.f32 %v8987_v20, %v8991_v32  ;;  %v8992_v26 = vld [vmem:[#allocation69_spill] sm:$0xff]  ;;  %v1534_v30 = vmul.f32 0.0, %v8987_v20 }
 0x16c   :  { %8979 = vst [vmem:[#allocation32_spill] sm:$0xff] %v5684_v31  ;;  %8981 = vst [vmem:[#allocation84_spill] sm:$0xff] %v5687_v24  ;;  %v1507_v51 = vmul.f32 %v8987_v20, %v8990_v62  ;;  %v1509_v29 = vmul.f32 %v8987_v20, %v8992_v26  ;;  %v8993_v8 = vld [vmem:[#allocation62_spill] sm:$0xff]  ;;  %v8994_v17 = vld [vmem:[#allocation53_spill] sm:$0xff] }
 0x16d   :  { %8983 = vst [vmem:[#allocation46_spill] sm:$0xff] %v5690_v48  ;;  %8985 = vst [vmem:[#allocation47_spill] sm:$0xff] %v5693_v50  ;;  %v1510_v53 = vmul.f32 %v8987_v20, %v8993_v8  ;;  %v1511_v37 = vmul.f32 %v8987_v20, %v8994_v17  ;;  %v8995_v2 = vld [vmem:[#allocation17_spill] sm:$0xff]  ;;  %v8996_v11 = vld [vmem:[#allocation70_spill] sm:$0xff]  ;;  %v5765_v13 = vadd.f32 %v1506_v42, %v5606_v10 }
 0x16e   :  { %v1512_v5 = vmul.f32 %v8987_v20, %v8995_v2  ;;  %v1513_v59 = vmul.f32 %v8987_v20, %v8996_v11  ;;  %v8997_v15 = vld [vmem:[#allocation18_spill] sm:$0xff]  ;;  %v8999_v28 = vld [vmem:[#allocation19_spill] sm:$0xff]  ;;  %v9001_v56 = vld [vmem:[#allocation21_spill] sm:$0xff] }
 0x16f   :  { %v1514_v4 = vmul.f32 %v8987_v20, %v8997_v15  ;;  %v8998_v60 = vld [vmem:[#allocation54_spill] sm:$0xff]  ;;  %v1516_v47 = vmul.f32 %v8987_v20, %v8999_v28  ;;  %v9000_v3 = vld [vmem:[#allocation71_spill] sm:$0xff]  ;;  %v1518_v18 = vmul.f32 %v8987_v20, %v9001_v56  ;;  %v9004_v17 = vld [vmem:[#allocation72_spill] sm:$0xff]  ;;  %v1525_v56 = vmul.f32 %v8987_v20, %v9008_v16 }
 0x170   :  { %v1515_v52 = vmul.f32 %v8987_v20, %v8998_v60  ;;  %v1517_v61 = vmul.f32 %v8987_v20, %v9000_v3  ;;  %v9002_v62 = vld [vmem:[#allocation55_spill] sm:$0xff]  ;;  %v9003_v26 = vld [vmem:[#allocation22_spill] sm:$0xff]  ;;  %v1521_v2 = vmul.f32 %v8987_v20, %v9004_v17  ;;  %v9006_v60 = vld [vmem:[#allocation56_spill] sm:$0xff]  ;;  %v1524_v3 = vmul.f32 %v8987_v20, %v9007_v39 }
 0x171   :  { %v1519_v32 = vmul.f32 %v8987_v20, %v9002_v62  ;;  %v1520_v8 = vmul.f32 %v8987_v20, %v9003_v26  ;;  %v9005_v11 = vld [vmem:[#allocation23_spill] sm:$0xff]  ;;  %v1523_v28 = vmul.f32 %v8987_v20, %v9006_v60  ;;  %v1526_v62 = vmul.f32 %v8987_v20, %v9009_v40  ;;  %v9010_v46 = vld [vmem:[#allocation57_spill] sm:$0xff]  ;;  %v9011_v50 = vld [vmem:[#allocation26_spill] sm:$0xff] }
 0x172   :  { %v1522_v15 = vmul.f32 %v8987_v20, %v9005_v11  ;;  %v1527_v26 = vmul.f32 %v8987_v20, %v9010_v46  ;;  %v1528_v17 = vmul.f32 %v8987_v20, %v9011_v50  ;;  %v9012_v48 = vld [vmem:[#allocation74_spill] sm:$0xff]  ;;  %v9013_v60 = vld [vmem:[#allocation27_spill] sm:$0xff]  ;;  %v9016_v38 = vld [vmem:[#allocation60_spill] sm:$0xff]  ;;  %v5759_v50 = vadd.f32 %v1504_v19, %v5600_v63 }
 0x173   :  { %v1529_v11 = vmul.f32 %v8987_v20, %v9012_v48  ;;  %v1530_v39 = vmul.f32 %v8987_v20, %v9013_v60  ;;  %v9014_v24 = vld [vmem:[#allocation58_spill] sm:$0xff]  ;;  %v9015_v31 = vld [vmem:[#allocation31_spill] sm:$0xff]  ;;  %v1533_v46 = vmul.f32 %v8987_v20, %v9016_v38  ;;  %v5762_v48 = vadd.f32 %v1505_v43, %v5603_v0 }
 0x174   :  { %v1531_v16 = vmul.f32 %v8987_v20, %v9014_v24  ;;  %v1532_v40 = vmul.f32 %v8987_v20, %v9015_v31  ;;  %v5768_v60 = vadd.f32 %v1507_v51, %v5609_v6  ;;  %v5771_v24 = vadd.f32 %v1508_v9, %v5612_v49  ;;  %v9029_v9 = vld [vmem:[#allocation46_spill] sm:$0xff] }
 0x175   :  { %v5774_v31 = vadd.f32 %v1509_v29, %v5615_v34  ;;  %v5777_v38 = vadd.f32 %v1510_v53, %v5618_v36  ;;  %v5780_v63 = vadd.f32 %v1511_v37, %v5621_v25  ;;  %v5783_v0 = vadd.f32 %v1512_v5, %v5624_v57  ;;  %v9033_v37 = vld [vmem:[#allocation61_spill] sm:$0xff] }
 0x176   :  { %v5786_v10 = vadd.f32 %v1513_v59, %v5627_v33  ;;  %v5789_v6 = vadd.f32 %v1514_v4, %v5630_v45  ;;  %v5792_v49 = vadd.f32 %v1515_v52, %v5633_v12  ;;  %v5795_v34 = vadd.f32 %v1516_v47, %v5636_v41  ;;  %v9034_v59 = vld [vmem:[#allocation16_spill] sm:$0xff] }
 0x177   :  { %v5798_v36 = vadd.f32 %v1517_v61, %v5639_v23  ;;  %v5801_v25 = vadd.f32 %v1518_v18, %v5642_v58  ;;  %v5804_v57 = vadd.f32 %v1519_v32, %v5645_v35  ;;  %v5807_v33 = vadd.f32 %v1520_v8, %v5648_v22  ;;  %v9035_v52 = vld [vmem:[#allocation24_spill] sm:$0xff]  ;;  %v9036_v61 = vld [vmem:[#allocation33_spill] sm:$0xff] }
 0x178   :  { %v5810_v45 = vadd.f32 %v1521_v2, %v5651_v55  ;;  %v5813_v12 = vadd.f32 %v1522_v15, %v5654_v7  ;;  %v5816_v41 = vadd.f32 %v1523_v28, %v5657_v1  ;;  %v5819_v23 = vadd.f32 %v1524_v3, %v5660_v54  ;;  %v9019_v7 = vld [vmem:[#allocation40_spill] sm:$0xff]  ;;  %v9021_v1 = vld [vmem:[#allocation42_spill] sm:$0xff]  ;;  %v9023_v54 = vld [vmem:[#allocation43_spill] sm:$0xff] }
 0x179   :  { %v5822_v58 = vadd.f32 %v1525_v56, %v5663_v27  ;;  %v5825_v35 = vadd.f32 %v1526_v62, %v5666_v14  ;;  %v5828_v22 = vadd.f32 %v1527_v26, %v5669_v21  ;;  %v5831_v55 = vadd.f32 %v1528_v17, %v5672_v44  ;;  %v9025_v27 = vld [vmem:[#allocation32_spill] sm:$0xff]  ;;  %v9031_v44 = vld [vmem:[#allocation47_spill] sm:$0xff]  ;;  %v9037_v32 = vld [vmem:[#allocation29_spill] sm:$0xff] }
 0x17a   :  { %v5834_v20 = vadd.f32 %v1529_v11, %v9019_v7  ;;  %v5837_v19 = vadd.f32 %v1530_v39, %v9021_v1  ;;  %v5840_v43 = vadd.f32 %v1531_v16, %v9023_v54  ;;  %v5843_v42 = vadd.f32 %v1532_v40, %v9025_v27  ;;  %v9027_v14 = vld [vmem:[#allocation84_spill] sm:$0xff]  ;;  %v9038_v2 = vld [vmem:[#allocation37_spill] sm:$0xff]  ;;  %v9039_v28 = vld [vmem:[#allocation30_spill] sm:$0xff] }
 0x17b   :  { %9017 = vst [vmem:[#allocation48_spill] sm:$0xff] %v5828_v22  ;;  %9018 = vst [vmem:[#allocation108_spill] sm:$0xff] %v5831_v55  ;;  %v5846_v51 = vadd.f32 %v1533_v46, %v9027_v14  ;;  %v1567_v21 = vstv %s5747_s18  ;;  %v5850_v29 = vadd.f32 %v1534_v30, %v9029_v9  ;;  %v5853_v53 = vadd.f32 %v1534_v30, %v9031_v44  ;;  %v9040_v56 = vld [vmem:[#allocation78_spill] sm:$0xff]  ;;  %v9041_v26 = vld [vmem:[#allocation92_spill] sm:$0xff] }
 0x17c   :  { %9020 = vst [vmem:[#allocation50_spill] sm:$0xff] %v5834_v20  ;;  %9022 = vst [vmem:[#allocation39_spill] sm:$0xff] %v5837_v19  ;;  %v1568_v5 = vmul.f32 %v1567_v21, %v9033_v37  ;;  %v1569_v4 = vmul.f32 %v1567_v21, %v9034_v59  ;;  %v1570_v47 = vmul.f32 %v1567_v21, %v9035_v52  ;;  %v9042_v30 = vld [vmem:[#allocation41_spill] sm:$0xff]  ;;  %v9043_v39 = vld [vmem:[#allocation110_spill] sm:$0xff]  ;;  %v1598_v22 = vmul.f32 0.0, %v1567_v21 }
 0x17d   :  { %9024 = vst [vmem:[#allocation51_spill] sm:$0xff] %v5840_v43  ;;  %9026 = vst [vmem:[#allocation94_spill] sm:$0xff] %v5843_v42  ;;  %v1571_v18 = vmul.f32 %v1567_v21, %v9036_v61  ;;  %v1572_v8 = vmul.f32 %v1567_v21, %v9037_v32  ;;  %v1573_v15 = vmul.f32 %v1567_v21, %v9038_v2  ;;  %v9044_v40 = vld [vmem:[#allocation111_spill] sm:$0xff]  ;;  %v9045_v7 = vld [vmem:[#allocation112_spill] sm:$0xff] }
 0x17e   :  { %9028 = vst [vmem:[#allocation109_spill] sm:$0xff] %v5846_v51  ;;  %9030 = vst [vmem:[#allocation75_spill] sm:$0xff] %v5850_v29  ;;  %v1574_v3 = vmul.f32 %v1567_v21, %v9039_v28  ;;  %v1575_v62 = vmul.f32 %v1567_v21, %v9040_v56  ;;  %v1576_v17 = vmul.f32 %v1567_v21, %v9041_v26  ;;  %v9046_v54 = vld [vmem:[#allocation113_spill] sm:$0xff]  ;;  %v9047_v14 = vld [vmem:[#allocation8_spill] sm:$0xff] }
 0x17f   :  { %9032 = vst [vmem:[#allocation38_spill] sm:$0xff] %v5853_v53  ;;  %v1577_v11 = vmul.f32 %v1567_v21, %v9042_v30  ;;  %v1578_v16 = vmul.f32 %v1567_v21, %v9043_v39  ;;  %v1579_v46 = vmul.f32 %v1567_v21, %v9044_v40  ;;  %v1580_v1 = vmul.f32 %v1567_v21, %v9045_v7  ;;  %v9048_v44 = vld [vmem:[#allocation114_spill] sm:$0xff]  ;;  %v9049_v59 = vld [vmem:[#allocation9_spill] sm:$0xff]  ;;  %v9051_v2 = vld [vmem:[#allocation11_spill] sm:$0xff] }
 0x180   :  { %v1581_v27 = vmul.f32 %v1567_v21, %v9046_v54  ;;  %v1582_v9 = vmul.f32 %v1567_v21, %v9047_v14  ;;  %v1583_v37 = vmul.f32 %v1567_v21, %v9048_v44  ;;  %v1584_v52 = vmul.f32 %v1567_v21, %v9049_v59  ;;  %v9050_v61 = vld [vmem:[#allocation10_spill] sm:$0xff]  ;;  %v9052_v56 = vld [vmem:[#allocation12_spill] sm:$0xff]  ;;  %v9053_v30 = vld [vmem:[#allocation63_spill] sm:$0xff] }
 0x181   :  { %v1585_v32 = vmul.f32 %v1567_v21, %v9050_v61  ;;  %v1586_v28 = vmul.f32 %v1567_v21, %v9051_v2  ;;  %v1587_v26 = vmul.f32 %v1567_v21, %v9052_v56  ;;  %v1588_v39 = vmul.f32 %v1567_v21, %v9053_v30  ;;  %v9054_v53 = vld [vmem:[#allocation13_spill] sm:$0xff]  ;;  %v9055_v29 = vld [vmem:[#allocation20_spill] sm:$0xff]  ;;  %v9060_v19 = vld [vmem:[#allocation66_spill] sm:$0xff] }
 0x182   :  { %v1589_v40 = vmul.f32 %v1567_v21, %v9054_v53  ;;  %v1590_v7 = vmul.f32 %v1567_v21, %v9055_v29  ;;  %v9056_v51 = vld [vmem:[#allocation64_spill] sm:$0xff]  ;;  %v9058_v43 = vld [vmem:[#allocation65_spill] sm:$0xff]  ;;  %v1595_v2 = vmul.f32 %v1567_v21, %v9060_v19  ;;  %v9062_v55 = vld [vmem:[#allocation67_spill] sm:$0xff]  ;;  %v5888_v53 = vadd.f32 %v1568_v5, %v5759_v50 }
 0x183   :  { %v1591_v54 = vmul.f32 %v1567_v21, %v9056_v51  ;;  %v9057_v42 = vld [vmem:[#allocation28_spill] sm:$0xff]  ;;  %v1593_v44 = vmul.f32 %v1567_v21, %v9058_v43  ;;  %v9061_v20 = vld [vmem:[#allocation45_spill] sm:$0xff]  ;;  %v1597_v30 = vmul.f32 %v1567_v21, %v9062_v55  ;;  %v5891_v51 = vadd.f32 %v1569_v4, %v5762_v48 }
 0x184   :  { %v1592_v14 = vmul.f32 %v1567_v21, %v9057_v42  ;;  %v9059_v59 = vld [vmem:[#allocation44_spill] sm:$0xff]  ;;  %v1596_v56 = vmul.f32 %v1567_v21, %v9061_v20  ;;  %v5894_v42 = vadd.f32 %v1570_v47, %v5765_v13  ;;  %v5897_v43 = vadd.f32 %v1571_v18, %v5768_v60 }
 0x185   :  { %v1594_v61 = vmul.f32 %v1567_v21, %v9059_v59  ;;  %v5900_v29 = vadd.f32 %v1572_v8, %v5771_v24  ;;  %v5903_v20 = vadd.f32 %v1573_v15, %v5774_v31  ;;  %v5906_v55 = vadd.f32 %v1574_v3, %v5777_v38  ;;  %v9077_v3 = vld [vmem:[#allocation75_spill] sm:$0xff] }
 0x186   :  { %v5909_v50 = vadd.f32 %v1575_v62, %v5780_v63  ;;  %v5912_v48 = vadd.f32 %v1576_v17, %v5783_v0  ;;  %v5915_v13 = vadd.f32 %v1577_v11, %v5786_v10  ;;  %v5918_v60 = vadd.f32 %v1578_v16, %v5789_v6  ;;  %v9079_v17 = vld [vmem:[#allocation38_spill] sm:$0xff]  ;;  %v9089_v59 = vld [vmem:[#allocation15_spill] sm:$0xff] }
 0x187   :  { %v5921_v24 = vadd.f32 %v1579_v46, %v5792_v49  ;;  %v5924_v31 = vadd.f32 %v1580_v1, %v5795_v34  ;;  %v5927_v38 = vadd.f32 %v1581_v27, %v5798_v36  ;;  %v5930_v63 = vadd.f32 %v1582_v9, %v5801_v25  ;;  %v9081_v16 = vld [vmem:[#allocation34_spill] sm:$0xff]  ;;  %v9082_v1 = vld [vmem:[#allocation100_spill] sm:$0xff]  ;;  %v9083_v9 = vld [vmem:[#allocation35_spill] sm:$0xff] }
 0x188   :  { %v5933_v0 = vadd.f32 %v1583_v37, %v5804_v57  ;;  %v5936_v10 = vadd.f32 %v1584_v52, %v5807_v33  ;;  %v5939_v6 = vadd.f32 %v1585_v32, %v5810_v45  ;;  %v5942_v49 = vadd.f32 %v1586_v28, %v5813_v12  ;;  %v9063_v33 = vld [vmem:[#allocation48_spill] sm:$0xff]  ;;  %v9067_v12 = vld [vmem:[#allocation50_spill] sm:$0xff]  ;;  %v9084_v52 = vld [vmem:[#allocation85_spill] sm:$0xff] }
 0x189   :  { %v5945_v34 = vadd.f32 %v1587_v26, %v5816_v41  ;;  %v5948_v36 = vadd.f32 %v1588_v39, %v5819_v23  ;;  %v5951_v25 = vadd.f32 %v1589_v40, %v5822_v58  ;;  %v5954_v57 = vadd.f32 %v1590_v7, %v5825_v35  ;;  %v9065_v45 = vld [vmem:[#allocation108_spill] sm:$0xff]  ;;  %v9069_v41 = vld [vmem:[#allocation39_spill] sm:$0xff]  ;;  %v9073_v58 = vld [vmem:[#allocation94_spill] sm:$0xff] }
 0x18a   :  { %v5957_v19 = vadd.f32 %v1591_v54, %v9063_v33  ;;  %v5960_v21 = vadd.f32 %v1592_v14, %v9065_v45  ;;  %v5963_v5 = vadd.f32 %v1593_v44, %v9067_v12  ;;  %v5966_v4 = vadd.f32 %v1594_v61, %v9069_v41  ;;  %v9071_v23 = vld [vmem:[#allocation51_spill] sm:$0xff]  ;;  %v9075_v35 = vld [vmem:[#allocation109_spill] sm:$0xff]  ;;  %v9085_v28 = vld [vmem:[#allocation36_spill] sm:$0xff] }
 0x18b   :  { %v5969_v47 = vadd.f32 %v1595_v2, %v9071_v23  ;;  %v5972_v18 = vadd.f32 %v1596_v56, %v9073_v58  ;;  %v5975_v8 = vadd.f32 %v1597_v30, %v9075_v35  ;;  %v1631_v15 = vstv %s5881_s19  ;;  %v9086_v39 = vld [vmem:[#allocation86_spill] sm:$0xff]  ;;  %v9087_v7 = vld [vmem:[#allocation79_spill] sm:$0xff]  ;;  %v9093_v12 = vld [vmem:[#allocation80_spill] sm:$0xff] }
 0x18c   :  { %9064 = vst [vmem:[#allocation59_spill] sm:$0xff] %v5957_v19  ;;  %9066 = vst [vmem:[#allocation49_spill] sm:$0xff] %v5960_v21  ;;  %v5979_v62 = vadd.f32 %v1598_v22, %v9077_v3  ;;  %v5982_v11 = vadd.f32 %v1598_v22, %v9079_v17  ;;  %v1632_v46 = vmul.f32 %v1631_v15, %v9081_v16  ;;  %v9088_v14 = vld [vmem:[#allocation102_spill] sm:$0xff]  ;;  %v9090_v22 = vld [vmem:[#allocation87_spill] sm:$0xff] }
 0x18d   :  { %9068 = vst [vmem:[#allocation68_spill] sm:$0xff] %v5963_v5  ;;  %9070 = vst [vmem:[#allocation76_spill] sm:$0xff] %v5966_v4  ;;  %v1633_v27 = vmul.f32 %v1631_v15, %v9082_v1  ;;  %v1634_v37 = vmul.f32 %v1631_v15, %v9083_v9  ;;  %v1635_v32 = vmul.f32 %v1631_v15, %v9084_v52  ;;  %v9091_v56 = vld [vmem:[#allocation95_spill] sm:$0xff]  ;;  %v9094_v23 = vld [vmem:[#allocation88_spill] sm:$0xff] }
 0x18e   :  { %9072 = vst [vmem:[#allocation52_spill] sm:$0xff] %v5969_v47  ;;  %9074 = vst [vmem:[#allocation77_spill] sm:$0xff] %v5972_v18  ;;  %v1636_v26 = vmul.f32 %v1631_v15, %v9085_v28  ;;  %v1637_v40 = vmul.f32 %v1631_v15, %v9086_v39  ;;  %v1638_v54 = vmul.f32 %v1631_v15, %v9087_v7  ;;  %v9092_v33 = vld [vmem:[#allocation103_spill] sm:$0xff]  ;;  %v9095_v35 = vld [vmem:[#allocation96_spill] sm:$0xff] }
 0x18f   :  { %9076 = vst [vmem:[#allocation69_spill] sm:$0xff] %v5975_v8  ;;  %9078 = vst [vmem:[#allocation62_spill] sm:$0xff] %v5979_v62  ;;  %v1639_v44 = vmul.f32 %v1631_v15, %v9088_v14  ;;  %v1640_v61 = vmul.f32 %v1631_v15, %v9089_v59  ;;  %v1641_v2 = vmul.f32 %v1631_v15, %v9090_v22  ;;  %v9096_v17 = vld [vmem:[#allocation104_spill] sm:$0xff]  ;;  %v9097_v1 = vld [vmem:[#allocation81_spill] sm:$0xff] }
 0x190   :  { %9080 = vst [vmem:[#allocation53_spill] sm:$0xff] %v5982_v11  ;;  %v1642_v30 = vmul.f32 %v1631_v15, %v9091_v56  ;;  %v1643_v45 = vmul.f32 %v1631_v15, %v9092_v33  ;;  %v1644_v41 = vmul.f32 %v1631_v15, %v9093_v12  ;;  %v1645_v58 = vmul.f32 %v1631_v15, %v9094_v23  ;;  %v9098_v52 = vld [vmem:[#allocation89_spill] sm:$0xff]  ;;  %v9101_v22 = vld [vmem:[#allocation82_spill] sm:$0xff]  ;;  %v9105_v18 = vld [vmem:[#allocation83_spill] sm:$0xff] }
 0x191   :  { %v1646_v3 = vmul.f32 %v1631_v15, %v9095_v35  ;;  %v1647_v16 = vmul.f32 %v1631_v15, %v9096_v17  ;;  %v1648_v9 = vmul.f32 %v1631_v15, %v9097_v1  ;;  %v1649_v28 = vmul.f32 %v1631_v15, %v9098_v52  ;;  %v9099_v39 = vld [vmem:[#allocation97_spill] sm:$0xff]  ;;  %v9102_v11 = vld [vmem:[#allocation90_spill] sm:$0xff]  ;;  %v9106_v47 = vld [vmem:[#allocation91_spill] sm:$0xff] }
 0x192   :  { %v1650_v7 = vmul.f32 %v1631_v15, %v9099_v39  ;;  %v9100_v14 = vld [vmem:[#allocation105_spill] sm:$0xff]  ;;  %v1652_v56 = vmul.f32 %v1631_v15, %v9101_v22  ;;  %v1653_v33 = vmul.f32 %v1631_v15, %v9102_v11  ;;  %v9103_v62 = vld [vmem:[#allocation98_spill] sm:$0xff]  ;;  %v1656_v35 = vmul.f32 %v1631_v15, %v9105_v18  ;;  %v9107_v4 = vld [vmem:[#allocation99_spill] sm:$0xff] }
 0x193   :  { %v1651_v59 = vmul.f32 %v1631_v15, %v9100_v14  ;;  %v1654_v12 = vmul.f32 %v1631_v15, %v9103_v62  ;;  %v9104_v8 = vld [vmem:[#allocation106_spill] sm:$0xff]  ;;  %v1657_v17 = vmul.f32 %v1631_v15, %v9106_v47  ;;  %v1658_v1 = vmul.f32 %v1631_v15, %v9107_v4  ;;  %v9108_v5 = vld [vmem:[#allocation107_spill] sm:$0xff]  ;;  %v9109_v21 = vld [vmem:[#allocation101_spill] sm:$0xff] }
 0x194   :  { %v1655_v23 = vmul.f32 %v1631_v15, %v9104_v8  ;;  %v1659_v52 = vmul.f32 %v1631_v15, %v9108_v5  ;;  %v1660_v39 = vmul.f32 %v1631_v15, %v9109_v21  ;;  %v9110_v19 = vld [vmem:[#allocation93_spill] sm:$0xff]  ;;  %v1662_v22 = vmul.f32 0.0, %v1631_v15 }
 0x195   :  { %v1661_v14 = vmul.f32 %v1631_v15, %v9110_v19  ;;  %v1663_v11 = vadd.f32 %v1632_v46, %v5888_v53  ;;  %v1664_v62 = vadd.f32 %v1633_v27, %v5891_v51  ;;  %v1665_v8 = vadd.f32 %v1634_v37, %v5894_v42  ;;  %v9113_v37 = vld [vmem:[#allocation68_spill] sm:$0xff] }
 0x196   :  { %v1666_v18 = vadd.f32 %v1635_v32, %v5897_v43  ;;  %v1667_v47 = vadd.f32 %v1636_v26, %v5900_v29  ;;  %v1668_v4 = vadd.f32 %v1637_v40, %v5903_v20  ;;  %v1669_v5 = vadd.f32 %v1638_v54, %v5906_v55  ;;  %v9114_v32 = vld [vmem:[#allocation76_spill] sm:$0xff]  ;;  %v9116_v40 = vld [vmem:[#allocation77_spill] sm:$0xff] }
 0x197   :  { %v1670_v21 = vadd.f32 %v1639_v44, %v5909_v50  ;;  %v1671_v19 = vadd.f32 %v1640_v61, %v5912_v48  ;;  %v1672_v15 = vadd.f32 %v1641_v2, %v5915_v13  ;;  %v1673_v53 = vadd.f32 %v1642_v30, %v5918_v60  ;;  %v9115_v26 = vld [vmem:[#allocation52_spill] sm:$0xff]  ;;  %v9117_v54 = vld [vmem:[#allocation69_spill] sm:$0xff] }
 0x198   :  { %v1674_v51 = vadd.f32 %v1643_v45, %v5921_v24  ;;  %v1675_v42 = vadd.f32 %v1644_v41, %v5924_v31  ;;  %v1676_v43 = vadd.f32 %v1645_v58, %v5927_v38  ;;  %v1677_v29 = vadd.f32 %v1646_v3, %v5930_v63  ;;  %v9111_v38 = vld [vmem:[#allocation59_spill] sm:$0xff]  ;;  %v9112_v63 = vld [vmem:[#allocation49_spill] sm:$0xff] }
 0x199   :  { %v1678_v20 = vadd.f32 %v1647_v16, %v5933_v0  ;;  %v1679_v55 = vadd.f32 %v1648_v9, %v5936_v10  ;;  %v1680_v50 = vadd.f32 %v1649_v28, %v5939_v6  ;;  %v1681_v48 = vadd.f32 %v1650_v7, %v5942_v49 }
 0x19a   :  { %v1682_v13 = vadd.f32 %v1651_v59, %v5945_v34  ;;  %v1683_v60 = vadd.f32 %v1652_v56, %v5948_v36  ;;  %v1684_v24 = vadd.f32 %v1653_v33, %v5951_v25  ;;  %v1685_v31 = vadd.f32 %v1654_v12, %v5954_v57  ;;  %v9118_v36 = vld [vmem:[#allocation62_spill] sm:$0xff]  ;;  %v9119_v25 = vld [vmem:[#allocation53_spill] sm:$0xff] }
 0x19b   :  { %v1686_v46 = vadd.f32 %v1655_v23, %v9111_v38  ;;  %v1687_v27 = vadd.f32 %v1656_v35, %v9112_v63  ;;  %v1688_v0 = vadd.f32 %v1657_v17, %v9113_v37  ;;  %v1689_v10 = vadd.f32 %v1658_v1, %v9114_v32 }
 0x19c   :  { %v1690_v6 = vadd.f32 %v1659_v52, %v9115_v26  ;;  %v1691_v49 = vadd.f32 %v1660_v39, %v9116_v40  ;;  %v1692_v34 = vadd.f32 %v1661_v14, %v9117_v54  ;;  %v1696_v44 = vstv %s6014_s20 }
 0x19d   :  { %v1693_v61 = vadd.f32 %v1662_v22, %v9118_v36  ;;  %v1694_v2 = vadd.f32 %v1662_v22, %v9119_v25  ;;  %v1697_v57 = vadd.f32 %v1696_v44, %v1663_v11  ;;  %v1698_v30 = vadd.f32 %v1696_v44, %v1664_v62 }
 0x19e   :  { %v1699_v45 = vadd.f32 %v1696_v44, %v1665_v8  ;;  %v1700_v41 = vadd.f32 %v1696_v44, %v1666_v18  ;;  %v1701_v58 = vadd.f32 %v1696_v44, %v1667_v47  ;;  %v1702_v3 = vadd.f32 %v1696_v44, %v1668_v4 }
 0x19f   :  { %v1703_v16 = vadd.f32 %v1696_v44, %v1669_v5  ;;  %v1704_v9 = vadd.f32 %v1696_v44, %v1670_v21  ;;  %v1705_v28 = vadd.f32 %v1696_v44, %v1671_v19  ;;  %v1706_v7 = vadd.f32 %v1696_v44, %v1672_v15 }
 0x1a0   :  { %v1707_v59 = vadd.f32 %v1696_v44, %v1673_v53  ;;  %v1708_v56 = vadd.f32 %v1696_v44, %v1674_v51  ;;  %v1709_v33 = vadd.f32 %v1696_v44, %v1675_v42  ;;  %v1710_v12 = vadd.f32 %v1696_v44, %v1676_v43 }
 0x1a1   :  { %v1711_v23 = vadd.f32 %v1696_v44, %v1677_v29  ;;  %v1712_v35 = vadd.f32 %v1696_v44, %v1678_v20  ;;  %v1713_v17 = vadd.f32 %v1696_v44, %v1679_v55  ;;  %v1714_v1 = vadd.f32 %v1696_v44, %v1680_v50 }
 0x1a2   :  { %v1715_v52 = vadd.f32 %v1696_v44, %v1681_v48  ;;  %v1716_v39 = vadd.f32 %v1696_v44, %v1682_v13  ;;  %v1717_v14 = vadd.f32 %v1696_v44, %v1683_v60  ;;  %v1718_v22 = vadd.f32 %v1696_v44, %v1684_v24 }
 0x1a3   :  { %v1719_v11 = vadd.f32 %v1696_v44, %v1685_v31  ;;  %v1720_v62 = vadd.f32 %v1696_v44, %v1686_v46  ;;  %v1721_v8 = vadd.f32 %v1696_v44, %v1687_v27  ;;  %v1722_v18 = vadd.f32 %v1696_v44, %v1688_v0 }
 0x1a4   :  { %v1723_v47 = vadd.f32 %v1696_v44, %v1689_v10  ;;  %v1724_v4 = vadd.f32 %v1696_v44, %v1690_v6  ;;  %v1725_v5 = vadd.f32 %v1696_v44, %v1691_v49  ;;  %v1726_v21 = vadd.f32 %v1696_v44, %v1692_v34 }
 0x1a5   :  { %v1727_v19 = vadd.f32 %v1696_v44, %v1693_v61  ;;  %v1728_v15 = vadd.f32 %v1696_v44, %v1694_v2  ;;  %v6049_v53 = vmax.f32 %v1697_v57, 0.0  ;;  %v6051_v51 = vmax.f32 %v1698_v30, 0.0 }
 0x1a6   :  { %v6053_v42 = vmax.f32 %v1699_v45, 0.0  ;;  %v6055_v43 = vmax.f32 %v1700_v41, 0.0  ;;  %v6057_v29 = vmax.f32 %v1701_v58, 0.0  ;;  %v6059_v20 = vmax.f32 %v1702_v3, 0.0 }
 0x1a7   :  { %9120 = vst [vmem:[#allocation17_spill] sm:$0xff] %v6049_v53  ;;  %9121 = vst [vmem:[#allocation70_spill] sm:$0xff] %v6051_v51  ;;  %v6061_v55 = vmax.f32 %v1703_v16, 0.0  ;;  %v6063_v50 = vmax.f32 %v1704_v9, 0.0  ;;  %v6065_v48 = vmax.f32 %v1705_v28, 0.0  ;;  %v6067_v13 = vmax.f32 %v1706_v7, 0.0 }
 0x1a8   :  { %9122 = vst [vmem:[#allocation18_spill] sm:$0xff] %v6053_v42  ;;  %9123 = vst [vmem:[#allocation54_spill] sm:$0xff] %v6055_v43  ;;  %v6069_v60 = vmax.f32 %v1707_v59, 0.0  ;;  %v6071_v24 = vmax.f32 %v1708_v56, 0.0  ;;  %v6073_v31 = vmax.f32 %v1709_v33, 0.0  ;;  %v6075_v38 = vmax.f32 %v1710_v12, 0.0 }
 0x1a9   :  { %9124 = vst [vmem:[#allocation19_spill] sm:$0xff] %v6057_v29  ;;  %9125 = vst [vmem:[#allocation71_spill] sm:$0xff] %v6059_v20  ;;  %v6077_v46 = vmax.f32 %v1711_v23, 0.0  ;;  %v6079_v63 = vmax.f32 %v1712_v35, 0.0  ;;  %v6081_v27 = vmax.f32 %v1713_v17, 0.0  ;;  %v6083_v37 = vmax.f32 %v1714_v1, 0.0 }
 0x1aa   :  { %9126 = vst [vmem:[#allocation21_spill] sm:$0xff] %v6061_v55  ;;  %9127 = vst [vmem:[#allocation55_spill] sm:$0xff] %v6063_v50  ;;  %v6085_v0 = vmax.f32 %v1715_v52, 0.0  ;;  %v6087_v32 = vmax.f32 %v1716_v39, 0.0  ;;  %v6089_v10 = vmax.f32 %v1717_v14, 0.0  ;;  %v6091_v26 = vmax.f32 %v1718_v22, 0.0 }
 0x1ab   :  { %9128 = vst [vmem:[#allocation22_spill] sm:$0xff] %v6065_v48  ;;  %9129 = vst [vmem:[#allocation72_spill] sm:$0xff] %v6067_v13  ;;  %v6093_v6 = vmax.f32 %v1719_v11, 0.0  ;;  %v6095_v40 = vmax.f32 %v1720_v62, 0.0  ;;  %v6097_v49 = vmax.f32 %v1721_v8, 0.0  ;;  %v6099_v54 = vmax.f32 %v1722_v18, 0.0 }
 0x1ac   :  { %9130 = vst [vmem:[#allocation23_spill] sm:$0xff] %v6069_v60  ;;  %9131 = vst [vmem:[#allocation56_spill] sm:$0xff] %v6071_v24  ;;  %v6101_v34 = vmax.f32 %v1723_v47, 0.0  ;;  %v6103_v44 = vmax.f32 %v1724_v4, 0.0  ;;  %v6105_v36 = vmax.f32 %v1725_v5, 0.0  ;;  %v6107_v61 = vmax.f32 %v1726_v21, 0.0 }
 0x1ad   :  { %9132 = vst [vmem:[#allocation25_spill] sm:$0xff] %v6073_v31  ;;  %9133 = vst [vmem:[#allocation73_spill] sm:$0xff] %v6075_v38  ;;  %v1802_v25 = vrot.slane %v6049_v53, 7  ;;  %v1803_v2 = vrot.slane %v6051_v51, 7  ;;  %v1805_v57 = vrot.slane %v6053_v42, 7  ;;  %v1806_v30 = vrot.slane %v6055_v43, 7 }
 0x1ae   :  { %9134 = vst [vmem:[#allocation14_spill] sm:$0xff] %v6077_v46  ;;  %9135 = vst [vmem:[#allocation57_spill] sm:$0xff] %v6079_v63  ;;  %v1808_v45 = vrot.slane %v6057_v29, 7  ;;  %v1809_v41 = vrot.slane %v6059_v20, 7  ;;  %v1811_v58 = vrot.slane %v6061_v55, 7  ;;  %v1812_v3 = vrot.slane %v6063_v50, 7 }
 0x1af   :  { %9136 = vst [vmem:[#allocation26_spill] sm:$0xff] %v6081_v27  ;;  %9137 = vst [vmem:[#allocation74_spill] sm:$0xff] %v6083_v37  ;;  %v6117_v16 = vmax.f32 %v1727_v19, 0.0  ;;  %v6119_v9 = vmax.f32 %v1728_v15, 0.0  ;;  %v1814_v28 = vrot.slane %v6065_v48, 7  ;;  %v1815_v7 = vrot.slane %v6067_v13, 7 }
 0x1b0   :  { %9138 = vst [vmem:[#allocation27_spill] sm:$0xff] %v6085_v0  ;;  %9139 = vst [vmem:[#allocation58_spill] sm:$0xff] %v6087_v32  ;;  %v6124_v59 = vsel %vm112_vm0, %v1802_v25, %v1803_v2  ;;  %v6127_v56 = vsel %vm112_vm0, %v1805_v57, %v1806_v30  ;;  %v1817_v33 = vrot.slane %v6069_v60, 7  ;;  %v1818_v12 = vrot.slane %v6071_v24, 7 }
 0x1b1   :  { %9140 = vst [vmem:[#allocation31_spill] sm:$0xff] %v6089_v10  ;;  %9141 = vst [vmem:[#allocation60_spill] sm:$0xff] %v6091_v26  ;;  %v6132_v23 = vsel %vm112_vm0, %v1808_v45, %v1809_v41  ;;  %v1820_v35 = vrot.slane %v6073_v31, 7  ;;  %v1821_v17 = vrot.slane %v6075_v38, 7  ;;  %v1823_v1 = vrot.slane %v6077_v46, 7 }
 0x1b2   :  { %9142 = vst [vmem:[#allocation40_spill] sm:$0xff] %v6093_v6  ;;  %9143 = vst [vmem:[#allocation42_spill] sm:$0xff] %v6095_v40  ;;  %v6138_v52 = vsel %vm112_vm0, %v1811_v58, %v1812_v3  ;;  %v1824_v39 = vrot.slane %v6079_v63, 7  ;;  %v1826_v14 = vrot.slane %v6081_v27, 7  ;;  %v1827_v22 = vrot.slane %v6083_v37, 7 }
 0x1b3   :  { %9144 = vst [vmem:[#allocation43_spill] sm:$0xff] %v6097_v49  ;;  %9145 = vst [vmem:[#allocation32_spill] sm:$0xff] %v6099_v54  ;;  %v6144_v11 = vsel %vm112_vm0, %v1814_v28, %v1815_v7  ;;  %v1829_v62 = vrot.slane %v6085_v0, 7  ;;  %v1830_v8 = vrot.slane %v6087_v32, 7  ;;  %v1832_v18 = vrot.slane %v6089_v10, 7 }
 0x1b4   :  { %9146 = vst [vmem:[#allocation84_spill] sm:$0xff] %v6101_v34  ;;  %9147 = vst [vmem:[#allocation46_spill] sm:$0xff] %v6103_v44  ;;  %v6150_v47 = vsel %vm112_vm0, %v1817_v33, %v1818_v12  ;;  %v6153_v4 = vsel %vm112_vm0, %v1820_v35, %v1821_v17  ;;  %v1833_v5 = vrot.slane %v6091_v26, 7  ;;  %v1835_v21 = vrot.slane %v6093_v6, 7 }
 0x1b5   :  { %9148 = vst [vmem:[#allocation47_spill] sm:$0xff] %v6105_v36  ;;  %9149 = vst [vmem:[#allocation61_spill] sm:$0xff] %v6107_v61  ;;  %v6158_v19 = vsel %vm112_vm0, %v1823_v1, %v1824_v39  ;;  %v1836_v15 = vrot.slane %v6095_v40, 7  ;;  %v1838_v2 = vrot.slane %v6097_v49, 7  ;;  %v1839_v30 = vrot.slane %v6099_v54, 7 }
 0x1b6   :  { %9150 = vst [vmem:[#allocation16_spill] sm:$0xff] %v6117_v16  ;;  %9151 = vst [vmem:[#allocation24_spill] sm:$0xff] %v6119_v9  ;;  %v6164_v41 = vsel %vm112_vm0, %v1826_v14, %v1827_v22  ;;  %v1841_v3 = vrot.slane %v6101_v34, 7  ;;  %v1842_v7 = vrot.slane %v6103_v44, 7  ;;  %v1844_v12 = vrot.slane %v6105_v36, 7 }
 0x1b7   :  { %9152 = vst [vmem:[#allocation33_spill] sm:$0xff] %v6124_v59  ;;  %9153 = vst [vmem:[#allocation29_spill] sm:$0xff] %v6127_v56  ;;  %v6170_v17 = vsel %vm112_vm0, %v1829_v62, %v1830_v8  ;;  %v6173_v39 = vsel %vm112_vm0, %v1832_v18, %v1833_v5  ;;  %v6181_v22 = vsel %vm112_vm0, %v1838_v2, %v1839_v30  ;;  %v6191_v5 = vsel %vm112_vm0, 0.0, %v1802_v25 }
 0x1b8   :  { %9154 = vst [vmem:[#allocation37_spill] sm:$0xff] %v6132_v23  ;;  %9155 = vst [vmem:[#allocation30_spill] sm:$0xff] %v6138_v52  ;;  %v6212_v25 = vsel %vm112_vm0, 0.0, %v1820_v35  ;;  %v6233_v35 = vsel %vm112_vm0, 0.0, %v1841_v3 }
 0x1b9   :  { %9156 = vst [vmem:[#allocation78_spill] sm:$0xff] %v6144_v11  ;;  %9157 = vst [vmem:[#allocation92_spill] sm:$0xff] %v6150_v47  ;;  %v6178_v47 = vsel %vm112_vm0, %v1835_v21, %v1836_v15  ;;  %v1848_v11 = vrot.slane %v6119_v9, 7  ;;  %v6197_v15 = vsel %vm112_vm0, 0.0, %v1808_v45  ;;  %v6218_v45 = vsel %vm112_vm0, 0.0, %v1826_v14 }
 0x1ba   :  { %9158 = vst [vmem:[#allocation41_spill] sm:$0xff] %v6153_v4  ;;  %9159 = vst [vmem:[#allocation110_spill] sm:$0xff] %v6158_v19  ;;  %v1845_v19 = vrot.slane %v6107_v61, 7  ;;  %v1847_v4 = vrot.slane %v6117_v16, 7  ;;  %v1899_v14 = vrot.slane %v6051_v51, 1  ;;  %v1910_v51 = vrot.slane %v6065_v48, 1 }
 0x1bb   :  { %9160 = vst [vmem:[#allocation111_spill] sm:$0xff] %v6164_v41  ;;  %9161 = vst [vmem:[#allocation112_spill] sm:$0xff] %v6170_v17  ;;  %v6184_v41 = vsel %vm112_vm0, %v1841_v3, %v1842_v7  ;;  %v6203_v7 = vsel %vm112_vm0, 0.0, %v1811_v58  ;;  %v6224_v58 = vsel %vm112_vm0, 0.0, %v1832_v18  ;;  %v1904_v18 = vrot.slane %v6057_v29, 1 }
 0x1bc   :  { %9162 = vst [vmem:[#allocation113_spill] sm:$0xff] %v6173_v39  ;;  %9163 = vst [vmem:[#allocation8_spill] sm:$0xff] %v6178_v47  ;;  %v6188_v8 = vsel %vm112_vm0, %v1844_v12, %v1845_v19  ;;  %v6194_v39 = vsel %vm112_vm0, 0.0, %v1805_v57  ;;  %v6200_v30 = vsel %vm112_vm0, %v1847_v4, %v1848_v11  ;;  %v6209_v19 = vsel %vm112_vm0, 0.0, %v1817_v33 }
 0x1bd   :  { %9164 = vst [vmem:[#allocation114_spill] sm:$0xff] %v6181_v22  ;;  %9165 = vst [vmem:[#allocation9_spill] sm:$0xff] %v6184_v41  ;;  %v6206_v41 = vsel %vm112_vm0, 0.0, %v1814_v28  ;;  %v6215_v57 = vsel %vm112_vm0, 0.0, %v1823_v1  ;;  %v6221_v11 = vsel %vm112_vm0, 0.0, %v1829_v62  ;;  %v6227_v28 = vsel %vm112_vm0, 0.0, %v1835_v21 }
 0x1be   :  { %9166 = vst [vmem:[#allocation10_spill] sm:$0xff] %v6188_v8  ;;  %9167 = vst [vmem:[#allocation11_spill] sm:$0xff] %v6191_v5  ;;  %v6230_v33 = vsel %vm112_vm0, 0.0, %v1838_v2  ;;  %v1898_v1 = vrot.slane %v6049_v53, 1  ;;  %v1902_v62 = vrot.slane %v6055_v43, 1  ;;  %v1905_v8 = vrot.slane %v6059_v20, 1 }
 0x1bf   :  { %9168 = vst [vmem:[#allocation12_spill] sm:$0xff] %v6194_v39  ;;  %9169 = vst [vmem:[#allocation63_spill] sm:$0xff] %v6197_v15  ;;  %v1907_v21 = vrot.slane %v6061_v55, 1  ;;  %v1908_v2 = vrot.slane %v6063_v50, 1  ;;  %v6244_v22 = vsel %vm112_vm0, 0.0, %v1844_v12  ;;  %v6247_v3 = vsel %vm112_vm0, 0.0, %v1847_v4 }
 0x1c0   :  { %9170 = vst [vmem:[#allocation13_spill] sm:$0xff] %v6200_v30  ;;  %9171 = vst [vmem:[#allocation20_spill] sm:$0xff] %v6203_v7  ;;  %v1901_v30 = vrot.slane %v6053_v42, 1  ;;  %v1911_v42 = vrot.slane %v6067_v13, 1  ;;  %v6252_v43 = vsel %vm209_vm1, %v1898_v1, %v1899_v14  ;;  %v1913_v55 = vrot.slane %v6069_v60, 1 }
 0x1c1   :  { %9172 = vst [vmem:[#allocation64_spill] sm:$0xff] %v6206_v41  ;;  %9173 = vst [vmem:[#allocation28_spill] sm:$0xff] %v6209_v19  ;;  %v1914_v50 = vrot.slane %v6071_v24, 1  ;;  %v6260_v12 = vsel %vm209_vm1, %v1904_v18, %v1905_v8  ;;  %v1916_v4 = vrot.slane %v6073_v31, 1  ;;  %v1919_v48 = vrot.slane %v6077_v46, 1 }
 0x1c2   :  { %9174 = vst [vmem:[#allocation65_spill] sm:$0xff] %v6212_v25  ;;  %9175 = vst [vmem:[#allocation44_spill] sm:$0xff] %v6215_v57  ;;  %v6255_v29 = vsel %vm209_vm1, %v1901_v30, %v1902_v62  ;;  %v6266_v13 = vsel %vm209_vm1, %v1907_v21, %v1908_v2  ;;  %v1920_v1 = vrot.slane %v6079_v63, 1  ;;  %v1922_v30 = vrot.slane %v6081_v27, 1 }
 0x1c3   :  { %9176 = vst [vmem:[#allocation66_spill] sm:$0xff] %v6218_v45  ;;  %9177 = vst [vmem:[#allocation45_spill] sm:$0xff] %v6221_v11  ;;  %v1925_v18 = vrot.slane %v6085_v0, 1  ;;  %v6282_v21 = vsel %vm209_vm1, %v1913_v55, %v1914_v50  ;;  %v1935_v0 = vrot.slane %v6099_v54, 1  ;;  %v1943_v54 = vrot.slane %v6117_v16, 1 }
 0x1c4   :  { %9178 = vst [vmem:[#allocation67_spill] sm:$0xff] %v6224_v58  ;;  %9179 = vst [vmem:[#allocation48_spill] sm:$0xff] %v6227_v28  ;;  %v6387_v16 = vstv %s6289_s21 }
 0x1c5   :  { %9180 = vst [vmem:[#allocation108_spill] sm:$0xff] %v6230_v33  ;;  %9181 = vst [vmem:[#allocation50_spill] sm:$0xff] %v6233_v35 }
 0x1c6   :  { %9182 = vst [vmem:[#allocation39_spill] sm:$0xff] %v6244_v22  ;;  %9183 = vst [vmem:[#allocation51_spill] sm:$0xff] %v6247_v3  ;;  %v1917_v3 = vrot.slane %v6075_v38, 1  ;;  %v1928_v38 = vrot.slane %v6089_v10, 1  ;;  %v1932_v10 = vrot.slane %v6095_v40, 1 }
 0x1c7   :  { %9184 = vst [vmem:[#allocation94_spill] sm:$0xff] %v6252_v43  ;;  %9185 = vst [vmem:[#allocation109_spill] sm:$0xff] %v6255_v29  ;;  %v1923_v29 = vrot.slane %v6083_v37, 1  ;;  %v6272_v43 = vsel %vm209_vm1, %v1910_v51, %v1911_v42  ;;  %v1929_v37 = vrot.slane %v6091_v26, 1  ;;  %v1931_v51 = vrot.slane %v6093_v6, 1 }
 0x1c8   :  { %9186 = vst [vmem:[#allocation75_spill] sm:$0xff] %v6260_v12  ;;  %9187 = vst [vmem:[#allocation38_spill] sm:$0xff] %v6266_v13  ;;  %v1926_v12 = vrot.slane %v6087_v32, 1  ;;  %v6285_v13 = vsel %vm209_vm1, %v1916_v4, %v1917_v3  ;;  %v1934_v32 = vrot.slane %v6097_v49, 1  ;;  %v1937_v4 = vrot.slane %v6101_v34, 1  ;;  %v9244_v34 = vld [vmem:[#allocation32_spill] sm:$0xff] }
 0x1c9   :  { %9188 = vst [vmem:[#allocation34_spill] sm:$0xff] %v6272_v43  ;;  %9189 = vst [vmem:[#allocation100_spill] sm:$0xff] %v6282_v21  ;;  %v6292_v43 = vsel %vm209_vm1, %v1919_v48, %v1920_v1  ;;  %v6300_v55 = vsel %vm209_vm1, %v1922_v30, %v1923_v29  ;;  %v1940_v21 = vrot.slane %v6105_v36, 1  ;;  %v1941_v49 = vrot.slane %v6107_v61, 1  ;;  %v9242_v61 = vld [vmem:[#allocation42_spill] sm:$0xff] }
 0x1ca   :  { %9190 = vst [vmem:[#allocation35_spill] sm:$0xff] %v6285_v13  ;;  %9191 = vst [vmem:[#allocation85_spill] sm:$0xff] %v6292_v43  ;;  %v1938_v13 = vrot.slane %v6103_v44, 1  ;;  %v6306_v48 = vsel %vm209_vm1, %v1925_v18, %v1926_v12  ;;  %v6309_v43 = vsel %vm209_vm1, %v1928_v38, %v1929_v37  ;;  %v6314_v40 = vsel %vm209_vm1, %v1931_v51, %v1932_v10  ;;  %v9243_v44 = vld [vmem:[#allocation43_spill] sm:$0xff] }
 0x1cb   :  { %9192 = vst [vmem:[#allocation36_spill] sm:$0xff] %v6300_v55  ;;  %9193 = vst [vmem:[#allocation86_spill] sm:$0xff] %v6306_v48  ;;  %v6317_v30 = vsel %vm209_vm1, %v1934_v32, %v1935_v0  ;;  %v1944_v36 = vrot.slane %v6119_v9, 1  ;;  %v6324_v18 = vsel %vm209_vm1, %v1940_v21, %v1941_v49  ;;  %v6327_v38 = vsel %vm209_vm1, %v1899_v14, 0.0  ;;  %v9226_v48 = vld [vmem:[#allocation114_spill] sm:$0xff] }
 0x1cc   :  { %9194 = vst [vmem:[#allocation79_spill] sm:$0xff] %v6309_v43  ;;  %9195 = vst [vmem:[#allocation102_spill] sm:$0xff] %v6314_v40  ;;  %v6320_v55 = vsel %vm209_vm1, %v1937_v4, %v1938_v13  ;;  %v6330_v43 = vsel %vm209_vm1, %v1902_v62, 0.0  ;;  %v6333_v51 = vsel %vm209_vm1, %v1905_v8, 0.0  ;;  %v6339_v4 = vsel %vm209_vm1, %v1908_v2, 0.0  ;;  %v9223_v40 = vld [vmem:[#allocation110_spill] sm:$0xff] }
 0x1cd   :  { %9196 = vst [vmem:[#allocation15_spill] sm:$0xff] %v6317_v30  ;;  %9197 = vst [vmem:[#allocation87_spill] sm:$0xff] %v6320_v55  ;;  %v6336_v32 = vsel %vm209_vm1, %v1943_v54, %v1944_v36  ;;  %v6342_v21 = vsel %vm209_vm1, %v1911_v42, 0.0  ;;  %v6345_v14 = vsel %vm209_vm1, %v1914_v50, 0.0  ;;  %v6348_v62 = vsel %vm209_vm1, %v1917_v3, 0.0  ;;  %v9220_v55 = vld [vmem:[#allocation78_spill] sm:$0xff] }
 0x1ce   :  { %9198 = vst [vmem:[#allocation95_spill] sm:$0xff] %v6324_v18  ;;  %9199 = vst [vmem:[#allocation103_spill] sm:$0xff] %v6327_v38  ;;  %v6351_v8 = vsel %vm209_vm1, %v1920_v1, 0.0  ;;  %v6354_v54 = vsel %vm209_vm1, %v1923_v29, 0.0  ;;  %v6357_v2 = vsel %vm209_vm1, %v1926_v12, 0.0  ;;  %v6360_v42 = vsel %vm209_vm1, %v1929_v37, 0.0 }
 0x1cf   :  { %9200 = vst [vmem:[#allocation80_spill] sm:$0xff] %v6330_v43  ;;  %9201 = vst [vmem:[#allocation88_spill] sm:$0xff] %v6333_v51  ;;  %v6366_v50 = vsel %vm209_vm1, %v1935_v0, 0.0  ;;  %v6369_v3 = vsel %vm209_vm1, %v1938_v13, 0.0  ;;  %v6372_v1 = vsel %vm209_vm1, %v1941_v49, 0.0  ;;  %v6375_v29 = vsel %vm209_vm1, %v1944_v36, 0.0 }
 0x1d0   :  { %9202 = vst [vmem:[#allocation96_spill] sm:$0xff] %v6336_v32  ;;  %9203 = vst [vmem:[#allocation104_spill] sm:$0xff] %v6339_v4  ;;  %v6363_v32 = vsel %vm209_vm1, %v1932_v10, 0.0  ;;  %v1994_v12 = vstv %s6277_s1  ;;  %v6379_v9 = vstv %s6279_s2  ;;  %v6390_v0 = vstv %s6297_s22  ;;  %v9221_v30 = vld [vmem:[#allocation92_spill] sm:$0xff]  ;;  %v9235_v4 = vld [vmem:[#allocation22_spill] sm:$0xff] }
 0x1d1   :  { %9204 = vst [vmem:[#allocation81_spill] sm:$0xff] %v6342_v21  ;;  %9205 = vst [vmem:[#allocation89_spill] sm:$0xff] %v6345_v14  ;;  %v6381_v37 = vmul.f32 0.0, %v1994_v12  ;;  %v6384_v10 = vmul.f32 %v1994_v12, %v6191_v5  ;;  %v1997_v13 = vmul.f32 %v1994_v12, %v6124_v59  ;;  %v1998_v49 = vmul.f32 %v1994_v12, %v6194_v39  ;;  %v9232_v14 = vld [vmem:[#allocation19_spill] sm:$0xff]  ;;  %v9236_v51 = vld [vmem:[#allocation72_spill] sm:$0xff] }
 0x1d2   :  { %9206 = vst [vmem:[#allocation97_spill] sm:$0xff] %v6348_v62  ;;  %9207 = vst [vmem:[#allocation105_spill] sm:$0xff] %v6351_v8  ;;  %v2000_v36 = vmul.f32 %v1994_v12, %v6197_v15  ;;  %v2002_v18 = vmul.f32 %v1994_v12, %v6203_v7  ;;  %v2004_v5 = vmul.f32 %v1994_v12, %v6206_v41  ;;  %v9228_v8 = vld [vmem:[#allocation10_spill] sm:$0xff]  ;;  %v9234_v21 = vld [vmem:[#allocation55_spill] sm:$0xff] }
 0x1d3   :  { %9208 = vst [vmem:[#allocation82_spill] sm:$0xff] %v6354_v54  ;;  %9209 = vst [vmem:[#allocation90_spill] sm:$0xff] %v6357_v2  ;;  %v2007_v59 = vmul.f32 %v1994_v12, %v9221_v30  ;;  %v2008_v39 = vmul.f32 %v1994_v12, %v6212_v25  ;;  %v2010_v15 = vmul.f32 %v1994_v12, %v6215_v57  ;;  %v9225_v2 = vld [vmem:[#allocation113_spill] sm:$0xff]  ;;  %v9230_v62 = vld [vmem:[#allocation18_spill] sm:$0xff] }
 0x1d4   :  { %9210 = vst [vmem:[#allocation98_spill] sm:$0xff] %v6360_v42  ;;  %9211 = vst [vmem:[#allocation106_spill] sm:$0xff] %v6363_v32  ;;  %v9222_v32 = vld [vmem:[#allocation41_spill] sm:$0xff]  ;;  %v2012_v7 = vmul.f32 %v1994_v12, %v6218_v45  ;;  %v9224_v42 = vld [vmem:[#allocation111_spill] sm:$0xff]  ;;  %v2014_v41 = vmul.f32 %v1994_v12, %v6221_v11  ;;  %v2017_v30 = vmul.f32 %v1994_v12, %v9225_v2 }
 0x1d5   :  { %9212 = vst [vmem:[#allocation83_spill] sm:$0xff] %v6366_v50  ;;  %9213 = vst [vmem:[#allocation91_spill] sm:$0xff] %v6369_v3  ;;  %v2003_v3 = vmul.f32 %v1994_v12, %v6138_v52  ;;  %v2005_v50 = vmul.f32 %v1994_v12, %v9220_v55  ;;  %v2013_v52 = vmul.f32 %v1994_v12, %v9224_v42  ;;  %v9227_v54 = vld [vmem:[#allocation9_spill] sm:$0xff]  ;;  %v9238_v38 = vld [vmem:[#allocation74_spill] sm:$0xff] }
 0x1d6   :  { %9214 = vst [vmem:[#allocation99_spill] sm:$0xff] %v6372_v1  ;;  %9215 = vst [vmem:[#allocation107_spill] sm:$0xff] %v6375_v29  ;;  %v1999_v1 = vmul.f32 %v1994_v12, %v6127_v56  ;;  %v2001_v29 = vmul.f32 %v1994_v12, %v6132_v23  ;;  %v2009_v56 = vmul.f32 %v1994_v12, %v9222_v32  ;;  %v9237_v43 = vld [vmem:[#allocation73_spill] sm:$0xff] }
 0x1d7   :  { %9216 = vst [vmem:[#allocation101_spill] sm:$0xff] %v6381_v37  ;;  %9217 = vst [vmem:[#allocation93_spill] sm:$0xff] %v6384_v10  ;;  %v2011_v23 = vmul.f32 %v1994_v12, %v9223_v40  ;;  %v2015_v55 = vmul.f32 %v1994_v12, %v6170_v17  ;;  %v2018_v25 = vmul.f32 %v1994_v12, %v6227_v28  ;;  %v9229_v28 = vld [vmem:[#allocation70_spill] sm:$0xff]  ;;  %v9241_v37 = vld [vmem:[#allocation31_spill] sm:$0xff] }
 0x1d8   :  { %9218 = vst [vmem:[#allocation59_spill] sm:$0xff] %v6387_v16  ;;  %9219 = vst [vmem:[#allocation49_spill] sm:$0xff] %v6390_v0  ;;  %v2006_v0 = vmul.f32 %v1994_v12, %v6209_v19  ;;  %v2016_v19 = vmul.f32 %v1994_v12, %v6224_v58  ;;  %v2019_v32 = vmul.f32 %v1994_v12, %v6178_v47  ;;  %v2027_v58 = vmul.f32 0.0, %v6379_v9  ;;  %v9239_v16 = vld [vmem:[#allocation27_spill] sm:$0xff]  ;;  %v9240_v10 = vld [vmem:[#allocation58_spill] sm:$0xff] }
 0x1d9   :  { %v2020_v57 = vmul.f32 %v1994_v12, %v6230_v33  ;;  %v2021_v40 = vmul.f32 %v1994_v12, %v9226_v48  ;;  %v2022_v45 = vmul.f32 %v1994_v12, %v6233_v35  ;;  %v2023_v42 = vmul.f32 %v1994_v12, %v9227_v54  ;;  %v9231_v48 = vld [vmem:[#allocation54_spill] sm:$0xff] }
 0x1da   :  { %v2024_v11 = vmul.f32 %v1994_v12, %v6244_v22  ;;  %v2025_v17 = vmul.f32 %v1994_v12, %v9228_v8  ;;  %v2028_v2 = vmul.f32 %v6379_v9, %v6049_v53  ;;  %v2029_v47 = vmul.f32 %v6379_v9, %v9229_v28  ;;  %v9233_v8 = vld [vmem:[#allocation21_spill] sm:$0xff] }
 0x1db   :  { %v2030_v33 = vmul.f32 %v6379_v9, %v9230_v62  ;;  %v2031_v35 = vmul.f32 %v6379_v9, %v9231_v48  ;;  %v2032_v54 = vmul.f32 %v6379_v9, %v9232_v14  ;;  %v2033_v12 = vmul.f32 %v6379_v9, %v6059_v20 }
 0x1dc   :  { %v2034_v22 = vmul.f32 %v6379_v9, %v9233_v8  ;;  %v2035_v53 = vmul.f32 %v6379_v9, %v9234_v21  ;;  %v2036_v28 = vmul.f32 %v6379_v9, %v9235_v4  ;;  %v2037_v62 = vmul.f32 %v6379_v9, %v9236_v51 }
 0x1dd   :  { %v2038_v48 = vmul.f32 %v6379_v9, %v6069_v60  ;;  %v2039_v14 = vmul.f32 %v6379_v9, %v6071_v24  ;;  %v2040_v20 = vmul.f32 %v6379_v9, %v6073_v31  ;;  %v2041_v8 = vmul.f32 %v6379_v9, %v9237_v43 }
 0x1de   :  { %v2042_v21 = vmul.f32 %v6379_v9, %v6077_v46  ;;  %v2043_v4 = vmul.f32 %v6379_v9, %v6079_v63  ;;  %v2044_v51 = vmul.f32 %v6379_v9, %v6081_v27  ;;  %v2045_v60 = vmul.f32 %v6379_v9, %v9238_v38 }
 0x1df   :  { %v2046_v24 = vmul.f32 %v6379_v9, %v9239_v16  ;;  %v2047_v31 = vmul.f32 %v6379_v9, %v9240_v10  ;;  %v2048_v43 = vmul.f32 %v6379_v9, %v9241_v37  ;;  %v2049_v46 = vmul.f32 %v6379_v9, %v6091_v26  ;;  %v9245_v10 = vld [vmem:[#allocation84_spill] sm:$0xff]  ;;  %v9246_v26 = vld [vmem:[#allocation46_spill] sm:$0xff] }
 0x1e0   :  { %v2050_v63 = vmul.f32 %v6379_v9, %v6093_v6  ;;  %v2051_v27 = vmul.f32 %v6379_v9, %v9242_v61  ;;  %v2052_v38 = vmul.f32 %v6379_v9, %v9243_v44  ;;  %v2053_v16 = vmul.f32 %v6379_v9, %v9244_v34  ;;  %v9247_v61 = vld [vmem:[#allocation47_spill] sm:$0xff]  ;;  %v9248_v34 = vld [vmem:[#allocation61_spill] sm:$0xff] }
 0x1e1   :  { %v2054_v37 = vmul.f32 %v6379_v9, %v9245_v10  ;;  %v2055_v6 = vmul.f32 %v6379_v9, %v9246_v26  ;;  %v2056_v44 = vmul.f32 %v6379_v9, %v9247_v61  ;;  %v2057_v10 = vmul.f32 %v6379_v9, %v9248_v34  ;;  %v9249_v26 = vld [vmem:[#allocation101_spill] sm:$0xff] }
 0x1e2   :  { %v2058_v61 = vadd.f32 %v2027_v58, %v9249_v26  ;;  %v9250_v9 = vld [vmem:[#allocation93_spill] sm:$0xff]  ;;  %v2060_v26 = vadd.f32 %v2029_v47, %v1997_v13  ;;  %v2061_v58 = vadd.f32 %v2030_v33, %v1998_v49  ;;  %v2064_v13 = vadd.f32 %v2033_v12, %v2001_v29 }
 0x1e3   :  { %v2059_v34 = vadd.f32 %v2028_v2, %v9250_v9  ;;  %v2062_v2 = vadd.f32 %v2031_v35, %v1999_v1  ;;  %v2063_v9 = vadd.f32 %v2032_v54, %v2000_v36  ;;  %v2065_v47 = vadd.f32 %v2034_v22, %v2002_v18 }
 0x1e4   :  { %v2066_v33 = vadd.f32 %v2035_v53, %v2003_v3  ;;  %v2067_v49 = vadd.f32 %v2036_v28, %v2004_v5  ;;  %v2068_v1 = vadd.f32 %v2037_v62, %v2005_v50  ;;  %v2069_v35 = vadd.f32 %v2038_v48, %v2006_v0 }
 0x1e5   :  { %v2070_v36 = vadd.f32 %v2039_v14, %v2007_v59  ;;  %v2071_v54 = vadd.f32 %v2040_v20, %v2008_v39  ;;  %v2072_v12 = vadd.f32 %v2041_v8, %v2009_v56  ;;  %v2073_v29 = vadd.f32 %v2042_v21, %v2010_v15  ;;  %v9251_v56 = vld [vmem:[#allocation59_spill] sm:$0xff]  ;;  %v9252_v21 = vld [vmem:[#allocation94_spill] sm:$0xff] }
 0x1e6   :  { %v2074_v18 = vadd.f32 %v2043_v4, %v2011_v23  ;;  %v2075_v22 = vadd.f32 %v2044_v51, %v2012_v7  ;;  %v2076_v3 = vadd.f32 %v2045_v60, %v2013_v52  ;;  %v2077_v53 = vadd.f32 %v2046_v24, %v2014_v41  ;;  %v9253_v23 = vld [vmem:[#allocation103_spill] sm:$0xff]  ;;  %v9254_v24 = vld [vmem:[#allocation109_spill] sm:$0xff]  ;;  %v9259_v52 = vld [vmem:[#allocation104_spill] sm:$0xff] }
 0x1e7   :  { %v2078_v5 = vadd.f32 %v2047_v31, %v2015_v55  ;;  %v2079_v28 = vadd.f32 %v2048_v43, %v2016_v19  ;;  %v2080_v50 = vadd.f32 %v2049_v46, %v2017_v30  ;;  %v2081_v62 = vadd.f32 %v2050_v63, %v2018_v25  ;;  %v9255_v31 = vld [vmem:[#allocation80_spill] sm:$0xff]  ;;  %v9256_v63 = vld [vmem:[#allocation75_spill] sm:$0xff]  ;;  %v9261_v19 = vld [vmem:[#allocation81_spill] sm:$0xff] }
 0x1e8   :  { %v2082_v0 = vadd.f32 %v2051_v27, %v2019_v32  ;;  %v2083_v48 = vadd.f32 %v2052_v38, %v2020_v57  ;;  %v2084_v14 = vadd.f32 %v2053_v16, %v2021_v40  ;;  %v2085_v59 = vadd.f32 %v2054_v37, %v2022_v45  ;;  %v9262_v57 = vld [vmem:[#allocation100_spill] sm:$0xff]  ;;  %v9264_v30 = vld [vmem:[#allocation35_spill] sm:$0xff]  ;;  %v9265_v51 = vld [vmem:[#allocation97_spill] sm:$0xff] }
 0x1e9   :  { %v2086_v20 = vadd.f32 %v2055_v6, %v2023_v42  ;;  %v2087_v39 = vadd.f32 %v2056_v44, %v2024_v11  ;;  %v2088_v8 = vadd.f32 %v2057_v10, %v2025_v17  ;;  %v2090_v15 = vmul.f32 0.0, %v9251_v56  ;;  %v9257_v6 = vld [vmem:[#allocation88_spill] sm:$0xff]  ;;  %v9258_v44 = vld [vmem:[#allocation38_spill] sm:$0xff]  ;;  %v9263_v11 = vld [vmem:[#allocation89_spill] sm:$0xff] }
 0x1ea   :  { %v2091_v4 = vmul.f32 %v9251_v56, %v9252_v21  ;;  %v2092_v60 = vmul.f32 %v9251_v56, %v9253_v23  ;;  %v2093_v43 = vmul.f32 %v9251_v56, %v9254_v24  ;;  %v2094_v46 = vmul.f32 %v9251_v56, %v9255_v31  ;;  %v9260_v17 = vld [vmem:[#allocation34_spill] sm:$0xff]  ;;  %v9266_v42 = vld [vmem:[#allocation85_spill] sm:$0xff]  ;;  %v9272_v31 = vld [vmem:[#allocation79_spill] sm:$0xff] }
 0x1eb   :  { %v2095_v27 = vmul.f32 %v9251_v56, %v9256_v63  ;;  %v2096_v40 = vmul.f32 %v9251_v56, %v9257_v6  ;;  %v2097_v16 = vmul.f32 %v9251_v56, %v9258_v44  ;;  %v2098_v41 = vmul.f32 %v9251_v56, %v9259_v52  ;;  %v9267_v10 = vld [vmem:[#allocation105_spill] sm:$0xff]  ;;  %v9268_v52 = vld [vmem:[#allocation36_spill] sm:$0xff]  ;;  %v9269_v44 = vld [vmem:[#allocation82_spill] sm:$0xff] }
 0x1ec   :  { %v2099_v7 = vmul.f32 %v9251_v56, %v9260_v17  ;;  %v2100_v25 = vmul.f32 %v9251_v56, %v9261_v19  ;;  %v2101_v45 = vmul.f32 %v9251_v56, %v9262_v57  ;;  %v2102_v55 = vmul.f32 %v9251_v56, %v9263_v11  ;;  %v9270_v6 = vld [vmem:[#allocation86_spill] sm:$0xff] }
 0x1ed   :  { %v2103_v38 = vmul.f32 %v9251_v56, %v9264_v30  ;;  %v2104_v32 = vmul.f32 %v9251_v56, %v9265_v51  ;;  %v2105_v37 = vmul.f32 %v9251_v56, %v9266_v42  ;;  %v2106_v17 = vmul.f32 %v9251_v56, %v9267_v10  ;;  %v9271_v63 = vld [vmem:[#allocation90_spill] sm:$0xff] }
 0x1ee   :  { %v2107_v19 = vmul.f32 %v9251_v56, %v9268_v52  ;;  %v2108_v57 = vmul.f32 %v9251_v56, %v9269_v44  ;;  %v2109_v11 = vmul.f32 %v9251_v56, %v9270_v6  ;;  %v2110_v30 = vmul.f32 %v9251_v56, %v9271_v63  ;;  %v9273_v24 = vld [vmem:[#allocation98_spill] sm:$0xff]  ;;  %v9276_v44 = vld [vmem:[#allocation15_spill] sm:$0xff] }
 0x1ef   :  { %v2111_v51 = vmul.f32 %v9251_v56, %v9272_v31  ;;  %v2112_v42 = vmul.f32 %v9251_v56, %v9273_v24  ;;  %v9274_v23 = vld [vmem:[#allocation102_spill] sm:$0xff]  ;;  %v2115_v6 = vmul.f32 %v9251_v56, %v9276_v44  ;;  %v9277_v63 = vld [vmem:[#allocation83_spill] sm:$0xff] }
 0x1f0   :  { %v2113_v10 = vmul.f32 %v9251_v56, %v9274_v23  ;;  %v9275_v21 = vld [vmem:[#allocation106_spill] sm:$0xff]  ;;  %v2116_v31 = vmul.f32 %v9251_v56, %v9277_v63  ;;  %v9278_v24 = vld [vmem:[#allocation87_spill] sm:$0xff] }
 0x1f1   :  { %v2114_v52 = vmul.f32 %v9251_v56, %v9275_v21  ;;  %v2117_v23 = vmul.f32 %v9251_v56, %v9278_v24  ;;  %v9279_v21 = vld [vmem:[#allocation91_spill] sm:$0xff] }
 0x1f2   :  { %v2118_v44 = vmul.f32 %v9251_v56, %v9279_v21  ;;  %v9280_v63 = vld [vmem:[#allocation95_spill] sm:$0xff] }
 0x1f3   :  { %v2119_v24 = vmul.f32 %v9251_v56, %v9280_v63  ;;  %v9281_v21 = vld [vmem:[#allocation99_spill] sm:$0xff] }
 0x1f4   :  { %v2120_v63 = vmul.f32 %v9251_v56, %v9281_v21  ;;  %v6545_v21 = vadd.f32 %v2090_v15, %v2058_v61  ;;  %v6547_v56 = vadd.f32 %v2091_v4, %v2059_v34  ;;  %v6549_v15 = vadd.f32 %v2092_v60, %v2060_v26 }
 0x1f5   :  { %v6551_v61 = vadd.f32 %v2093_v43, %v2061_v58  ;;  %v6555_v4 = vadd.f32 %v2095_v27, %v2063_v9  ;;  %v6557_v34 = vadd.f32 %v2096_v40, %v2064_v13  ;;  %v6561_v26 = vadd.f32 %v2098_v41, %v2066_v33  ;;  %v9295_v27 = vld [vmem:[#allocation33_spill] sm:$0xff]  ;;  %v9302_v40 = vld [vmem:[#allocation64_spill] sm:$0xff] }
 0x1f6   :  { %9282 = vst [vmem:[#allocation68_spill] sm:$0xff] %v6545_v21  ;;  %9283 = vst [vmem:[#allocation76_spill] sm:$0xff] %v6547_v56  ;;  %v6553_v21 = vadd.f32 %v2094_v46, %v2062_v2  ;;  %v6559_v56 = vadd.f32 %v2097_v16, %v2065_v47  ;;  %v6563_v60 = vadd.f32 %v2099_v7, %v2067_v49  ;;  %v9294_v46 = vld [vmem:[#allocation49_spill] sm:$0xff]  ;;  %v9303_v16 = vld [vmem:[#allocation78_spill] sm:$0xff] }
 0x1f7   :  { %9284 = vst [vmem:[#allocation52_spill] sm:$0xff] %v6549_v15  ;;  %9285 = vst [vmem:[#allocation77_spill] sm:$0xff] %v6551_v61  ;;  %v6565_v15 = vadd.f32 %v2100_v25, %v2068_v1  ;;  %v6567_v43 = vadd.f32 %v2101_v45, %v2069_v35  ;;  %v6569_v58 = vadd.f32 %v2102_v55, %v2070_v36  ;;  %v9304_v41 = vld [vmem:[#allocation28_spill] sm:$0xff]  ;;  %v9306_v25 = vld [vmem:[#allocation65_spill] sm:$0xff] }
 0x1f8   :  { %v6571_v61 = vadd.f32 %v2103_v38, %v2071_v54  ;;  %v6573_v2 = vadd.f32 %v2104_v32, %v2072_v12  ;;  %v6575_v9 = vadd.f32 %v2105_v37, %v2073_v29  ;;  %v6577_v13 = vadd.f32 %v2106_v17, %v2074_v18  ;;  %v9305_v7 = vld [vmem:[#allocation92_spill] sm:$0xff]  ;;  %v9307_v45 = vld [vmem:[#allocation41_spill] sm:$0xff]  ;;  %v9309_v38 = vld [vmem:[#allocation110_spill] sm:$0xff] }
 0x1f9   :  { %v6579_v47 = vadd.f32 %v2107_v19, %v2075_v22  ;;  %v6581_v33 = vadd.f32 %v2108_v57, %v2076_v3  ;;  %v6583_v49 = vadd.f32 %v2109_v11, %v2077_v53  ;;  %v6585_v1 = vadd.f32 %v2110_v30, %v2078_v5  ;;  %v9308_v55 = vld [vmem:[#allocation44_spill] sm:$0xff]  ;;  %v9310_v32 = vld [vmem:[#allocation66_spill] sm:$0xff]  ;;  %v9311_v37 = vld [vmem:[#allocation111_spill] sm:$0xff] }
 0x1fa   :  { %v6587_v35 = vadd.f32 %v2111_v51, %v2079_v28  ;;  %v6589_v36 = vadd.f32 %v2112_v42, %v2080_v50  ;;  %v6591_v54 = vadd.f32 %v2113_v10, %v2081_v62  ;;  %v6593_v12 = vadd.f32 %v2114_v52, %v2082_v0  ;;  %v9293_v28 = vld [vmem:[#allocation11_spill] sm:$0xff]  ;;  %v9296_v0 = vld [vmem:[#allocation12_spill] sm:$0xff] }
 0x1fb   :  { %v6595_v29 = vadd.f32 %v2115_v6, %v2083_v48  ;;  %v6597_v18 = vadd.f32 %v2116_v31, %v2084_v14  ;;  %v6599_v22 = vadd.f32 %v2117_v23, %v2085_v59  ;;  %v6601_v3 = vadd.f32 %v2118_v44, %v2086_v20  ;;  %v9297_v6 = vld [vmem:[#allocation29_spill] sm:$0xff]  ;;  %v9298_v59 = vld [vmem:[#allocation63_spill] sm:$0xff]  ;;  %v9301_v31 = vld [vmem:[#allocation30_spill] sm:$0xff] }
 0x1fc   :  { %9286 = vst [vmem:[#allocation69_spill] sm:$0xff] %v6593_v12  ;;  %v6603_v53 = vadd.f32 %v2119_v24, %v2087_v39  ;;  %v6605_v5 = vadd.f32 %v2120_v63, %v2088_v8  ;;  %v2153_v50 = vmul.f32 %v9294_v46, %v9293_v28  ;;  %v2154_v62 = vmul.f32 %v9294_v46, %v9295_v27  ;;  %v9299_v23 = vld [vmem:[#allocation37_spill] sm:$0xff]  ;;  %v9300_v8 = vld [vmem:[#allocation20_spill] sm:$0xff] }
 0x1fd   :  { %9287 = vst [vmem:[#allocation62_spill] sm:$0xff] %v6595_v29  ;;  %9288 = vst [vmem:[#allocation53_spill] sm:$0xff] %v6597_v18  ;;  %v2155_v48 = vmul.f32 %v9294_v46, %v9296_v0  ;;  %v2156_v14 = vmul.f32 %v9294_v46, %v9297_v6  ;;  %v2157_v20 = vmul.f32 %v9294_v46, %v9298_v59  ;;  %v9312_v28 = vld [vmem:[#allocation45_spill] sm:$0xff]  ;;  %v9320_v59 = vld [vmem:[#allocation50_spill] sm:$0xff] }
 0x1fe   :  { %9289 = vst [vmem:[#allocation101_spill] sm:$0xff] %v6599_v22  ;;  %9290 = vst [vmem:[#allocation93_spill] sm:$0xff] %v6601_v3  ;;  %v2158_v39 = vmul.f32 %v9294_v46, %v9299_v23  ;;  %v2159_v24 = vmul.f32 %v9294_v46, %v9300_v8  ;;  %v2160_v63 = vmul.f32 %v9294_v46, %v9301_v31  ;;  %v9317_v31 = vld [vmem:[#allocation8_spill] sm:$0xff]  ;;  %v9319_v23 = vld [vmem:[#allocation114_spill] sm:$0xff] }
 0x1ff   :  { %9291 = vst [vmem:[#allocation59_spill] sm:$0xff] %v6603_v53  ;;  %9292 = vst [vmem:[#allocation115_spill] sm:$0xff] %v6605_v5  ;;  %v2161_v44 = vmul.f32 %v9294_v46, %v9302_v40  ;;  %v2162_v52 = vmul.f32 %v9294_v46, %v9303_v16  ;;  %v2163_v17 = vmul.f32 %v9294_v46, %v9304_v41  ;;  %v9314_v41 = vld [vmem:[#allocation67_spill] sm:$0xff]  ;;  %v9315_v16 = vld [vmem:[#allocation113_spill] sm:$0xff] }
 0x200   :  { %v2164_v19 = vmul.f32 %v9294_v46, %v9305_v7  ;;  %v2165_v57 = vmul.f32 %v9294_v46, %v9306_v25  ;;  %v2166_v11 = vmul.f32 %v9294_v46, %v9307_v45  ;;  %v2167_v30 = vmul.f32 %v9294_v46, %v9308_v55  ;;  %v9313_v7 = vld [vmem:[#allocation112_spill] sm:$0xff]  ;;  %v9322_v6 = vld [vmem:[#allocation39_spill] sm:$0xff]  ;;  %v9323_v0 = vld [vmem:[#allocation10_spill] sm:$0xff] }
 0x201   :  { %v2168_v51 = vmul.f32 %v9294_v46, %v9309_v38  ;;  %v2169_v42 = vmul.f32 %v9294_v46, %v9310_v32  ;;  %v2170_v10 = vmul.f32 %v9294_v46, %v9311_v37  ;;  %v2171_v27 = vmul.f32 %v9294_v46, %v9312_v28  ;;  %v9316_v40 = vld [vmem:[#allocation48_spill] sm:$0xff]  ;;  %v9324_v5 = vld [vmem:[#allocation51_spill] sm:$0xff]  ;;  %v9325_v53 = vld [vmem:[#allocation13_spill] sm:$0xff] }
 0x202   :  { %v2172_v25 = vmul.f32 %v9294_v46, %v9313_v7  ;;  %v2173_v45 = vmul.f32 %v9294_v46, %v9314_v41  ;;  %v2174_v55 = vmul.f32 %v9294_v46, %v9315_v16  ;;  %v2175_v38 = vmul.f32 %v9294_v46, %v9316_v40  ;;  %v9318_v8 = vld [vmem:[#allocation108_spill] sm:$0xff]  ;;  %v9321_v41 = vld [vmem:[#allocation9_spill] sm:$0xff] }
 0x203   :  { %v2176_v32 = vmul.f32 %v9294_v46, %v9317_v31  ;;  %v2177_v37 = vmul.f32 %v9294_v46, %v9318_v8  ;;  %v2178_v28 = vmul.f32 %v9294_v46, %v9319_v23  ;;  %v2179_v7 = vmul.f32 %v9294_v46, %v9320_v59  ;;  %v9326_v3 = vld [vmem:[#allocation68_spill] sm:$0xff]  ;;  %v9329_v12 = vld [vmem:[#allocation77_spill] sm:$0xff] }
 0x204   :  { %v2180_v16 = vmul.f32 %v9294_v46, %v9321_v41  ;;  %v2181_v40 = vmul.f32 %v9294_v46, %v9322_v6  ;;  %v2182_v31 = vmul.f32 %v9294_v46, %v9323_v0  ;;  %v2183_v8 = vmul.f32 %v9294_v46, %v9324_v5  ;;  %v9327_v18 = vld [vmem:[#allocation76_spill] sm:$0xff] }
 0x205   :  { %v2184_v23 = vmul.f32 %v9294_v46, %v9325_v53  ;;  %v6674_v22 = vadd.f32 %v2153_v50, %v9326_v3  ;;  %v6677_v59 = vadd.f32 %v2154_v62, %v9326_v3  ;;  %v6680_v41 = vadd.f32 %v2155_v48, %v9327_v18  ;;  %v9328_v29 = vld [vmem:[#allocation52_spill] sm:$0xff]  ;;  %v9366_v53 = vld [vmem:[#allocation31_spill] sm:$0xff] }
 0x206   :  { %v6683_v6 = vadd.f32 %v2156_v14, %v9328_v29  ;;  %v6686_v0 = vadd.f32 %v2157_v20, %v9329_v12  ;;  %v6689_v5 = vadd.f32 %v2158_v39, %v6553_v21  ;;  %v6692_v46 = vadd.f32 %v2159_v24, %v6555_v4  ;;  %v9342_v24 = vld [vmem:[#allocation59_spill] sm:$0xff] }
 0x207   :  { %v6695_v50 = vadd.f32 %v2160_v63, %v6557_v34  ;;  %v6698_v3 = vadd.f32 %v2161_v44, %v6559_v56  ;;  %v6701_v18 = vadd.f32 %v2162_v52, %v6561_v26  ;;  %v6704_v29 = vadd.f32 %v2163_v17, %v6563_v60  ;;  %v9346_v52 = vld [vmem:[#allocation17_spill] sm:$0xff] }
 0x208   :  { %v6707_v12 = vadd.f32 %v2164_v19, %v6565_v15  ;;  %v6710_v21 = vadd.f32 %v2165_v57, %v6567_v43  ;;  %v6713_v4 = vadd.f32 %v2166_v11, %v6569_v58  ;;  %v6716_v34 = vadd.f32 %v2167_v30, %v6571_v61  ;;  %v9349_v57 = vld [vmem:[#allocation54_spill] sm:$0xff]  ;;  %v9352_v30 = vld [vmem:[#allocation21_spill] sm:$0xff] }
 0x209   :  { %v6719_v56 = vadd.f32 %v2168_v51, %v6573_v2  ;;  %v6722_v26 = vadd.f32 %v2169_v42, %v6575_v9  ;;  %v6725_v60 = vadd.f32 %v2170_v10, %v6577_v13  ;;  %v6728_v15 = vadd.f32 %v2171_v27, %v6579_v47  ;;  %v9332_v47 = vld [vmem:[#allocation69_spill] sm:$0xff]  ;;  %v9353_v51 = vld [vmem:[#allocation55_spill] sm:$0xff]  ;;  %v9357_v27 = vld [vmem:[#allocation56_spill] sm:$0xff] }
 0x20a   :  { %v6731_v43 = vadd.f32 %v2172_v25, %v6581_v33  ;;  %v6734_v58 = vadd.f32 %v2173_v45, %v6583_v49  ;;  %v6737_v61 = vadd.f32 %v2174_v55, %v6585_v1  ;;  %v6740_v2 = vadd.f32 %v2175_v38, %v6587_v35  ;;  %v9334_v33 = vld [vmem:[#allocation62_spill] sm:$0xff]  ;;  %v9336_v49 = vld [vmem:[#allocation53_spill] sm:$0xff]  ;;  %v9351_v55 = vld [vmem:[#allocation71_spill] sm:$0xff] }
 0x20b   :  { %v6743_v9 = vadd.f32 %v2176_v32, %v6589_v36  ;;  %v6746_v13 = vadd.f32 %v2177_v37, %v6591_v54  ;;  %v6749_v62 = vadd.f32 %v2178_v28, %v9332_v47  ;;  %v6752_v48 = vadd.f32 %v2179_v7, %v9334_v33  ;;  %v9338_v1 = vld [vmem:[#allocation101_spill] sm:$0xff]  ;;  %v9344_v54 = vld [vmem:[#allocation115_spill] sm:$0xff]  ;;  %v9347_v7 = vld [vmem:[#allocation70_spill] sm:$0xff] }
 0x20c   :  { %v6755_v14 = vadd.f32 %v2180_v16, %v9336_v49  ;;  %v6758_v20 = vadd.f32 %v2181_v40, %v9338_v1  ;;  %v9340_v35 = vld [vmem:[#allocation93_spill] sm:$0xff]  ;;  %v2217_v36 = vstv %s6661_s23  ;;  %v6765_v63 = vadd.f32 %v2183_v8, %v9342_v24  ;;  %v9348_v25 = vld [vmem:[#allocation18_spill] sm:$0xff]  ;;  %v9350_v40 = vld [vmem:[#allocation19_spill] sm:$0xff] }
 0x20d   :  { %9330 = vst [vmem:[#allocation11_spill] sm:$0xff] %v6743_v9  ;;  %9331 = vst [vmem:[#allocation49_spill] sm:$0xff] %v6746_v13  ;;  %v6761_v39 = vadd.f32 %v2182_v31, %v9340_v35  ;;  %v6768_v44 = vadd.f32 %v2184_v23, %v9344_v54  ;;  %v2218_v17 = vmul.f32 %v2217_v36, %v9346_v52  ;;  %v9354_v32 = vld [vmem:[#allocation22_spill] sm:$0xff]  ;;  %v9355_v23 = vld [vmem:[#allocation72_spill] sm:$0xff] }
 0x20e   :  { %9333 = vst [vmem:[#allocation33_spill] sm:$0xff] %v6749_v62  ;;  %9335 = vst [vmem:[#allocation68_spill] sm:$0xff] %v6752_v48  ;;  %v2219_v19 = vmul.f32 %v2217_v36, %v9347_v7  ;;  %v2220_v16 = vmul.f32 %v2217_v36, %v9348_v25  ;;  %v2221_v45 = vmul.f32 %v2217_v36, %v9349_v57  ;;  %v9356_v10 = vld [vmem:[#allocation23_spill] sm:$0xff]  ;;  %v9358_v33 = vld [vmem:[#allocation25_spill] sm:$0xff] }
 0x20f   :  { %9337 = vst [vmem:[#allocation76_spill] sm:$0xff] %v6755_v14  ;;  %9339 = vst [vmem:[#allocation52_spill] sm:$0xff] %v6758_v20  ;;  %v2222_v11 = vmul.f32 %v2217_v36, %v9350_v40  ;;  %v2223_v31 = vmul.f32 %v2217_v36, %v9351_v55  ;;  %v2224_v38 = vmul.f32 %v2217_v36, %v9352_v30  ;;  %v9359_v1 = vld [vmem:[#allocation73_spill] sm:$0xff]  ;;  %v9360_v24 = vld [vmem:[#allocation14_spill] sm:$0xff] }
 0x210   :  { %9341 = vst [vmem:[#allocation77_spill] sm:$0xff] %v6761_v39  ;;  %9343 = vst [vmem:[#allocation69_spill] sm:$0xff] %v6765_v63  ;;  %v2225_v8 = vmul.f32 %v2217_v36, %v9353_v51  ;;  %v2226_v42 = vmul.f32 %v2217_v36, %v9354_v32  ;;  %v2227_v37 = vmul.f32 %v2217_v36, %v9355_v23  ;;  %v9361_v52 = vld [vmem:[#allocation57_spill] sm:$0xff]  ;;  %v9362_v55 = vld [vmem:[#allocation26_spill] sm:$0xff] }
 0x211   :  { %9345 = vst [vmem:[#allocation62_spill] sm:$0xff] %v6768_v44  ;;  %v2228_v28 = vmul.f32 %v2217_v36, %v9356_v10  ;;  %v2229_v47 = vmul.f32 %v2217_v36, %v9357_v27  ;;  %v2230_v49 = vmul.f32 %v2217_v36, %v9358_v33  ;;  %v2231_v35 = vmul.f32 %v2217_v36, %v9359_v1  ;;  %v9363_v40 = vld [vmem:[#allocation74_spill] sm:$0xff]  ;;  %v9364_v57 = vld [vmem:[#allocation27_spill] sm:$0xff]  ;;  %v9367_v44 = vld [vmem:[#allocation60_spill] sm:$0xff] }
 0x212   :  { %v2232_v54 = vmul.f32 %v2217_v36, %v9360_v24  ;;  %v2233_v7 = vmul.f32 %v2217_v36, %v9361_v52  ;;  %v2234_v30 = vmul.f32 %v2217_v36, %v9362_v55  ;;  %v2235_v51 = vmul.f32 %v2217_v36, %v9363_v40  ;;  %v9365_v25 = vld [vmem:[#allocation58_spill] sm:$0xff]  ;;  %v9368_v63 = vld [vmem:[#allocation40_spill] sm:$0xff]  ;;  %v9370_v20 = vld [vmem:[#allocation43_spill] sm:$0xff] }
 0x213   :  { %v2236_v32 = vmul.f32 %v2217_v36, %v9364_v57  ;;  %v2237_v23 = vmul.f32 %v2217_v36, %v9365_v25  ;;  %v2238_v10 = vmul.f32 %v2217_v36, %v9366_v53  ;;  %v2239_v27 = vmul.f32 %v2217_v36, %v9367_v44  ;;  %v9369_v39 = vld [vmem:[#allocation42_spill] sm:$0xff]  ;;  %v9371_v14 = vld [vmem:[#allocation32_spill] sm:$0xff]  ;;  %v9374_v13 = vld [vmem:[#allocation47_spill] sm:$0xff] }
 0x214   :  { %v2240_v33 = vmul.f32 %v2217_v36, %v9368_v63  ;;  %v2241_v1 = vmul.f32 %v2217_v36, %v9369_v39  ;;  %v2242_v24 = vmul.f32 %v2217_v36, %v9370_v20  ;;  %v2243_v52 = vmul.f32 %v2217_v36, %v9371_v14  ;;  %v9372_v48 = vld [vmem:[#allocation84_spill] sm:$0xff]  ;;  %v9373_v62 = vld [vmem:[#allocation46_spill] sm:$0xff]  ;;  %v9375_v9 = vld [vmem:[#allocation61_spill] sm:$0xff] }
 0x215   :  { %v2244_v55 = vmul.f32 %v2217_v36, %v9372_v48  ;;  %v2245_v40 = vmul.f32 %v2217_v36, %v9373_v62  ;;  %v2246_v57 = vmul.f32 %v2217_v36, %v9374_v13  ;;  %v2247_v25 = vmul.f32 %v2217_v36, %v9375_v9  ;;  %v9376_v44 = vld [vmem:[#allocation16_spill] sm:$0xff]  ;;  %v9418_v62 = vld [vmem:[#allocation82_spill] sm:$0xff] }
 0x216   :  { %v2248_v63 = vmul.f32 %v2217_v36, %v9376_v44  ;;  %v9377_v53 = vld [vmem:[#allocation24_spill] sm:$0xff]  ;;  %v6807_v20 = vadd.f32 %v2218_v17, %v6674_v22  ;;  %v6810_v14 = vadd.f32 %v2219_v19, %v6677_v59  ;;  %v6817_v9 = vadd.f32 %v2220_v16, %v6680_v41  ;;  %v9382_v19 = vld [vmem:[#allocation49_spill] sm:$0xff]  ;;  %v9419_v48 = vld [vmem:[#allocation86_spill] sm:$0xff] }
 0x217   :  { %v2249_v39 = vmul.f32 %v2217_v36, %v9377_v53  ;;  %v6820_v13 = vadd.f32 %v2221_v45, %v6683_v6  ;;  %v6823_v44 = vadd.f32 %v2222_v11, %v6686_v0  ;;  %v6826_v36 = vadd.f32 %v2223_v31, %v6689_v5  ;;  %v9384_v16 = vld [vmem:[#allocation33_spill] sm:$0xff]  ;;  %v9386_v45 = vld [vmem:[#allocation68_spill] sm:$0xff] }
 0x218   :  { %v6829_v22 = vadd.f32 %v2224_v38, %v6692_v46  ;;  %v6832_v59 = vadd.f32 %v2225_v8, %v6695_v50  ;;  %v6835_v17 = vadd.f32 %v2226_v42, %v6698_v3  ;;  %v6838_v41 = vadd.f32 %v2227_v37, %v6701_v18  ;;  %v9388_v11 = vld [vmem:[#allocation76_spill] sm:$0xff] }
 0x219   :  { %v6841_v6 = vadd.f32 %v2228_v28, %v6704_v29  ;;  %v6844_v0 = vadd.f32 %v2229_v47, %v6707_v12  ;;  %v6847_v5 = vadd.f32 %v2230_v49, %v6710_v21  ;;  %v6850_v46 = vadd.f32 %v2231_v35, %v6713_v4  ;;  %v9400_v28 = vld [vmem:[#allocation103_spill] sm:$0xff]  ;;  %v9403_v47 = vld [vmem:[#allocation109_spill] sm:$0xff]  ;;  %v9406_v35 = vld [vmem:[#allocation88_spill] sm:$0xff] }
 0x21a   :  { %v6853_v50 = vadd.f32 %v2232_v54, %v6716_v34  ;;  %v6856_v3 = vadd.f32 %v2233_v7, %v6719_v56  ;;  %v6859_v18 = vadd.f32 %v2234_v30, %v6722_v26  ;;  %v6862_v29 = vadd.f32 %v2235_v51, %v6725_v60  ;;  %v9380_v26 = vld [vmem:[#allocation11_spill] sm:$0xff]  ;;  %v9394_v51 = vld [vmem:[#allocation69_spill] sm:$0xff]  ;;  %v9417_v53 = vld [vmem:[#allocation36_spill] sm:$0xff] }
 0x21b   :  { %v6865_v12 = vadd.f32 %v2236_v32, %v6728_v15  ;;  %v6868_v21 = vadd.f32 %v2237_v23, %v6731_v43  ;;  %v6871_v4 = vadd.f32 %v2238_v10, %v6734_v58  ;;  %v6874_v34 = vadd.f32 %v2239_v27, %v6737_v61  ;;  %v9390_v61 = vld [vmem:[#allocation52_spill] sm:$0xff]  ;;  %v9396_v32 = vld [vmem:[#allocation62_spill] sm:$0xff] }
 0x21c   :  { %v6877_v56 = vadd.f32 %v2240_v33, %v6740_v2  ;;  %v6880_v60 = vadd.f32 %v2241_v1, %v9380_v26  ;;  %v6883_v15 = vadd.f32 %v2242_v24, %v9382_v19  ;;  %v6886_v43 = vadd.f32 %v2243_v52, %v9384_v16  ;;  %v9392_v2 = vld [vmem:[#allocation77_spill] sm:$0xff]  ;;  %v9404_v33 = vld [vmem:[#allocation80_spill] sm:$0xff]  ;;  %v9407_v24 = vld [vmem:[#allocation38_spill] sm:$0xff] }
 0x21d   :  { %9378 = vst [vmem:[#allocation53_spill] sm:$0xff] %v6874_v34  ;;  %v6889_v58 = vadd.f32 %v2244_v55, %v9386_v45  ;;  %v6892_v31 = vadd.f32 %v2245_v40, %v9388_v11  ;;  %v6895_v30 = vadd.f32 %v2246_v57, %v9390_v61  ;;  %v6898_v38 = vadd.f32 %v2247_v25, %v9392_v2  ;;  %v9399_v55 = vld [vmem:[#allocation94_spill] sm:$0xff]  ;;  %v9408_v52 = vld [vmem:[#allocation104_spill] sm:$0xff]  ;;  %v9410_v16 = vld [vmem:[#allocation81_spill] sm:$0xff] }
 0x21e   :  { %9379 = vst [vmem:[#allocation101_spill] sm:$0xff] %v6877_v56  ;;  %9381 = vst [vmem:[#allocation93_spill] sm:$0xff] %v6880_v60  ;;  %v6901_v8 = vadd.f32 %v2248_v63, %v9394_v51  ;;  %v6904_v42 = vadd.f32 %v2249_v39, %v9396_v32  ;;  %v2282_v23 = vstv %s6800_s24  ;;  %v6908_v37 = vstv %s6802_s25  ;;  %v9405_v63 = vld [vmem:[#allocation75_spill] sm:$0xff]  ;;  %v9409_v26 = vld [vmem:[#allocation34_spill] sm:$0xff] }
 0x21f   :  { %9383 = vst [vmem:[#allocation59_spill] sm:$0xff] %v6883_v15  ;;  %9385 = vst [vmem:[#allocation115_spill] sm:$0xff] %v6886_v43  ;;  %v2283_v10 = vmul.f32 %v2282_v23, %v9399_v55  ;;  %v2284_v40 = vmul.f32 %v2282_v23, %v9400_v28  ;;  %v6913_v27 = vstv %s6812_s26  ;;  %v6916_v57 = vstv %s6814_s27  ;;  %v9411_v11 = vld [vmem:[#allocation100_spill] sm:$0xff]  ;;  %v9412_v2 = vld [vmem:[#allocation89_spill] sm:$0xff] }
 0x220   :  { %9387 = vst [vmem:[#allocation17_spill] sm:$0xff] %v6889_v58  ;;  %9389 = vst [vmem:[#allocation70_spill] sm:$0xff] %v6892_v31  ;;  %v2285_v25 = vmul.f32 %v2282_v23, %v9403_v47  ;;  %v2286_v49 = vmul.f32 %v2282_v23, %v9404_v33  ;;  %v2287_v1 = vmul.f32 %v2282_v23, %v9405_v63  ;;  %v9413_v32 = vld [vmem:[#allocation35_spill] sm:$0xff]  ;;  %v9414_v28 = vld [vmem:[#allocation97_spill] sm:$0xff] }
 0x221   :  { %9391 = vst [vmem:[#allocation11_spill] sm:$0xff] %v6895_v30  ;;  %9393 = vst [vmem:[#allocation49_spill] sm:$0xff] %v6898_v38  ;;  %v2288_v39 = vmul.f32 %v2282_v23, %v9406_v35  ;;  %v2289_v54 = vmul.f32 %v2282_v23, %v9407_v24  ;;  %v2290_v7 = vmul.f32 %v2282_v23, %v9408_v52  ;;  %v9416_v47 = vld [vmem:[#allocation105_spill] sm:$0xff]  ;;  %v9424_v38 = vld [vmem:[#allocation106_spill] sm:$0xff] }
 0x222   :  { %9395 = vst [vmem:[#allocation33_spill] sm:$0xff] %v6901_v8  ;;  %9397 = vst [vmem:[#allocation68_spill] sm:$0xff] %v6904_v42  ;;  %v2291_v19 = vmul.f32 %v2282_v23, %v9409_v26  ;;  %v2292_v45 = vmul.f32 %v2282_v23, %v9410_v16  ;;  %v2293_v61 = vmul.f32 %v2282_v23, %v9411_v11  ;;  %v9422_v42 = vld [vmem:[#allocation98_spill] sm:$0xff]  ;;  %v9425_v30 = vld [vmem:[#allocation15_spill] sm:$0xff] }
 0x223   :  { %9398 = vst [vmem:[#allocation76_spill] sm:$0xff] %v6908_v37  ;;  %9401 = vst [vmem:[#allocation52_spill] sm:$0xff] %v6913_v27  ;;  %v2294_v51 = vmul.f32 %v2282_v23, %v9412_v2  ;;  %v2295_v55 = vmul.f32 %v2282_v23, %v9413_v32  ;;  %v2296_v33 = vmul.f32 %v2282_v23, %v9414_v28  ;;  %v9420_v27 = vld [vmem:[#allocation90_spill] sm:$0xff]  ;;  %v9421_v37 = vld [vmem:[#allocation79_spill] sm:$0xff] }
 0x224   :  { %9402 = vst [vmem:[#allocation77_spill] sm:$0xff] %v6916_v57  ;;  %v9415_v57 = vld [vmem:[#allocation85_spill] sm:$0xff]  ;;  %v2298_v35 = vmul.f32 %v2282_v23, %v9416_v47  ;;  %v2299_v24 = vmul.f32 %v2282_v23, %v9417_v53  ;;  %v2300_v52 = vmul.f32 %v2282_v23, %v9418_v62  ;;  %v2301_v26 = vmul.f32 %v2282_v23, %v9419_v48  ;;  %v9423_v8 = vld [vmem:[#allocation102_spill] sm:$0xff]  ;;  %v9426_v31 = vld [vmem:[#allocation83_spill] sm:$0xff] }
 0x225   :  { %v2297_v63 = vmul.f32 %v2282_v23, %v9415_v57  ;;  %v2302_v16 = vmul.f32 %v2282_v23, %v9420_v27  ;;  %v2303_v11 = vmul.f32 %v2282_v23, %v9421_v37  ;;  %v2304_v2 = vmul.f32 %v2282_v23, %v9422_v42  ;;  %v9427_v58 = vld [vmem:[#allocation87_spill] sm:$0xff]  ;;  %v9431_v56 = vld [vmem:[#allocation96_spill] sm:$0xff] }
 0x226   :  { %v2305_v32 = vmul.f32 %v2282_v23, %v9423_v8  ;;  %v2306_v28 = vmul.f32 %v2282_v23, %v9424_v38  ;;  %v2307_v57 = vmul.f32 %v2282_v23, %v9425_v30  ;;  %v2308_v47 = vmul.f32 %v2282_v23, %v9426_v31  ;;  %v9428_v43 = vld [vmem:[#allocation91_spill] sm:$0xff]  ;;  %v9475_v30 = vld [vmem:[#allocation114_spill] sm:$0xff] }
 0x227   :  { %v2309_v53 = vmul.f32 %v2282_v23, %v9427_v58  ;;  %v2310_v62 = vmul.f32 %v2282_v23, %v9428_v43  ;;  %v9429_v15 = vld [vmem:[#allocation95_spill] sm:$0xff]  ;;  %v2313_v37 = vmul.f32 %v2282_v23, %v9431_v56  ;;  %v6949_v8 = vadd.f32 %v2283_v10, %v6807_v20  ;;  %v9473_v56 = vld [vmem:[#allocation8_spill] sm:$0xff] }
 0x228   :  { %v2311_v48 = vmul.f32 %v2282_v23, %v9429_v15  ;;  %v9430_v60 = vld [vmem:[#allocation99_spill] sm:$0xff]  ;;  %v6952_v38 = vadd.f32 %v2284_v40, %v6810_v14  ;;  %v6955_v31 = vadd.f32 %v2285_v25, %v6817_v9  ;;  %v6958_v58 = vadd.f32 %v2286_v49, %v6820_v13  ;;  %v9474_v43 = vld [vmem:[#allocation108_spill] sm:$0xff] }
 0x229   :  { %v2312_v27 = vmul.f32 %v2282_v23, %v9430_v60  ;;  %v9432_v34 = vld [vmem:[#allocation107_spill] sm:$0xff]  ;;  %v6961_v15 = vadd.f32 %v2287_v1, %v6823_v44  ;;  %v6964_v60 = vadd.f32 %v2288_v39, %v6826_v36  ;;  %v6970_v20 = vadd.f32 %v2290_v7, %v6832_v59 }
 0x22a   :  { %v2314_v42 = vmul.f32 %v2282_v23, %v9432_v34  ;;  %v6967_v23 = vadd.f32 %v2289_v54, %v6829_v22  ;;  %v6973_v14 = vadd.f32 %v2291_v19, %v6835_v17  ;;  %v6976_v9 = vadd.f32 %v2292_v45, %v6838_v41  ;;  %v9452_v19 = vld [vmem:[#allocation76_spill] sm:$0xff] }
 0x22b   :  { %v6979_v13 = vadd.f32 %v2293_v61, %v6841_v6  ;;  %v6982_v44 = vadd.f32 %v2294_v51, %v6844_v0  ;;  %v6985_v36 = vadd.f32 %v2295_v55, %v6847_v5  ;;  %v6988_v22 = vadd.f32 %v2296_v33, %v6850_v46  ;;  %v9459_v55 = vld [vmem:[#allocation78_spill] sm:$0xff]  ;;  %v9472_v34 = vld [vmem:[#allocation48_spill] sm:$0xff] }
 0x22c   :  { %v6991_v59 = vadd.f32 %v2297_v63, %v6853_v50  ;;  %v6994_v17 = vadd.f32 %v2298_v35, %v6856_v3  ;;  %v6997_v41 = vadd.f32 %v2299_v24, %v6859_v18  ;;  %v7000_v6 = vadd.f32 %v2300_v52, %v6862_v29  ;;  %v9433_v50 = vld [vmem:[#allocation53_spill] sm:$0xff]  ;;  %v9436_v29 = vld [vmem:[#allocation59_spill] sm:$0xff] }
 0x22d   :  { %v7003_v0 = vadd.f32 %v2301_v26, %v6865_v12  ;;  %v7006_v5 = vadd.f32 %v2302_v16, %v6868_v21  ;;  %v7009_v46 = vadd.f32 %v2303_v11, %v6871_v4  ;;  %v7012_v10 = vadd.f32 %v2304_v2, %v9433_v50  ;;  %v9434_v3 = vld [vmem:[#allocation101_spill] sm:$0xff]  ;;  %v9437_v12 = vld [vmem:[#allocation115_spill] sm:$0xff]  ;;  %v9441_v4 = vld [vmem:[#allocation70_spill] sm:$0xff] }
 0x22e   :  { %v7015_v40 = vadd.f32 %v2305_v32, %v9434_v3  ;;  %v9435_v18 = vld [vmem:[#allocation93_spill] sm:$0xff]  ;;  %v7021_v33 = vadd.f32 %v2307_v57, %v9436_v29  ;;  %v7024_v49 = vadd.f32 %v2308_v47, %v9437_v12  ;;  %v7030_v1 = vadd.f32 %v2310_v62, %v9441_v4  ;;  %v9443_v35 = vld [vmem:[#allocation11_spill] sm:$0xff]  ;;  %v9449_v57 = vld [vmem:[#allocation68_spill] sm:$0xff] }
 0x22f   :  { %v7018_v25 = vadd.f32 %v2306_v28, %v9435_v18  ;;  %v9439_v21 = vld [vmem:[#allocation17_spill] sm:$0xff]  ;;  %v7033_v39 = vadd.f32 %v2311_v48, %v9443_v35  ;;  %v7042_v26 = vadd.f32 %v2314_v42, %v9449_v57  ;;  %v9451_v47 = vld [vmem:[#allocation12_spill] sm:$0xff]  ;;  %v9454_v62 = vld [vmem:[#allocation63_spill] sm:$0xff]  ;;  %v2355_v28 = vmul.f32 %v9452_v19, %v9459_v55 }
 0x230   :  { %9438 = vst [vmem:[#allocation69_spill] sm:$0xff] %v7024_v49  ;;  %v7027_v63 = vadd.f32 %v2309_v53, %v9439_v21  ;;  %9442 = vst [vmem:[#allocation94_spill] sm:$0xff] %v7030_v1  ;;  %v9445_v24 = vld [vmem:[#allocation49_spill] sm:$0xff]  ;;  %v2348_v16 = vmul.f32 %v9452_v19, %v9451_v47  ;;  %v2350_v11 = vmul.f32 %v9452_v19, %v9454_v62  ;;  %v9458_v42 = vld [vmem:[#allocation64_spill] sm:$0xff] }
 0x231   :  { %9444 = vst [vmem:[#allocation103_spill] sm:$0xff] %v7033_v39  ;;  %v7036_v54 = vadd.f32 %v2312_v27, %v9445_v24  ;;  %v9447_v52 = vld [vmem:[#allocation33_spill] sm:$0xff]  ;;  %9450 = vst [vmem:[#allocation93_spill] sm:$0xff] %v7042_v26  ;;  %v9456_v27 = vld [vmem:[#allocation20_spill] sm:$0xff]  ;;  %v2354_v32 = vmul.f32 %v9452_v19, %v9458_v42 }
 0x232   :  { %9440 = vst [vmem:[#allocation62_spill] sm:$0xff] %v7027_v63  ;;  %v7039_v7 = vadd.f32 %v2313_v37, %v9447_v52  ;;  %v9453_v53 = vld [vmem:[#allocation29_spill] sm:$0xff]  ;;  %v2352_v2 = vmul.f32 %v9452_v19, %v9456_v27  ;;  %v9457_v37 = vld [vmem:[#allocation30_spill] sm:$0xff]  ;;  %v9460_v50 = vld [vmem:[#allocation28_spill] sm:$0xff]  ;;  %v7106_v49 = vadd.f32 %v2348_v16, %v6949_v8  ;;  %v7127_v8 = vadd.f32 %v2355_v28, %v6970_v20 }
 0x233   :  { %9446 = vst [vmem:[#allocation53_spill] sm:$0xff] %v7036_v54  ;;  %v2349_v45 = vmul.f32 %v9452_v19, %v9453_v53  ;;  %v9455_v48 = vld [vmem:[#allocation37_spill] sm:$0xff]  ;;  %v2353_v51 = vmul.f32 %v9452_v19, %v9457_v37  ;;  %v2356_v3 = vmul.f32 %v9452_v19, %v9460_v50  ;;  %v9461_v18 = vld [vmem:[#allocation92_spill] sm:$0xff]  ;;  %v9465_v57 = vld [vmem:[#allocation110_spill] sm:$0xff] }
 0x234   :  { %9448 = vst [vmem:[#allocation101_spill] sm:$0xff] %v7039_v7  ;;  %v2351_v61 = vmul.f32 %v9452_v19, %v9455_v48  ;;  %v2357_v29 = vmul.f32 %v9452_v19, %v9461_v18  ;;  %v9462_v12 = vld [vmem:[#allocation65_spill] sm:$0xff]  ;;  %v9464_v24 = vld [vmem:[#allocation44_spill] sm:$0xff]  ;;  %v2361_v47 = vmul.f32 %v9452_v19, %v9465_v57  ;;  %v9466_v53 = vld [vmem:[#allocation66_spill] sm:$0xff]  ;;  %v2368_v57 = vmul.f32 %v9452_v19, %v9472_v34 }
 0x235   :  { %v2358_v21 = vmul.f32 %v9452_v19, %v9462_v12  ;;  %v9463_v4 = vld [vmem:[#allocation41_spill] sm:$0xff]  ;;  %v2360_v52 = vmul.f32 %v9452_v19, %v9464_v24  ;;  %v2362_v62 = vmul.f32 %v9452_v19, %v9466_v53  ;;  %v9467_v48 = vld [vmem:[#allocation111_spill] sm:$0xff]  ;;  %v9469_v55 = vld [vmem:[#allocation112_spill] sm:$0xff]  ;;  %v2369_v53 = vmul.f32 %v9452_v19, %v9473_v56 }
 0x236   :  { %v2359_v35 = vmul.f32 %v9452_v19, %v9463_v4  ;;  %v2363_v27 = vmul.f32 %v9452_v19, %v9467_v48  ;;  %v9468_v37 = vld [vmem:[#allocation45_spill] sm:$0xff]  ;;  %v2365_v50 = vmul.f32 %v9452_v19, %v9469_v55  ;;  %v9470_v18 = vld [vmem:[#allocation67_spill] sm:$0xff]  ;;  %v2370_v48 = vmul.f32 %v9452_v19, %v9474_v43  ;;  %v9476_v26 = vld [vmem:[#allocation50_spill] sm:$0xff] }
 0x237   :  { %v2364_v42 = vmul.f32 %v9452_v19, %v9468_v37  ;;  %v2366_v12 = vmul.f32 %v9452_v19, %v9470_v18  ;;  %v9471_v4 = vld [vmem:[#allocation113_spill] sm:$0xff]  ;;  %v2371_v37 = vmul.f32 %v9452_v19, %v9475_v30  ;;  %v2372_v55 = vmul.f32 %v9452_v19, %v9476_v26  ;;  %v9478_v54 = vld [vmem:[#allocation39_spill] sm:$0xff]  ;;  %v9479_v39 = vld [vmem:[#allocation10_spill] sm:$0xff] }
 0x238   :  { %v2367_v24 = vmul.f32 %v9452_v19, %v9471_v4  ;;  %v9477_v7 = vld [vmem:[#allocation9_spill] sm:$0xff]  ;;  %v2374_v4 = vmul.f32 %v9452_v19, %v9478_v54  ;;  %v2375_v34 = vmul.f32 %v9452_v19, %v9479_v39  ;;  %v9480_v1 = vld [vmem:[#allocation51_spill] sm:$0xff]  ;;  %v2378_v30 = vmul.f32 0.0, %v9452_v19  ;;  %v9497_v28 = vld [vmem:[#allocation52_spill] sm:$0xff] }
 0x239   :  { %v2373_v18 = vmul.f32 %v9452_v19, %v9477_v7  ;;  %v2376_v56 = vmul.f32 %v9452_v19, %v9480_v1  ;;  %v9481_v63 = vld [vmem:[#allocation13_spill] sm:$0xff]  ;;  %v7109_v26 = vadd.f32 %v2349_v45, %v6952_v38  ;;  %v7112_v7 = vadd.f32 %v2350_v11, %v6955_v31 }
 0x23a   :  { %v2377_v43 = vmul.f32 %v9452_v19, %v9481_v63  ;;  %v7115_v54 = vadd.f32 %v2351_v61, %v6958_v58  ;;  %v7118_v39 = vadd.f32 %v2352_v2, %v6961_v15  ;;  %v7121_v1 = vadd.f32 %v2353_v51, %v6964_v60 }
 0x23b   :  { %v7124_v63 = vadd.f32 %v2354_v32, %v6967_v23  ;;  %v7130_v38 = vadd.f32 %v2356_v3, %v6973_v14  ;;  %v7133_v31 = vadd.f32 %v2357_v29, %v6976_v9  ;;  %v7136_v58 = vadd.f32 %v2358_v21, %v6979_v13  ;;  %v9496_v32 = vld [vmem:[#allocation18_spill] sm:$0xff] }
 0x23c   :  { %v7139_v15 = vadd.f32 %v2359_v35, %v6982_v44  ;;  %v7142_v60 = vadd.f32 %v2360_v52, %v6985_v36  ;;  %v7145_v23 = vadd.f32 %v2361_v47, %v6988_v22  ;;  %v7148_v20 = vadd.f32 %v2362_v62, %v6991_v59  ;;  %v9498_v29 = vld [vmem:[#allocation54_spill] sm:$0xff]  ;;  %v9499_v35 = vld [vmem:[#allocation19_spill] sm:$0xff] }
 0x23d   :  { %v7151_v14 = vadd.f32 %v2363_v27, %v6994_v17  ;;  %v7154_v9 = vadd.f32 %v2364_v42, %v6997_v41  ;;  %v7157_v13 = vadd.f32 %v2365_v50, %v7000_v6  ;;  %v7160_v44 = vadd.f32 %v2366_v12, %v7003_v0  ;;  %v9482_v0 = vld [vmem:[#allocation69_spill] sm:$0xff]  ;;  %v9500_v47 = vld [vmem:[#allocation71_spill] sm:$0xff] }
 0x23e   :  { %v7163_v36 = vadd.f32 %v2367_v24, %v7006_v5  ;;  %v7166_v22 = vadd.f32 %v2368_v57, %v7009_v46  ;;  %v7169_v59 = vadd.f32 %v2369_v53, %v7012_v10  ;;  %v7172_v17 = vadd.f32 %v2370_v48, %v7015_v40  ;;  %v9484_v5 = vld [vmem:[#allocation62_spill] sm:$0xff]  ;;  %v9488_v10 = vld [vmem:[#allocation103_spill] sm:$0xff]  ;;  %v9490_v40 = vld [vmem:[#allocation53_spill] sm:$0xff] }
 0x23f   :  { %v7175_v41 = vadd.f32 %v2371_v37, %v7018_v25  ;;  %v7178_v6 = vadd.f32 %v2372_v55, %v7021_v33  ;;  %v7181_v19 = vadd.f32 %v2373_v18, %v9482_v0  ;;  %v7184_v16 = vadd.f32 %v2374_v4, %v9484_v5  ;;  %v9486_v46 = vld [vmem:[#allocation94_spill] sm:$0xff]  ;;  %v9492_v25 = vld [vmem:[#allocation101_spill] sm:$0xff]  ;;  %v9502_v50 = vld [vmem:[#allocation55_spill] sm:$0xff] }
 0x240   :  { %v7187_v45 = vadd.f32 %v2375_v34, %v9486_v46  ;;  %v7190_v11 = vadd.f32 %v2376_v56, %v9488_v10  ;;  %v7193_v61 = vadd.f32 %v2377_v43, %v9490_v40  ;;  %v7196_v2 = vadd.f32 %v2378_v30, %v9492_v25  ;;  %v9494_v33 = vld [vmem:[#allocation93_spill] sm:$0xff]  ;;  %v9503_v24 = vld [vmem:[#allocation22_spill] sm:$0xff]  ;;  %v9504_v53 = vld [vmem:[#allocation72_spill] sm:$0xff] }
 0x241   :  { %9483 = vst [vmem:[#allocation59_spill] sm:$0xff] %v7181_v19  ;;  %9485 = vst [vmem:[#allocation115_spill] sm:$0xff] %v7184_v16  ;;  %v7199_v51 = vadd.f32 %v2378_v30, %v9494_v33  ;;  %v2412_v3 = vmul.f32 %v9497_v28, %v9496_v32  ;;  %v2413_v21 = vmul.f32 %v9497_v28, %v9498_v29  ;;  %v9501_v27 = vld [vmem:[#allocation21_spill] sm:$0xff]  ;;  %v9505_v37 = vld [vmem:[#allocation23_spill] sm:$0xff] }
 0x242   :  { %9487 = vst [vmem:[#allocation17_spill] sm:$0xff] %v7187_v45  ;;  %9489 = vst [vmem:[#allocation70_spill] sm:$0xff] %v7190_v11  ;;  %v2414_v52 = vmul.f32 %v9497_v28, %v9499_v35  ;;  %v2415_v62 = vmul.f32 %v9497_v28, %v9500_v47  ;;  %v2416_v42 = vmul.f32 %v9497_v28, %v9501_v27  ;;  %v9506_v18 = vld [vmem:[#allocation56_spill] sm:$0xff]  ;;  %v9507_v34 = vld [vmem:[#allocation25_spill] sm:$0xff] }
 0x243   :  { %9491 = vst [vmem:[#allocation11_spill] sm:$0xff] %v7193_v61  ;;  %9493 = vst [vmem:[#allocation49_spill] sm:$0xff] %v7196_v2  ;;  %v2417_v12 = vmul.f32 %v9497_v28, %v9502_v50  ;;  %v2418_v57 = vmul.f32 %v9497_v28, %v9503_v24  ;;  %v2419_v48 = vmul.f32 %v9497_v28, %v9504_v53  ;;  %v9508_v43 = vld [vmem:[#allocation73_spill] sm:$0xff]  ;;  %v9509_v0 = vld [vmem:[#allocation14_spill] sm:$0xff] }
 0x244   :  { %9495 = vst [vmem:[#allocation33_spill] sm:$0xff] %v7199_v51  ;;  %v2420_v55 = vmul.f32 %v9497_v28, %v9505_v37  ;;  %v2421_v4 = vmul.f32 %v9497_v28, %v9506_v18  ;;  %v2422_v56 = vmul.f32 %v9497_v28, %v9507_v34  ;;  %v2423_v30 = vmul.f32 %v9497_v28, %v9508_v43  ;;  %v9510_v46 = vld [vmem:[#allocation57_spill] sm:$0xff]  ;;  %v9511_v40 = vld [vmem:[#allocation26_spill] sm:$0xff]  ;;  %v9513_v29 = vld [vmem:[#allocation27_spill] sm:$0xff] }
 0x245   :  { %v2424_v5 = vmul.f32 %v9497_v28, %v9509_v0  ;;  %v2425_v10 = vmul.f32 %v9497_v28, %v9510_v46  ;;  %v2426_v25 = vmul.f32 %v9497_v28, %v9511_v40  ;;  %v9512_v33 = vld [vmem:[#allocation74_spill] sm:$0xff]  ;;  %v2428_v35 = vmul.f32 %v9497_v28, %v9513_v29  ;;  %v9515_v50 = vld [vmem:[#allocation31_spill] sm:$0xff]  ;;  %v9516_v53 = vld [vmem:[#allocation60_spill] sm:$0xff] }
 0x246   :  { %v2427_v32 = vmul.f32 %v9497_v28, %v9512_v33  ;;  %v9514_v47 = vld [vmem:[#allocation58_spill] sm:$0xff]  ;;  %v2430_v24 = vmul.f32 %v9497_v28, %v9515_v50  ;;  %v2431_v37 = vmul.f32 %v9497_v28, %v9516_v53  ;;  %v9517_v18 = vld [vmem:[#allocation40_spill] sm:$0xff]  ;;  %v9519_v46 = vld [vmem:[#allocation43_spill] sm:$0xff]  ;;  %v7263_v19 = vadd.f32 %v2412_v3, %v7106_v49 }
 0x247   :  { %v2429_v27 = vmul.f32 %v9497_v28, %v9514_v47  ;;  %v2432_v34 = vmul.f32 %v9497_v28, %v9517_v18  ;;  %v9518_v43 = vld [vmem:[#allocation42_spill] sm:$0xff]  ;;  %v2434_v40 = vmul.f32 %v9497_v28, %v9519_v46  ;;  %v9520_v33 = vld [vmem:[#allocation32_spill] sm:$0xff]  ;;  %v9523_v61 = vld [vmem:[#allocation47_spill] sm:$0xff]  ;;  %v7284_v49 = vadd.f32 %v2419_v48, %v7127_v8 }
 0x248   :  { %v2433_v0 = vmul.f32 %v9497_v28, %v9518_v43  ;;  %v2435_v29 = vmul.f32 %v9497_v28, %v9520_v33  ;;  %v9521_v51 = vld [vmem:[#allocation84_spill] sm:$0xff]  ;;  %v9522_v2 = vld [vmem:[#allocation46_spill] sm:$0xff]  ;;  %v2438_v53 = vmul.f32 %v9497_v28, %v9523_v61  ;;  %v9524_v11 = vld [vmem:[#allocation61_spill] sm:$0xff]  ;;  %v2442_v33 = vmul.f32 0.0, %v9497_v28 }
 0x249   :  { %v2436_v47 = vmul.f32 %v9497_v28, %v9521_v51  ;;  %v2437_v50 = vmul.f32 %v9497_v28, %v9522_v2  ;;  %v2439_v18 = vmul.f32 %v9497_v28, %v9524_v11  ;;  %v9525_v45 = vld [vmem:[#allocation16_spill] sm:$0xff]  ;;  %v7266_v51 = vadd.f32 %v2413_v21, %v7109_v26  ;;  %v9543_v48 = vld [vmem:[#allocation77_spill] sm:$0xff] }
 0x24a   :  { %v2440_v43 = vmul.f32 %v9497_v28, %v9525_v45  ;;  %v9526_v16 = vld [vmem:[#allocation24_spill] sm:$0xff]  ;;  %v7269_v2 = vadd.f32 %v2414_v52, %v7112_v7  ;;  %v7272_v61 = vadd.f32 %v2415_v62, %v7115_v54  ;;  %v7275_v11 = vadd.f32 %v2416_v42, %v7118_v39 }
 0x24b   :  { %v2441_v46 = vmul.f32 %v9497_v28, %v9526_v16  ;;  %v7278_v45 = vadd.f32 %v2417_v12, %v7121_v1  ;;  %v7281_v16 = vadd.f32 %v2418_v57, %v7124_v63  ;;  %v7287_v26 = vadd.f32 %v2420_v55, %v7130_v38  ;;  %v9542_v57 = vld [vmem:[#allocation109_spill] sm:$0xff] }
 0x24c   :  { %v7290_v7 = vadd.f32 %v2421_v4, %v7133_v31  ;;  %v7293_v54 = vadd.f32 %v2422_v56, %v7136_v58  ;;  %v7296_v39 = vadd.f32 %v2423_v30, %v7139_v15  ;;  %v7299_v1 = vadd.f32 %v2424_v5, %v7142_v60  ;;  %v9544_v4 = vld [vmem:[#allocation80_spill] sm:$0xff]  ;;  %v9545_v30 = vld [vmem:[#allocation75_spill] sm:$0xff] }
 0x24d   :  { %v7302_v63 = vadd.f32 %v2425_v10, %v7145_v23  ;;  %v7305_v8 = vadd.f32 %v2426_v25, %v7148_v20  ;;  %v7308_v38 = vadd.f32 %v2427_v32, %v7151_v14  ;;  %v7311_v31 = vadd.f32 %v2428_v35, %v7154_v9  ;;  %v9546_v10 = vld [vmem:[#allocation88_spill] sm:$0xff]  ;;  %v9547_v32 = vld [vmem:[#allocation38_spill] sm:$0xff] }
 0x24e   :  { %v7314_v58 = vadd.f32 %v2429_v27, %v7157_v13  ;;  %v7317_v15 = vadd.f32 %v2430_v24, %v7160_v44  ;;  %v7320_v60 = vadd.f32 %v2431_v37, %v7163_v36  ;;  %v7323_v23 = vadd.f32 %v2432_v34, %v7166_v22  ;;  %v9528_v44 = vld [vmem:[#allocation59_spill] sm:$0xff]  ;;  %v9532_v22 = vld [vmem:[#allocation17_spill] sm:$0xff]  ;;  %v9548_v27 = vld [vmem:[#allocation104_spill] sm:$0xff] }
 0x24f   :  { %v7326_v20 = vadd.f32 %v2433_v0, %v7169_v59  ;;  %v7329_v14 = vadd.f32 %v2434_v40, %v7172_v17  ;;  %v7332_v9 = vadd.f32 %v2435_v29, %v7175_v41  ;;  %v7335_v13 = vadd.f32 %v2436_v47, %v7178_v6  ;;  %v9530_v36 = vld [vmem:[#allocation115_spill] sm:$0xff]  ;;  %v9534_v59 = vld [vmem:[#allocation70_spill] sm:$0xff]  ;;  %v9538_v41 = vld [vmem:[#allocation49_spill] sm:$0xff] }
 0x250   :  { %v7338_v28 = vadd.f32 %v2437_v50, %v9528_v44  ;;  %v7341_v3 = vadd.f32 %v2438_v53, %v9530_v36  ;;  %v7344_v21 = vadd.f32 %v2439_v18, %v9532_v22  ;;  %v7347_v52 = vadd.f32 %v2440_v43, %v9534_v59  ;;  %v9536_v17 = vld [vmem:[#allocation11_spill] sm:$0xff]  ;;  %v9540_v6 = vld [vmem:[#allocation33_spill] sm:$0xff]  ;;  %v9549_v37 = vld [vmem:[#allocation34_spill] sm:$0xff] }
 0x251   :  { %9527 = vst [vmem:[#allocation68_spill] sm:$0xff] %v7335_v13  ;;  %v7350_v62 = vadd.f32 %v2441_v46, %v9536_v17  ;;  %v7353_v42 = vadd.f32 %v2442_v33, %v9538_v41  ;;  %v7356_v12 = vadd.f32 %v2442_v33, %v9540_v6  ;;  %v2476_v55 = vmul.f32 %v9543_v48, %v9542_v57  ;;  %v9550_v0 = vld [vmem:[#allocation81_spill] sm:$0xff]  ;;  %v9551_v29 = vld [vmem:[#allocation100_spill] sm:$0xff]  ;;  %v9553_v18 = vld [vmem:[#allocation35_spill] sm:$0xff] }
 0x252   :  { %9529 = vst [vmem:[#allocation12_spill] sm:$0xff] %v7338_v28  ;;  %9531 = vst [vmem:[#allocation76_spill] sm:$0xff] %v7341_v3  ;;  %v2477_v56 = vmul.f32 %v9543_v48, %v9544_v4  ;;  %v2478_v5 = vmul.f32 %v9543_v48, %v9545_v30  ;;  %v2479_v25 = vmul.f32 %v9543_v48, %v9546_v10  ;;  %v9552_v50 = vld [vmem:[#allocation89_spill] sm:$0xff]  ;;  %v9557_v17 = vld [vmem:[#allocation36_spill] sm:$0xff] }
 0x253   :  { %9533 = vst [vmem:[#allocation29_spill] sm:$0xff] %v7344_v21  ;;  %9535 = vst [vmem:[#allocation63_spill] sm:$0xff] %v7347_v52  ;;  %v2480_v35 = vmul.f32 %v9543_v48, %v9547_v32  ;;  %v2481_v24 = vmul.f32 %v9543_v48, %v9548_v27  ;;  %v2482_v34 = vmul.f32 %v9543_v48, %v9549_v37  ;;  %v9554_v46 = vld [vmem:[#allocation97_spill] sm:$0xff]  ;;  %v9558_v6 = vld [vmem:[#allocation82_spill] sm:$0xff] }
 0x254   :  { %9537 = vst [vmem:[#allocation37_spill] sm:$0xff] %v7350_v62  ;;  %9539 = vst [vmem:[#allocation20_spill] sm:$0xff] %v7353_v42  ;;  %v2483_v40 = vmul.f32 %v9543_v48, %v9550_v0  ;;  %v2484_v47 = vmul.f32 %v9543_v48, %v9551_v29  ;;  %v2485_v53 = vmul.f32 %v9543_v48, %v9552_v50  ;;  %v9555_v44 = vld [vmem:[#allocation85_spill] sm:$0xff]  ;;  %v9559_v4 = vld [vmem:[#allocation86_spill] sm:$0xff] }
 0x255   :  { %9541 = vst [vmem:[#allocation30_spill] sm:$0xff] %v7356_v12  ;;  %v2486_v43 = vmul.f32 %v9543_v48, %v9553_v18  ;;  %v2487_v33 = vmul.f32 %v9543_v48, %v9554_v46  ;;  %v2488_v36 = vmul.f32 %v9543_v48, %v9555_v44  ;;  %v9556_v22 = vld [vmem:[#allocation105_spill] sm:$0xff]  ;;  %v2490_v41 = vmul.f32 %v9543_v48, %v9557_v17  ;;  %v9560_v10 = vld [vmem:[#allocation90_spill] sm:$0xff]  ;;  %v9561_v27 = vld [vmem:[#allocation79_spill] sm:$0xff] }
 0x256   :  { %v2489_v59 = vmul.f32 %v9543_v48, %v9556_v22  ;;  %v2491_v57 = vmul.f32 %v9543_v48, %v9558_v6  ;;  %v2492_v30 = vmul.f32 %v9543_v48, %v9559_v4  ;;  %v2493_v32 = vmul.f32 %v9543_v48, %v9560_v10  ;;  %v9562_v0 = vld [vmem:[#allocation98_spill] sm:$0xff]  ;;  %v9565_v22 = vld [vmem:[#allocation15_spill] sm:$0xff]  ;;  %v9571_v21 = vld [vmem:[#allocation96_spill] sm:$0xff] }
 0x257   :  { %v2494_v37 = vmul.f32 %v9543_v48, %v9561_v27  ;;  %v2495_v29 = vmul.f32 %v9543_v48, %v9562_v0  ;;  %v9563_v50 = vld [vmem:[#allocation102_spill] sm:$0xff]  ;;  %v2498_v17 = vmul.f32 %v9543_v48, %v9565_v22  ;;  %v9566_v6 = vld [vmem:[#allocation83_spill] sm:$0xff]  ;;  %v2507_v28 = vadd.f32 %v2476_v55, %v7263_v19 }
 0x258   :  { %v2496_v18 = vmul.f32 %v9543_v48, %v9563_v50  ;;  %v9564_v46 = vld [vmem:[#allocation106_spill] sm:$0xff]  ;;  %v2499_v4 = vmul.f32 %v9543_v48, %v9566_v6  ;;  %v9567_v12 = vld [vmem:[#allocation87_spill] sm:$0xff]  ;;  %v2506_v6 = vmul.f32 0.0, %v9543_v48  ;;  %v2512_v13 = vadd.f32 %v2481_v24, %v7278_v45 }
 0x259   :  { %v2497_v44 = vmul.f32 %v9543_v48, %v9564_v46  ;;  %v2500_v10 = vmul.f32 %v9543_v48, %v9567_v12  ;;  %v9568_v42 = vld [vmem:[#allocation91_spill] sm:$0xff]  ;;  %v2504_v46 = vmul.f32 %v9543_v48, %v9571_v21  ;;  %v2509_v12 = vadd.f32 %v2478_v5, %v7269_v2 }
 0x25a   :  { %v2501_v27 = vmul.f32 %v9543_v48, %v9568_v42  ;;  %v9569_v62 = vld [vmem:[#allocation95_spill] sm:$0xff]  ;;  %v2508_v42 = vadd.f32 %v2477_v56, %v7266_v51  ;;  %v2513_v21 = vadd.f32 %v2482_v34, %v7281_v16  ;;  %v2516_v19 = vadd.f32 %v2485_v53, %v7290_v7 }
 0x25b   :  { %v2502_v0 = vmul.f32 %v9543_v48, %v9569_v62  ;;  %v9570_v52 = vld [vmem:[#allocation99_spill] sm:$0xff]  ;;  %v2510_v62 = vadd.f32 %v2479_v25, %v7272_v61  ;;  %v2517_v55 = vadd.f32 %v2486_v43, %v7293_v54  ;;  %v2518_v51 = vadd.f32 %v2487_v33, %v7296_v39  ;;  %v9578_v34 = vld [vmem:[#allocation37_spill] sm:$0xff] }
 0x25c   :  { %v2503_v50 = vmul.f32 %v9543_v48, %v9570_v52  ;;  %v9572_v3 = vld [vmem:[#allocation107_spill] sm:$0xff]  ;;  %v2511_v52 = vadd.f32 %v2480_v35, %v7275_v11  ;;  %v2519_v2 = vadd.f32 %v2488_v36, %v7299_v1  ;;  %v2520_v61 = vadd.f32 %v2489_v59, %v7302_v63  ;;  %v9576_v35 = vld [vmem:[#allocation29_spill] sm:$0xff] }
 0x25d   :  { %v2505_v22 = vmul.f32 %v9543_v48, %v9572_v3  ;;  %v2514_v3 = vadd.f32 %v2483_v40, %v7284_v49  ;;  %v2515_v48 = vadd.f32 %v2484_v47, %v7287_v26  ;;  %v2521_v11 = vadd.f32 %v2490_v41, %v7305_v8  ;;  %v9573_v8 = vld [vmem:[#allocation68_spill] sm:$0xff]  ;;  %v9577_v24 = vld [vmem:[#allocation63_spill] sm:$0xff]  ;;  %v9580_v47 = vld [vmem:[#allocation30_spill] sm:$0xff] }
 0x25e   :  { %v2522_v45 = vadd.f32 %v2491_v57, %v7308_v38  ;;  %v2523_v16 = vadd.f32 %v2492_v30, %v7311_v31  ;;  %v2524_v49 = vadd.f32 %v2493_v32, %v7314_v58  ;;  %v2525_v26 = vadd.f32 %v2494_v37, %v7317_v15  ;;  %v9574_v38 = vld [vmem:[#allocation12_spill] sm:$0xff] }
 0x25f   :  { %v2526_v7 = vadd.f32 %v2495_v29, %v7320_v60  ;;  %v2527_v54 = vadd.f32 %v2496_v18, %v7323_v23  ;;  %v2528_v39 = vadd.f32 %v2497_v44, %v7326_v20  ;;  %v2529_v1 = vadd.f32 %v2498_v17, %v7329_v14  ;;  %v9575_v31 = vld [vmem:[#allocation76_spill] sm:$0xff] }
 0x260   :  { %v2530_v63 = vadd.f32 %v2499_v4, %v7332_v9  ;;  %v2531_v56 = vadd.f32 %v2500_v10, %v9573_v8  ;;  %v2532_v5 = vadd.f32 %v2501_v27, %v9574_v38  ;;  %v2533_v25 = vadd.f32 %v2502_v0, %v9575_v31  ;;  %v9579_v40 = vld [vmem:[#allocation20_spill] sm:$0xff] }
 0x261   :  { %v2534_v58 = vadd.f32 %v2503_v50, %v9576_v35  ;;  %v2535_v15 = vadd.f32 %v2504_v46, %v9577_v24  ;;  %v2536_v60 = vadd.f32 %v2505_v22, %v9578_v34  ;;  %v2537_v23 = vadd.f32 %v2506_v6, %v9579_v40 }
 0x262   :  { %v2538_v20 = vadd.f32 %v2506_v6, %v9580_v47  ;;  %v2540_v53 = vstv %s7420_s28 }
 0x263   :  { %v2541_v14 = vadd.f32 %v2540_v53, %v2507_v28  ;;  %v2542_v43 = vadd.f32 %v2540_v53, %v2508_v42  ;;  %v2543_v9 = vadd.f32 %v2540_v53, %v2509_v12  ;;  %v2544_v33 = vadd.f32 %v2540_v53, %v2510_v62 }
 0x264   :  { %v2545_v36 = vadd.f32 %v2540_v53, %v2511_v52  ;;  %v2546_v59 = vadd.f32 %v2540_v53, %v2512_v13  ;;  %v2547_v41 = vadd.f32 %v2540_v53, %v2513_v21  ;;  %v2548_v57 = vadd.f32 %v2540_v53, %v2514_v3 }
 0x265   :  { %v2549_v30 = vadd.f32 %v2540_v53, %v2515_v48  ;;  %v2550_v32 = vadd.f32 %v2540_v53, %v2516_v19  ;;  %v2551_v37 = vadd.f32 %v2540_v53, %v2517_v55  ;;  %v2552_v29 = vadd.f32 %v2540_v53, %v2518_v51  ;;  %v2735_v19 = vld [vmem:[%s7748_s0] sm:$0xff]  ;;  %v2736_v51 = vld [vmem:[%s7748_s0 + $0x8] sm:$0xff] }
 0x266   :  { %v2553_v18 = vadd.f32 %v2540_v53, %v2519_v2  ;;  %v2554_v44 = vadd.f32 %v2540_v53, %v2520_v61  ;;  %v2555_v17 = vadd.f32 %v2540_v53, %v2521_v11  ;;  %v2556_v4 = vadd.f32 %v2540_v53, %v2522_v45  ;;  %v2737_v61 = vld [vmem:[%s7748_s0 + $0x10] sm:$0xff]  ;;  %v2738_v45 = vld [vmem:[%s7748_s0 + $0x18] sm:$0xff] }
 0x267   :  { %v2557_v10 = vadd.f32 %v2540_v53, %v2523_v16  ;;  %v2558_v27 = vadd.f32 %v2540_v53, %v2524_v49  ;;  %v2559_v0 = vadd.f32 %v2540_v53, %v2525_v26  ;;  %v2560_v50 = vadd.f32 %v2540_v53, %v2526_v7  ;;  %v2739_v49 = vld [vmem:[%s7748_s0 + $0x20] sm:$0xff]  ;;  %v2740_v7 = vld [vmem:[%s7748_s0 + $0x28] sm:$0xff] }
 0x268   :  { %v2561_v28 = vadd.f32 %v2540_v53, %v2527_v54  ;;  %v2562_v46 = vadd.f32 %v2540_v53, %v2528_v39  ;;  %v2563_v22 = vadd.f32 %v2540_v53, %v2529_v1  ;;  %v2564_v6 = vadd.f32 %v2540_v53, %v2530_v63  ;;  %v2741_v39 = vld [vmem:[%s7748_s0 + $0x30] sm:$0xff]  ;;  %v2742_v63 = vld [vmem:[%s7748_s0 + $0x38] sm:$0xff] }
 0x269   :  { %v2565_v42 = vadd.f32 %v2540_v53, %v2531_v56  ;;  %v2566_v13 = vadd.f32 %v2540_v53, %v2532_v5  ;;  %v2567_v12 = vadd.f32 %v2540_v53, %v2533_v25  ;;  %v2568_v62 = vadd.f32 %v2540_v53, %v2534_v58  ;;  %v2743_v56 = vld [vmem:[%s7748_s0 + $0x40] sm:$0xff]  ;;  %v2744_v5 = vld [vmem:[%s7748_s0 + $0x48] sm:$0xff]  ;;  %v2745_v25 = vld [vmem:[%s7748_s0 + $0x50] sm:$0xff] }
 0x26a   :  { %v2569_v52 = vadd.f32 %v2540_v53, %v2535_v15  ;;  %v2570_v21 = vadd.f32 %v2540_v53, %v2536_v60  ;;  %v7454_v3 = vadd.f32 %v2540_v53, %v2537_v23  ;;  %v7456_v48 = vadd.f32 %v2540_v53, %v2538_v20  ;;  %v2746_v58 = vld [vmem:[%s7748_s0 + $0x58] sm:$0xff]  ;;  %v2747_v15 = vld [vmem:[%s7748_s0 + $0x60] sm:$0xff]  ;;  %v2748_v60 = vld [vmem:[%s7748_s0 + $0x68] sm:$0xff] }
 0x26b   :  { %v7461_v55 = vadd.f32 %v2735_v19, %v2541_v14  ;;  %v7466_v2 = vadd.f32 %v2736_v51, %v2542_v43  ;;  %v7471_v11 = vadd.f32 %v2737_v61, %v2543_v9  ;;  %v7476_v16 = vadd.f32 %v2738_v45, %v2544_v33  ;;  %v2749_v23 = vld [vmem:[%s7748_s0 + $0x70] sm:$0xff]  ;;  %v2750_v20 = vld [vmem:[%s7748_s0 + $0x78] sm:$0xff]  ;;  %v2751_v14 = vld [vmem:[%s7748_s0 + $0x80] sm:$0xff] }
 0x26c   :  { %v7481_v26 = vadd.f32 %v2739_v49, %v2545_v36  ;;  %v7486_v54 = vadd.f32 %v2740_v7, %v2546_v59  ;;  %v7491_v1 = vadd.f32 %v2741_v39, %v2547_v41  ;;  %v7496_v8 = vadd.f32 %v2742_v63, %v2548_v57  ;;  %v2752_v9 = vld [vmem:[%s7748_s0 + $0x88] sm:$0xff]  ;;  %v2753_v36 = vld [vmem:[%s7748_s0 + $0x90] sm:$0xff]  ;;  %v2754_v41 = vld [vmem:[%s7748_s0 + $0x98] sm:$0xff] }
 0x26d   :  { %v7501_v38 = vadd.f32 %v2743_v56, %v2549_v30  ;;  %v7506_v31 = vadd.f32 %v2744_v5, %v2550_v32  ;;  %v7511_v35 = vadd.f32 %v2745_v25, %v2551_v37  ;;  %v7516_v24 = vadd.f32 %v2746_v58, %v2552_v29  ;;  %v2755_v30 = vld [vmem:[%s7748_s0 + $0xa0] sm:$0xff]  ;;  %v2756_v37 = vld [vmem:[%s7748_s0 + $0xa8] sm:$0xff] }
 0x26e   :  { %v7521_v34 = vadd.f32 %v2747_v15, %v2553_v18  ;;  %v7526_v40 = vadd.f32 %v2748_v60, %v2554_v44  ;;  %v7531_v47 = vadd.f32 %v2749_v23, %v2555_v17  ;;  %v7536_v53 = vadd.f32 %v2750_v20, %v2556_v4  ;;  %v2757_v18 = vld [vmem:[%s7748_s0 + $0xb0] sm:$0xff]  ;;  %v2758_v17 = vld [vmem:[%s7748_s0 + $0xb8] sm:$0xff] }
 0x26f   :  { %v7541_v43 = vadd.f32 %v2751_v14, %v2557_v10  ;;  %v7546_v33 = vadd.f32 %v2752_v9, %v2558_v27  ;;  %v7551_v59 = vadd.f32 %v2753_v36, %v2559_v0  ;;  %v7556_v57 = vadd.f32 %v2754_v41, %v2560_v50  ;;  %v2759_v10 = vld [vmem:[%s7748_s0 + $0xc0] sm:$0xff]  ;;  %v2760_v0 = vld [vmem:[%s7748_s0 + $0xc8] sm:$0xff] }
 0x270   :  { %v7561_v32 = vadd.f32 %v2755_v30, %v2561_v28  ;;  %v7566_v29 = vadd.f32 %v2756_v37, %v2562_v46  ;;  %v7571_v44 = vadd.f32 %v2757_v18, %v2563_v22  ;;  %v7576_v4 = vadd.f32 %v2758_v17, %v2564_v6  ;;  %v2761_v28 = vld [vmem:[%s7748_s0 + $0xd0] sm:$0xff]  ;;  %v2762_v22 = vld [vmem:[%s7748_s0 + $0xd8] sm:$0xff] }
 0x271   :  { %v7581_v27 = vadd.f32 %v2759_v10, %v2565_v42  ;;  %v7586_v50 = vadd.f32 %v2760_v0, %v2566_v13  ;;  %v7591_v46 = vadd.f32 %v2761_v28, %v2567_v12  ;;  %v7596_v6 = vadd.f32 %v2762_v22, %v2568_v62  ;;  %v2763_v42 = vld [vmem:[%s7748_s0 + $0xe0] sm:$0xff]  ;;  %v2764_v13 = vld [vmem:[%s7748_s0 + $0xe8] sm:$0xff]  ;;  %v2765_v12 = vld [vmem:[%s7748_s0 + $0xf0] sm:$0xff] }
 0x272   :  { %v7601_v19 = vadd.f32 %v2763_v42, %v2569_v52  ;;  %v7606_v51 = vadd.f32 %v2764_v13, %v2570_v21  ;;  %v7612_v61 = vadd.f32 %v2765_v12, %v7454_v3  ;;  %v2766_v62 = vld [vmem:[%s7748_s0 + $0xf8] sm:$0xff]  ;;  %v2605_v45 = vmax.f32 %v7461_v55, 0.0 }
 0x273   :  { %v7618_v52 = vadd.f32 %v2766_v62, %v7456_v48  ;;  %v2606_v49 = vmax.f32 %v7466_v2, 0.0  ;;  %v2607_v21 = vmax.f32 %v7471_v11, 0.0  ;;  %v2608_v7 = vmax.f32 %v7476_v16, 0.0 }
 0x274   :  { %v2609_v39 = vmax.f32 %v7481_v26, 0.0  ;;  %v2610_v3 = vmax.f32 %v7486_v54, 0.0  ;;  %v2611_v63 = vmax.f32 %v7491_v1, 0.0  ;;  %v2612_v56 = vmax.f32 %v7496_v8, 0.0  ;;  %2637 = vst [vmem:[%s7751_s3] sm:$0xff] %v2605_v45 }
 0x275   :  { %v2613_v5 = vmax.f32 %v7501_v38, 0.0  ;;  %v2614_v48 = vmax.f32 %v7506_v31, 0.0  ;;  %v2615_v55 = vmax.f32 %v7511_v35, 0.0  ;;  %v2616_v2 = vmax.f32 %v7516_v24, 0.0  ;;  %2638 = vst [vmem:[%s7751_s3 + $0x8] sm:$0xff] %v2606_v49  ;;  %2639 = vst [vmem:[%s7751_s3 + $0x10] sm:$0xff] %v2607_v21 }
 0x276   :  { %2640 = vst [vmem:[%s7751_s3 + $0x18] sm:$0xff] %v2608_v7  ;;  %v2617_v11 = vmax.f32 %v7521_v34, 0.0  ;;  %v2618_v16 = vmax.f32 %v7526_v40, 0.0  ;;  %v2619_v26 = vmax.f32 %v7531_v47, 0.0  ;;  %v2620_v54 = vmax.f32 %v7536_v53, 0.0  ;;  %2641 = vst [vmem:[%s7751_s3 + $0x20] sm:$0xff] %v2609_v39 }
 0x277   :  { %2642 = vst [vmem:[%s7751_s3 + $0x28] sm:$0xff] %v2610_v3  ;;  %2643 = vst [vmem:[%s7751_s3 + $0x30] sm:$0xff] %v2611_v63  ;;  %v2621_v1 = vmax.f32 %v7541_v43, 0.0  ;;  %v2622_v8 = vmax.f32 %v7546_v33, 0.0  ;;  %v2623_v38 = vmax.f32 %v7551_v59, 0.0  ;;  %v2624_v31 = vmax.f32 %v7556_v57, 0.0 }
 0x278   :  { %2644 = vst [vmem:[%s7751_s3 + $0x38] sm:$0xff] %v2612_v56  ;;  %2645 = vst [vmem:[%s7751_s3 + $0x40] sm:$0xff] %v2613_v5  ;;  %v2625_v25 = vmax.f32 %v7561_v32, 0.0  ;;  %v2626_v35 = vmax.f32 %v7566_v29, 0.0  ;;  %v2627_v58 = vmax.f32 %v7571_v44, 0.0  ;;  %v2628_v24 = vmax.f32 %v7576_v4, 0.0 }
 0x279   :  { %2646 = vst [vmem:[%s7751_s3 + $0x48] sm:$0xff] %v2614_v48  ;;  %2647 = vst [vmem:[%s7751_s3 + $0x50] sm:$0xff] %v2615_v55  ;;  %v2629_v15 = vmax.f32 %v7581_v27, 0.0  ;;  %v2630_v34 = vmax.f32 %v7586_v50, 0.0  ;;  %v2631_v60 = vmax.f32 %v7591_v46, 0.0  ;;  %v2632_v40 = vmax.f32 %v7596_v6, 0.0 }
 0x27a   :  { %2648 = vst [vmem:[%s7751_s3 + $0x58] sm:$0xff] %v2616_v2  ;;  %2649 = vst [vmem:[%s7751_s3 + $0x60] sm:$0xff] %v2617_v11  ;;  %v2633_v23 = vmax.f32 %v7601_v19, 0.0  ;;  %v2634_v47 = vmax.f32 %v7606_v51, 0.0  ;;  %v2635_v20 = vmax.f32 %v7612_v61, 0.0  ;;  %v2636_v53 = vmax.f32 %v7618_v52, 0.0 }
 0x27b   :  { %2650 = vst [vmem:[%s7751_s3 + $0x68] sm:$0xff] %v2618_v16  ;;  %2651 = vst [vmem:[%s7751_s3 + $0x70] sm:$0xff] %v2619_v26 }
 0x27c   :  { %2652 = vst [vmem:[%s7751_s3 + $0x78] sm:$0xff] %v2620_v54  ;;  %2653 = vst [vmem:[%s7751_s3 + $0x80] sm:$0xff] %v2621_v1 }
 0x27d   :  { %2654 = vst [vmem:[%s7751_s3 + $0x88] sm:$0xff] %v2622_v8  ;;  %2655 = vst [vmem:[%s7751_s3 + $0x90] sm:$0xff] %v2623_v38 }
 0x27e   :  { %2656 = vst [vmem:[%s7751_s3 + $0x98] sm:$0xff] %v2624_v31  ;;  %2657 = vst [vmem:[%s7751_s3 + $0xa0] sm:$0xff] %v2625_v25 }
 0x27f   :  { %2658 = vst [vmem:[%s7751_s3 + $0xa8] sm:$0xff] %v2626_v35  ;;  %2659 = vst [vmem:[%s7751_s3 + $0xb0] sm:$0xff] %v2627_v58 }
 0x280   :  { %2660 = vst [vmem:[%s7751_s3 + $0xb8] sm:$0xff] %v2628_v24  ;;  %2661 = vst [vmem:[%s7751_s3 + $0xc0] sm:$0xff] %v2629_v15 }
 0x281   :  { %2662 = vst [vmem:[%s7751_s3 + $0xc8] sm:$0xff] %v2630_v34  ;;  %2663 = vst [vmem:[%s7751_s3 + $0xd0] sm:$0xff] %v2631_v60 }
 0x282   :  { %2664 = vst [vmem:[%s7751_s3 + $0xd8] sm:$0xff] %v2632_v40  ;;  %2665 = vst [vmem:[%s7751_s3 + $0xe0] sm:$0xff] %v2633_v23 }
 0x283   :  { %2666 = vst [vmem:[%s7751_s3 + $0xe8] sm:$0xff] %v2634_v47  ;;  %2667 = vst [vmem:[%s7751_s3 + $0xf0] sm:$0xff] %v2635_v20 }
 0x284   :  { %2668 = vst [vmem:[%s7751_s3 + $0xf8] sm:$0xff] %v2636_v53 }
 0x285   :  { %2673 = vsyncpa [#allocation3], 1 }
 0x286   :  { %2674 = vsyncpa [#allocation5], 1 }

</bundles_post_ra>
